<compile_context>
chip_gen: v6e
topology: v6e:2x2x1
jax: 0.10.0
libtpu: 0.0.40
codegen_flags: <defaults>
</compile_context>

<pallas_src>
import jax
import jax.numpy as jnp
from jax.experimental import pallas as pl
from jax.experimental.pallas import tpu as pltpu


def _round_up(x, m):
    return ((x + m - 1) // m) * m


# ----------------------------------------------------------------------------
# Single fused kernel: grid = (num_layers,) sequential ("arbitrary").
#   Layer l consumes the sequence produced by layer l-1, held in VMEM scratch.
#   The last layer additionally runs the Linear + LogSoftmax head.
# ----------------------------------------------------------------------------
def _decoder_kernel(gx0_ref, wih_ref, whh_ref, b_ref, h0_ref, c0_ref,   # inputs
                    lw_ref, lb_ref,
                    logp_ref, hn_ref, cn_ref,                            # outputs
                    seq_ref, gx_ref):                                    # VMEM scratch
    l = pl.program_id(0)
    last = pl.num_programs(0) - 1
    TB, G = gx_ref.shape                 # (T*Bp, 4*Hp)
    Bp, Hp = hn_ref.shape
    T = TB // Bp

    # Hoisted input-side projection (one matmul per layer, off the serial chain).
    # Layer 0's projection was pre-folded into the gathered table -> just a VMEM copy.
    @pl.when(l == 0)
    def _():
        gx_ref[...] = gx0_ref[...]

    @pl.when(l > 0)
    def _():
        gx_ref[...] = jnp.dot(seq_ref[...].astype(jnp.bfloat16), wih_ref[...],
                              preferred_element_type=jnp.float32) + b_ref[...]

    def step(t, carry):
        h, c = carry                                    # (Bp, Hp) f32, vreg carries
        row = pl.multiple_of(t * Bp, Bp)                # sublane-aligned (Bp % 8 == 0)
        gates = gx_ref[pl.ds(row, Bp), :] + jnp.dot(
            h.astype(jnp.bfloat16), whh_ref[...], preferred_element_type=jnp.float32)
        i = jax.nn.sigmoid(gates[:, 0 * Hp:1 * Hp])
        f = jax.nn.sigmoid(gates[:, 1 * Hp:2 * Hp])
        g = jnp.tanh(gates[:, 2 * Hp:3 * Hp])
        o = jax.nn.sigmoid(gates[:, 3 * Hp:4 * Hp])
        c = f * c + i * g
        h = o * jnp.tanh(c)
        seq_ref[pl.ds(row, Bp), :] = h                  # this layer's output -> next layer input
        return (h, c)

    h, c = jax.lax.fori_loop(0, T, step, (h0_ref[...], c0_ref[...]), unroll=True)
    hn_ref[...] = h
    cn_ref[...] = c

    # Fused output head on the VMEM-resident last-layer sequence.
    @pl.when(l == last)
    def _():
        z = jnp.dot(seq_ref[...].astype(jnp.bfloat16), lw_ref[...],
                    preferred_element_type=jnp.float32) + lb_ref[...]
        m = jnp.max(z, axis=-1, keepdims=True)
        lse = jnp.log(jnp.sum(jnp.exp(z - m), axis=-1, keepdims=True)) + m
        logp_ref[...] = z - lse


def lstm_decoder_pallas(gx0, w_ih, w_hh, bias, h0, c0, lin_w, lin_b):
    """gx0: (T*Bp, 4Hp) f32 layer-0 gates (embedding+fc+W_ih0+b0 pre-folded, time-major).
       w_ih/w_hh: (L, Hp, 4Hp) bf16; bias: (L, 1, 4Hp) f32 (layer 0 slot unused);
       h0/c0: (L, Bp, Hp) f32; lin_w: (Hp, Vp) bf16; lin_b: (1, Vp) f32.
       Returns: log_probs (T*Bp, Vp) f32, h_n, c_n (L, Bp, Hp) f32."""
    TB, G = gx0.shape
    L, Bp, Hp = h0.shape
    Vp = lin_w.shape[1]
    grid_spec = pltpu.PrefetchScalarGridSpec(
        num_scalar_prefetch=0,
        grid=(L,),
        in_specs=[
            pl.BlockSpec((TB, G), lambda l: (0, 0)),            # folded layer-0 gates (resident)
            pl.BlockSpec((None, Hp, G), lambda l: (l, 0, 0)),   # W_ih per layer
            pl.BlockSpec((None, Hp, G), lambda l: (l, 0, 0)),   # W_hh per layer
            pl.BlockSpec((None, 1, G), lambda l: (l, 0, 0)),    # bias per layer
            pl.BlockSpec((None, Bp, Hp), lambda l: (l, 0, 0)),  # h0 per layer
            pl.BlockSpec((None, Bp, Hp), lambda l: (l, 0, 0)),  # c0 per layer
            pl.BlockSpec((Hp, Vp), lambda l: (0, 0)),           # head weight (resident)
            pl.BlockSpec((1, Vp), lambda l: (0, 0)),            # head bias (resident)
        ],
        out_specs=[
            pl.BlockSpec((TB, Vp), lambda l: (0, 0)),           # log-probs (lane-dense, written
                                                                #  once at the last layer)
            pl.BlockSpec((None, Bp, Hp), lambda l: (l, 0, 0)),  # h_n
            pl.BlockSpec((None, Bp, Hp), lambda l: (l, 0, 0)),  # c_n
        ],
        scratch_shapes=[
            pltpu.VMEM((TB, Hp), jnp.float32),                  # inter-layer sequence buffer
            pltpu.VMEM((TB, G), jnp.float32),                   # hoisted gates_x buffer
        ],
    )
    return pl.pallas_call(
        _decoder_kernel,
        grid_spec=grid_spec,
        out_shape=(
            jax.ShapeDtypeStruct((TB, Vp), jnp.float32),
            jax.ShapeDtypeStruct((L, Bp, Hp), jnp.float32),
            jax.ShapeDtypeStruct((L, Bp, Hp), jnp.float32),
        ),
        compiler_params=pltpu.CompilerParams(
            dimension_semantics=("arbitrary",),
        ),
    )(gx0, w_ih, w_hh, bias, h0, c0, lin_w, lin_b)


# ----------------------------------------------------------------------------
# Parameter prep (one-time, outside the per-call hot path):
#  lane-pad hidden/vocab, fold embedding + input_fc + layer-0 W_ih/bias into a gather table.
# ----------------------------------------------------------------------------
def prepare_decoder_params(params):
    emb = params["embedding"].astype(jnp.float32)   # (D, E)
    fc_w = params["fc_w"]                           # (E, H)   -- x @ W layout (== torch W.T)
    fc_b = params["fc_b"]                           # (H,)
    w_ih = params["w_ih"]                           # (L, H, 4H) gate order i,f,g,o
    w_hh = params["w_hh"]                           # (L, H, 4H)
    bias = params["bias"]                           # (L, 4H)  -- b_ih + b_hh combined
    lin_w = params["lin_w"]                         # (H, V)
    lin_b = params["lin_b"]                         # (V,)

    L, H, _ = w_ih.shape
    V = lin_w.shape[1]
    Hp = _round_up(H, 128)
    Vp = _round_up(V, 128)

    def pad_gates(w):                               # (..., 4H) -> (..., 4Hp), per-gate zero pad
        shp = w.shape[:-1]
        w = w.reshape(shp + (4, H))
        w = jnp.pad(w, [(0, 0)] * len(shp) + [(0, 0), (0, Hp - H)])
        return w.reshape(shp + (4 * Hp,))

    def pad_in(w):                                  # zero-pad the input-H axis (second to last)
        return jnp.pad(w, [(0, 0)] * (w.ndim - 2) + [(0, Hp - H), (0, 0)])

    w_ih_p = pad_in(pad_gates(w_ih))                # (L, Hp, 4Hp)
    w_hh_p = pad_in(pad_gates(w_hh))                # (L, Hp, 4Hp)
    bias_p = pad_gates(bias)                        # (L, 4Hp)

    # Fold embedding -> input_fc -> layer-0 W_ih / bias into ONE gather table:
    #   table0[tok] = (emb[tok] @ fc_w + fc_b) @ W_ih0 + (b_ih0 + b_hh0)
    hid = emb @ fc_w + fc_b                         # (D, H)
    table0 = pad_gates(hid @ w_ih[0] + bias[0])     # (D, 4Hp)
    bias_p = bias_p.at[0].set(0.0)                  # layer-0 bias now lives in table0 (unused slot)

    lin_w_p = jnp.pad(lin_w, ((0, Hp - H), (0, Vp - V)))
    lin_b_p = jnp.pad(lin_b, ((0, Vp - V),), constant_values=-1e30)  # padded logits -> exp == 0

    return dict(
        table0=table0.astype(jnp.float32),
        w_ih=w_ih_p.astype(jnp.bfloat16),
        w_hh=w_hh_p.astype(jnp.bfloat16),
        bias=bias_p.reshape(L, 1, 4 * Hp).astype(jnp.float32),
        lin_w=lin_w_p.astype(jnp.bfloat16),
        lin_b=lin_b_p.reshape(1, Vp).astype(jnp.float32),
        H=H, Hp=Hp, V=V, Vp=Vp, L=L,
    )


# ----------------------------------------------------------------------------
# LSTMDecoder forward
# ----------------------------------------------------------------------------
def lstm_decoder_forward(tokens, encoder_hidden, prep):
    """tokens: (B, T) int32 token ids; encoder_hidden = (h0, c0), each (L, B, H).
       Returns (log_probs (B, T, V), (h_n, c_n) each (L, B, H))."""
    B, T = tokens.shape
    H, Hp, V, Vp, L = prep["H"], prep["Hp"], prep["V"], prep["Vp"], prep["L"]
    Bp = _round_up(B, 8)

    h0, c0 = encoder_hidden
    h0 = jnp.pad(h0.astype(jnp.float32), ((0, 0), (0, Bp - B), (0, Hp - H)))
    c0 = jnp.pad(c0.astype(jnp.float32), ((0, 0), (0, Bp - B), (0, Hp - H)))

    # Time-major token ids; gather layer-0 gates_x directly from the folded table
    # (embedding + input_fc + W_ih0 + b0 all collapse into one lookup, no transpose pass).
    ids_tm = jnp.pad(tokens.T, ((0, 0), (0, Bp - B))).reshape(T * Bp)
    gx0 = jnp.take(prep["table0"], ids_tm, axis=0)              # (T*Bp, 4Hp) f32

    logp, h_n, c_n = lstm_decoder_pallas(gx0, prep["w_ih"], prep["w_hh"], prep["bias"],
                                         h0, c0, prep["lin_w"], prep["lin_b"])

    # Back to batch_first layout, drop lane/sublane padding.
    logp = logp.reshape(T, Bp, Vp)[:, :B, :V].transpose(1, 0, 2)  # (B, T, V)
    return logp, (h_n[:, :B, :H], c_n[:, :B, :H])


def init_params(key, decode_size, embed, hidden, num_layers):
    ks = jax.random.split(key, 9)
    s = 1.0 / jnp.sqrt(hidden)
    return {
        "embedding": jax.random.normal(ks[0], (decode_size, embed), jnp.float32),
        "fc_w": jax.random.normal(ks[1], (embed, hidden), jnp.float32) * s,
        "fc_b": jax.random.normal(ks[2], (hidden,), jnp.float32) * s,
        "w_ih": jax.random.normal(ks[3], (num_layers, hidden, 4 * hidden), jnp.float32) * s,
        "w_hh": jax.random.normal(ks[4], (num_layers, hidden, 4 * hidden), jnp.float32) * s,
        "bias": (jax.random.normal(ks[5], (num_layers, 4 * hidden), jnp.float32) * s
                 + jax.random.normal(ks[6], (num_layers, 4 * hidden), jnp.float32) * s),
        "lin_w": jax.random.normal(ks[7], (hidden, decode_size), jnp.float32) * s,
        "lin_b": jax.random.normal(ks[8], (decode_size,), jnp.float32) * s,
    }


if __name__ == "__main__":
    DECODE = 50       # decode_size (output vocab)
    EMBED = 128       # embed_size (module default)
    HIDDEN = 32       # hidden_size (lane-padded to 128 inside the wrapper)
    LAYERS = 3        # num_layers
    B, T = 8, 8       # batch, seq_len

    key = jax.random.PRNGKey(0)
    k_param, k_tok, k_h, k_c = jax.random.split(key, 4)
    params = init_params(k_param, DECODE, EMBED, HIDDEN, LAYERS)
    prep = prepare_decoder_params(params)

    tokens = jax.random.randint(k_tok, (B, T), 0, DECODE, dtype=jnp.int32)
    h0 = jax.random.normal(k_h, (LAYERS, B, HIDDEN), jnp.float32)
    c0 = jax.random.normal(k_c, (LAYERS, B, HIDDEN), jnp.float32)

    log_probs, (h_n, c_n) = lstm_decoder_forward(tokens, (h0, c0), prep)
    jax.block_until_ready((log_probs, h_n, c_n))
    assert log_probs.shape == (B, T, DECODE)
    assert h_n.shape == (LAYERS, B, HIDDEN) and c_n.shape == (LAYERS, B, HIDDEN)
    assert bool(jnp.all(jnp.isfinite(log_probs)))
    print("KERNEL_OK")
</pallas_src>

<mosaic_0001>
module attributes {stable_mosaic.version = 11 : i64} {
  func.func @_decoder_kernel(%arg0: i32, %arg1: memref<64x512xf32, #tpu.memory_space<vmem>>, %arg2: memref<1x128x512xbf16, #tpu.memory_space<vmem>>, %arg3: memref<1x128x512xbf16, #tpu.memory_space<vmem>>, %arg4: memref<1x1x512xf32, #tpu.memory_space<vmem>>, %arg5: memref<1x8x128xf32, #tpu.memory_space<vmem>>, %arg6: memref<1x8x128xf32, #tpu.memory_space<vmem>>, %arg7: memref<128x128xbf16, #tpu.memory_space<vmem>>, %arg8: memref<1x128xf32, #tpu.memory_space<vmem>>, %arg9: memref<64x128xf32, #tpu.memory_space<vmem>>, %arg10: memref<1x8x128xf32, #tpu.memory_space<vmem>>, %arg11: memref<1x8x128xf32, #tpu.memory_space<vmem>>, %arg12: memref<64x128xf32, #tpu.memory_space<vmem>>, %arg13: memref<64x512xf32, #tpu.memory_space<vmem>>) attributes {dimension_semantics = [#tpu.dimension_semantics<arbitrary>], iteration_bounds = array<i64: 3>, scalar_prefetch = 0 : i64, scratch_operands = 2 : i64, tpu.core_type = #tpu.core_type<tc>, window_params = [{pipeline_mode = #tpu.pipeline_mode<synchronous>, transform_indices = @transform_0, window_bounds = array<i64: 64, 512>}, {transform_indices = @transform_1, window_bounds = array<i64: 1, 128, 512>}, {transform_indices = @transform_2, window_bounds = array<i64: 1, 128, 512>}, {transform_indices = @transform_3, window_bounds = array<i64: 1, 1, 512>}, {transform_indices = @transform_4, window_bounds = array<i64: 1, 8, 128>}, {transform_indices = @transform_5, window_bounds = array<i64: 1, 8, 128>}, {pipeline_mode = #tpu.pipeline_mode<synchronous>, transform_indices = @transform_6, window_bounds = array<i64: 128, 128>}, {pipeline_mode = #tpu.pipeline_mode<synchronous>, transform_indices = @transform_7, window_bounds = array<i64: 1, 128>}, {pipeline_mode = #tpu.pipeline_mode<synchronous>, transform_indices = @transform_8, window_bounds = array<i64: 64, 128>}, {transform_indices = @transform_9, window_bounds = array<i64: 1, 8, 128>}, {transform_indices = @transform_10, window_bounds = array<i64: 1, 8, 128>}]} {
    %c0_i32 = arith.constant 0 : i32
    %0 = arith.cmpi eq, %arg0, %c0_i32 : i32
    %1 = arith.extui %0 : i1 to i32
    %c0_i32_0 = arith.constant 0 : i32
    %2 = arith.cmpi ne, %1, %c0_i32_0 : i32
    scf.if %2 {
      %c0_96 = arith.constant 0 : index
      %c0_97 = arith.constant 0 : index
      %307 = vector.load %arg1[%c0_96, %c0_97] : memref<64x512xf32, #tpu.memory_space<vmem>>, vector<64x512xf32>
      %c0_98 = arith.constant 0 : index
      %c0_99 = arith.constant 0 : index
      %308 = vector.load %arg13[%c0_98, %c0_99] : memref<64x512xf32, #tpu.memory_space<vmem>>, vector<64x512xf32>
      tpu.vector_store %arg13[%c0_98, %c0_99], %307 {strides = array<i32>} : memref<64x512xf32, #tpu.memory_space<vmem>>, vector<64x512xf32>,
    } else {
    }
    %c0_i32_1 = arith.constant 0 : i32
    %3 = arith.cmpi sgt, %arg0, %c0_i32_1 : i32
    %4 = arith.extui %3 : i1 to i32
    %c0_i32_2 = arith.constant 0 : i32
    %5 = arith.cmpi ne, %4, %c0_i32_2 : i32
    scf.if %5 {
      %c0_96 = arith.constant 0 : index
      %c0_97 = arith.constant 0 : index
      %307 = vector.load %arg12[%c0_96, %c0_97] : memref<64x128xf32, #tpu.memory_space<vmem>>, vector<64x128xf32>
      %308 = arith.truncf %307 : vector<64x128xf32> to vector<64x128xbf16>
      %c0_98 = arith.constant 0 : index
      %c0_99 = arith.constant 0 : index
      %c0_100 = arith.constant 0 : index
      %309 = vector.load %arg2[%c0_98, %c0_99, %c0_100] : memref<1x128x512xbf16, #tpu.memory_space<vmem>>, vector<1x128x512xbf16>
      %310 = vector.shape_cast %309 : vector<1x128x512xbf16> to vector<128x512xbf16>
      %cst_101 = arith.constant dense<0.000000e+00> : vector<64x512xf32>
      %311 = tpu.matmul %308, %310, %cst_101 {dimension_numbers = #tpu.dot_dimension_numbers<[1], [0], [0], [1], [0, 0, 1, 1], [], []>} : vector<64x128xbf16>, vector<128x512xbf16>, vector<64x512xf32> -> vector<64x512xf32>
      %c0_102 = arith.constant 0 : index
      %c0_103 = arith.constant 0 : index
      %c0_104 = arith.constant 0 : index
      %312 = vector.load %arg4[%c0_102, %c0_103, %c0_104] : memref<1x1x512xf32, #tpu.memory_space<vmem>>, vector<1x1x512xf32>
      %313 = vector.shape_cast %312 : vector<1x1x512xf32> to vector<1x512xf32>
      %314 = vector.broadcast %313 : vector<1x512xf32> to vector<64x512xf32>
      %315 = arith.addf %311, %314 : vector<64x512xf32>
      %c0_105 = arith.constant 0 : index
      %c0_106 = arith.constant 0 : index
      %316 = vector.load %arg13[%c0_105, %c0_106] : memref<64x512xf32, #tpu.memory_space<vmem>>, vector<64x512xf32>
      tpu.vector_store %arg13[%c0_105, %c0_106], %315 {strides = array<i32>} : memref<64x512xf32, #tpu.memory_space<vmem>>, vector<64x512xf32>,
    } else {
    }
    %c0 = arith.constant 0 : index
    %c0_3 = arith.constant 0 : index
    %c0_4 = arith.constant 0 : index
    %6 = vector.load %arg5[%c0, %c0_3, %c0_4] : memref<1x8x128xf32, #tpu.memory_space<vmem>>, vector<1x8x128xf32>
    %7 = vector.shape_cast %6 : vector<1x8x128xf32> to vector<8x128xf32>
    %c0_5 = arith.constant 0 : index
    %c0_6 = arith.constant 0 : index
    %c0_7 = arith.constant 0 : index
    %8 = vector.load %arg6[%c0_5, %c0_6, %c0_7] : memref<1x8x128xf32, #tpu.memory_space<vmem>>, vector<1x8x128xf32>
    %9 = vector.shape_cast %8 : vector<1x8x128xf32> to vector<8x128xf32>
    %c0_i32_8 = arith.constant 0 : i32
    %c8_i32 = arith.constant 8 : i32
    %10 = arith.muli %c0_i32_8, %c8_i32 : i32
    %11 = tpu.assume_multiple %10, 8 : i32
    %12 = arith.index_cast %11 : i32 to index
    %c0_9 = arith.constant 0 : index
    %13 = vector.load %arg13[%12, %c0_9] : memref<64x512xf32, #tpu.memory_space<vmem>>, vector<8x512xf32>
    %14 = arith.truncf %7 : vector<8x128xf32> to vector<8x128xbf16>
    %c0_10 = arith.constant 0 : index
    %c0_11 = arith.constant 0 : index
    %c0_12 = arith.constant 0 : index
    %15 = vector.load %arg3[%c0_10, %c0_11, %c0_12] : memref<1x128x512xbf16, #tpu.memory_space<vmem>>, vector<1x128x512xbf16>
    %16 = vector.shape_cast %15 : vector<1x128x512xbf16> to vector<128x512xbf16>
    %cst = arith.constant dense<0.000000e+00> : vector<8x512xf32>
    %17 = tpu.matmul %14, %16, %cst {dimension_numbers = #tpu.dot_dimension_numbers<[1], [0], [0], [1], [0, 0, 1, 1], [], []>} : vector<8x128xbf16>, vector<128x512xbf16>, vector<8x512xf32> -> vector<8x512xf32>
    %18 = arith.addf %13, %17 : vector<8x512xf32>
    %19 = vector.extract_strided_slice %18 {offsets = [0, 0], sizes = [8, 128], strides = [1, 1]} : vector<8x512xf32> to vector<8x128xf32>
    %20 = arith.negf %19 : vector<8x128xf32>
    %21 = math.exp %20 : vector<8x128xf32>
    %cst_13 = arith.constant 1.000000e+00 : f32
    %22 = vector.broadcast %cst_13 : f32 to vector<8x128xf32>
    %23 = arith.addf %22, %21 : vector<8x128xf32>
    %24 = arith.divf %22, %23 : vector<8x128xf32>
    %25 = vector.extract_strided_slice %18 {offsets = [0, 128], sizes = [8, 128], strides = [1, 1]} : vector<8x512xf32> to vector<8x128xf32>
    %26 = arith.negf %25 : vector<8x128xf32>
    %27 = math.exp %26 : vector<8x128xf32>
    %cst_14 = arith.constant 1.000000e+00 : f32
    %28 = vector.broadcast %cst_14 : f32 to vector<8x128xf32>
    %29 = arith.addf %28, %27 : vector<8x128xf32>
    %30 = arith.divf %28, %29 : vector<8x128xf32>
    %31 = vector.extract_strided_slice %18 {offsets = [0, 256], sizes = [8, 128], strides = [1, 1]} : vector<8x512xf32> to vector<8x128xf32>
    %32 = math.tanh %31 : vector<8x128xf32>
    %33 = vector.extract_strided_slice %18 {offsets = [0, 384], sizes = [8, 128], strides = [1, 1]} : vector<8x512xf32> to vector<8x128xf32>
    %34 = arith.negf %33 : vector<8x128xf32>
    %35 = math.exp %34 : vector<8x128xf32>
    %cst_15 = arith.constant 1.000000e+00 : f32
    %36 = vector.broadcast %cst_15 : f32 to vector<8x128xf32>
    %37 = arith.addf %36, %35 : vector<8x128xf32>
    %38 = arith.divf %36, %37 : vector<8x128xf32>
    %39 = arith.mulf %30, %9 : vector<8x128xf32>
    %40 = arith.mulf %24, %32 : vector<8x128xf32>
    %41 = arith.addf %39, %40 : vector<8x128xf32>
    %42 = math.tanh %41 : vector<8x128xf32>
    %43 = arith.mulf %38, %42 : vector<8x128xf32>
    %44 = arith.index_cast %11 : i32 to index
    %c0_16 = arith.constant 0 : index
    %45 = vector.load %arg12[%44, %c0_16] : memref<64x128xf32, #tpu.memory_space<vmem>>, vector<8x128xf32>
    tpu.vector_store %arg12[%44, %c0_16], %43 {strides = array<i32>} : memref<64x128xf32, #tpu.memory_space<vmem>>, vector<8x128xf32>,
    %c1_i32 = arith.constant 1 : i32
    %c8_i32_17 = arith.constant 8 : i32
    %46 = arith.muli %c1_i32, %c8_i32_17 : i32
    %47 = tpu.assume_multiple %46, 8 : i32
    %48 = arith.index_cast %47 : i32 to index
    %c0_18 = arith.constant 0 : index
    %49 = vector.load %arg13[%48, %c0_18] : memref<64x512xf32, #tpu.memory_space<vmem>>, vector<8x512xf32>
    %50 = arith.truncf %43 : vector<8x128xf32> to vector<8x128xbf16>
    %c0_19 = arith.constant 0 : index
    %c0_20 = arith.constant 0 : index
    %c0_21 = arith.constant 0 : index
    %51 = vector.load %arg3[%c0_19, %c0_20, %c0_21] : memref<1x128x512xbf16, #tpu.memory_space<vmem>>, vector<1x128x512xbf16>
    %52 = vector.shape_cast %51 : vector<1x128x512xbf16> to vector<128x512xbf16>
    %cst_22 = arith.constant dense<0.000000e+00> : vector<8x512xf32>
    %53 = tpu.matmul %50, %52, %cst_22 {dimension_numbers = #tpu.dot_dimension_numbers<[1], [0], [0], [1], [0, 0, 1, 1], [], []>} : vector<8x128xbf16>, vector<128x512xbf16>, vector<8x512xf32> -> vector<8x512xf32>
    %54 = arith.addf %49, %53 : vector<8x512xf32>
    %55 = vector.extract_strided_slice %54 {offsets = [0, 0], sizes = [8, 128], strides = [1, 1]} : vector<8x512xf32> to vector<8x128xf32>
    %56 = arith.negf %55 : vector<8x128xf32>
    %57 = math.exp %56 : vector<8x128xf32>
    %cst_23 = arith.constant 1.000000e+00 : f32
    %58 = vector.broadcast %cst_23 : f32 to vector<8x128xf32>
    %59 = arith.addf %58, %57 : vector<8x128xf32>
    %60 = arith.divf %58, %59 : vector<8x128xf32>
    %61 = vector.extract_strided_slice %54 {offsets = [0, 128], sizes = [8, 128], strides = [1, 1]} : vector<8x512xf32> to vector<8x128xf32>
    %62 = arith.negf %61 : vector<8x128xf32>
    %63 = math.exp %62 : vector<8x128xf32>
    %cst_24 = arith.constant 1.000000e+00 : f32
    %64 = vector.broadcast %cst_24 : f32 to vector<8x128xf32>
    %65 = arith.addf %64, %63 : vector<8x128xf32>
    %66 = arith.divf %64, %65 : vector<8x128xf32>
    %67 = vector.extract_strided_slice %54 {offsets = [0, 256], sizes = [8, 128], strides = [1, 1]} : vector<8x512xf32> to vector<8x128xf32>
    %68 = math.tanh %67 : vector<8x128xf32>
    %69 = vector.extract_strided_slice %54 {offsets = [0, 384], sizes = [8, 128], strides = [1, 1]} : vector<8x512xf32> to vector<8x128xf32>
    %70 = arith.negf %69 : vector<8x128xf32>
    %71 = math.exp %70 : vector<8x128xf32>
    %cst_25 = arith.constant 1.000000e+00 : f32
    %72 = vector.broadcast %cst_25 : f32 to vector<8x128xf32>
    %73 = arith.addf %72, %71 : vector<8x128xf32>
    %74 = arith.divf %72, %73 : vector<8x128xf32>
    %75 = arith.mulf %66, %41 : vector<8x128xf32>
    %76 = arith.mulf %60, %68 : vector<8x128xf32>
    %77 = arith.addf %75, %76 : vector<8x128xf32>
    %78 = math.tanh %77 : vector<8x128xf32>
    %79 = arith.mulf %74, %78 : vector<8x128xf32>
    %80 = arith.index_cast %47 : i32 to index
    %c0_26 = arith.constant 0 : index
    %81 = vector.load %arg12[%80, %c0_26] : memref<64x128xf32, #tpu.memory_space<vmem>>, vector<8x128xf32>
    tpu.vector_store %arg12[%80, %c0_26], %79 {strides = array<i32>} : memref<64x128xf32, #tpu.memory_space<vmem>>, vector<8x128xf32>,
    %c2_i32 = arith.constant 2 : i32
    %c8_i32_27 = arith.constant 8 : i32
    %82 = arith.muli %c2_i32, %c8_i32_27 : i32
    %83 = tpu.assume_multiple %82, 8 : i32
    %84 = arith.index_cast %83 : i32 to index
    %c0_28 = arith.constant 0 : index
    %85 = vector.load %arg13[%84, %c0_28] : memref<64x512xf32, #tpu.memory_space<vmem>>, vector<8x512xf32>
    %86 = arith.truncf %79 : vector<8x128xf32> to vector<8x128xbf16>
    %c0_29 = arith.constant 0 : index
    %c0_30 = arith.constant 0 : index
    %c0_31 = arith.constant 0 : index
    %87 = vector.load %arg3[%c0_29, %c0_30, %c0_31] : memref<1x128x512xbf16, #tpu.memory_space<vmem>>, vector<1x128x512xbf16>
    %88 = vector.shape_cast %87 : vector<1x128x512xbf16> to vector<128x512xbf16>
    %cst_32 = arith.constant dense<0.000000e+00> : vector<8x512xf32>
    %89 = tpu.matmul %86, %88, %cst_32 {dimension_numbers = #tpu.dot_dimension_numbers<[1], [0], [0], [1], [0, 0, 1, 1], [], []>} : vector<8x128xbf16>, vector<128x512xbf16>, vector<8x512xf32> -> vector<8x512xf32>
    %90 = arith.addf %85, %89 : vector<8x512xf32>
    %91 = vector.extract_strided_slice %90 {offsets = [0, 0], sizes = [8, 128], strides = [1, 1]} : vector<8x512xf32> to vector<8x128xf32>
    %92 = arith.negf %91 : vector<8x128xf32>
    %93 = math.exp %92 : vector<8x128xf32>
    %cst_33 = arith.constant 1.000000e+00 : f32
    %94 = vector.broadcast %cst_33 : f32 to vector<8x128xf32>
    %95 = arith.addf %94, %93 : vector<8x128xf32>
    %96 = arith.divf %94, %95 : vector<8x128xf32>
    %97 = vector.extract_strided_slice %90 {offsets = [0, 128], sizes = [8, 128], strides = [1, 1]} : vector<8x512xf32> to vector<8x128xf32>
    %98 = arith.negf %97 : vector<8x128xf32>
    %99 = math.exp %98 : vector<8x128xf32>
    %cst_34 = arith.constant 1.000000e+00 : f32
    %100 = vector.broadcast %cst_34 : f32 to vector<8x128xf32>
    %101 = arith.addf %100, %99 : vector<8x128xf32>
    %102 = arith.divf %100, %101 : vector<8x128xf32>
    %103 = vector.extract_strided_slice %90 {offsets = [0, 256], sizes = [8, 128], strides = [1, 1]} : vector<8x512xf32> to vector<8x128xf32>
    %104 = math.tanh %103 : vector<8x128xf32>
    %105 = vector.extract_strided_slice %90 {offsets = [0, 384], sizes = [8, 128], strides = [1, 1]} : vector<8x512xf32> to vector<8x128xf32>
    %106 = arith.negf %105 : vector<8x128xf32>
    %107 = math.exp %106 : vector<8x128xf32>
    %cst_35 = arith.constant 1.000000e+00 : f32
    %108 = vector.broadcast %cst_35 : f32 to vector<8x128xf32>
    %109 = arith.addf %108, %107 : vector<8x128xf32>
    %110 = arith.divf %108, %109 : vector<8x128xf32>
    %111 = arith.mulf %102, %77 : vector<8x128xf32>
    %112 = arith.mulf %96, %104 : vector<8x128xf32>
    %113 = arith.addf %111, %112 : vector<8x128xf32>
    %114 = math.tanh %113 : vector<8x128xf32>
    %115 = arith.mulf %110, %114 : vector<8x128xf32>
    %116 = arith.index_cast %83 : i32 to index
    %c0_36 = arith.constant 0 : index
    %117 = vector.load %arg12[%116, %c0_36] : memref<64x128xf32, #tpu.memory_space<vmem>>, vector<8x128xf32>
    tpu.vector_store %arg12[%116, %c0_36], %115 {strides = array<i32>} : memref<64x128xf32, #tpu.memory_space<vmem>>, vector<8x128xf32>,
    %c3_i32 = arith.constant 3 : i32
    %c8_i32_37 = arith.constant 8 : i32
    %118 = arith.muli %c3_i32, %c8_i32_37 : i32
    %119 = tpu.assume_multiple %118, 8 : i32
    %120 = arith.index_cast %119 : i32 to index
    %c0_38 = arith.constant 0 : index
    %121 = vector.load %arg13[%120, %c0_38] : memref<64x512xf32, #tpu.memory_space<vmem>>, vector<8x512xf32>
    %122 = arith.truncf %115 : vector<8x128xf32> to vector<8x128xbf16>
    %c0_39 = arith.constant 0 : index
    %c0_40 = arith.constant 0 : index
    %c0_41 = arith.constant 0 : index
    %123 = vector.load %arg3[%c0_39, %c0_40, %c0_41] : memref<1x128x512xbf16, #tpu.memory_space<vmem>>, vector<1x128x512xbf16>
    %124 = vector.shape_cast %123 : vector<1x128x512xbf16> to vector<128x512xbf16>
    %cst_42 = arith.constant dense<0.000000e+00> : vector<8x512xf32>
    %125 = tpu.matmul %122, %124, %cst_42 {dimension_numbers = #tpu.dot_dimension_numbers<[1], [0], [0], [1], [0, 0, 1, 1], [], []>} : vector<8x128xbf16>, vector<128x512xbf16>, vector<8x512xf32> -> vector<8x512xf32>
    %126 = arith.addf %121, %125 : vector<8x512xf32>
    %127 = vector.extract_strided_slice %126 {offsets = [0, 0], sizes = [8, 128], strides = [1, 1]} : vector<8x512xf32> to vector<8x128xf32>
    %128 = arith.negf %127 : vector<8x128xf32>
    %129 = math.exp %128 : vector<8x128xf32>
    %cst_43 = arith.constant 1.000000e+00 : f32
    %130 = vector.broadcast %cst_43 : f32 to vector<8x128xf32>
    %131 = arith.addf %130, %129 : vector<8x128xf32>
    %132 = arith.divf %130, %131 : vector<8x128xf32>
    %133 = vector.extract_strided_slice %126 {offsets = [0, 128], sizes = [8, 128], strides = [1, 1]} : vector<8x512xf32> to vector<8x128xf32>
    %134 = arith.negf %133 : vector<8x128xf32>
    %135 = math.exp %134 : vector<8x128xf32>
    %cst_44 = arith.constant 1.000000e+00 : f32
    %136 = vector.broadcast %cst_44 : f32 to vector<8x128xf32>
    %137 = arith.addf %136, %135 : vector<8x128xf32>
    %138 = arith.divf %136, %137 : vector<8x128xf32>
    %139 = vector.extract_strided_slice %126 {offsets = [0, 256], sizes = [8, 128], strides = [1, 1]} : vector<8x512xf32> to vector<8x128xf32>
    %140 = math.tanh %139 : vector<8x128xf32>
    %141 = vector.extract_strided_slice %126 {offsets = [0, 384], sizes = [8, 128], strides = [1, 1]} : vector<8x512xf32> to vector<8x128xf32>
    %142 = arith.negf %141 : vector<8x128xf32>
    %143 = math.exp %142 : vector<8x128xf32>
    %cst_45 = arith.constant 1.000000e+00 : f32
    %144 = vector.broadcast %cst_45 : f32 to vector<8x128xf32>
    %145 = arith.addf %144, %143 : vector<8x128xf32>
    %146 = arith.divf %144, %145 : vector<8x128xf32>
    %147 = arith.mulf %138, %113 : vector<8x128xf32>
    %148 = arith.mulf %132, %140 : vector<8x128xf32>
    %149 = arith.addf %147, %148 : vector<8x128xf32>
    %150 = math.tanh %149 : vector<8x128xf32>
    %151 = arith.mulf %146, %150 : vector<8x128xf32>
    %152 = arith.index_cast %119 : i32 to index
    %c0_46 = arith.constant 0 : index
    %153 = vector.load %arg12[%152, %c0_46] : memref<64x128xf32, #tpu.memory_space<vmem>>, vector<8x128xf32>
    tpu.vector_store %arg12[%152, %c0_46], %151 {strides = array<i32>} : memref<64x128xf32, #tpu.memory_space<vmem>>, vector<8x128xf32>,
    %c4_i32 = arith.constant 4 : i32
    %c8_i32_47 = arith.constant 8 : i32
    %154 = arith.muli %c4_i32, %c8_i32_47 : i32
    %155 = tpu.assume_multiple %154, 8 : i32
    %156 = arith.index_cast %155 : i32 to index
    %c0_48 = arith.constant 0 : index
    %157 = vector.load %arg13[%156, %c0_48] : memref<64x512xf32, #tpu.memory_space<vmem>>, vector<8x512xf32>
    %158 = arith.truncf %151 : vector<8x128xf32> to vector<8x128xbf16>
    %c0_49 = arith.constant 0 : index
    %c0_50 = arith.constant 0 : index
    %c0_51 = arith.constant 0 : index
    %159 = vector.load %arg3[%c0_49, %c0_50, %c0_51] : memref<1x128x512xbf16, #tpu.memory_space<vmem>>, vector<1x128x512xbf16>
    %160 = vector.shape_cast %159 : vector<1x128x512xbf16> to vector<128x512xbf16>
    %cst_52 = arith.constant dense<0.000000e+00> : vector<8x512xf32>
    %161 = tpu.matmul %158, %160, %cst_52 {dimension_numbers = #tpu.dot_dimension_numbers<[1], [0], [0], [1], [0, 0, 1, 1], [], []>} : vector<8x128xbf16>, vector<128x512xbf16>, vector<8x512xf32> -> vector<8x512xf32>
    %162 = arith.addf %157, %161 : vector<8x512xf32>
    %163 = vector.extract_strided_slice %162 {offsets = [0, 0], sizes = [8, 128], strides = [1, 1]} : vector<8x512xf32> to vector<8x128xf32>
    %164 = arith.negf %163 : vector<8x128xf32>
    %165 = math.exp %164 : vector<8x128xf32>
    %cst_53 = arith.constant 1.000000e+00 : f32
    %166 = vector.broadcast %cst_53 : f32 to vector<8x128xf32>
    %167 = arith.addf %166, %165 : vector<8x128xf32>
    %168 = arith.divf %166, %167 : vector<8x128xf32>
    %169 = vector.extract_strided_slice %162 {offsets = [0, 128], sizes = [8, 128], strides = [1, 1]} : vector<8x512xf32> to vector<8x128xf32>
    %170 = arith.negf %169 : vector<8x128xf32>
    %171 = math.exp %170 : vector<8x128xf32>
    %cst_54 = arith.constant 1.000000e+00 : f32
    %172 = vector.broadcast %cst_54 : f32 to vector<8x128xf32>
    %173 = arith.addf %172, %171 : vector<8x128xf32>
    %174 = arith.divf %172, %173 : vector<8x128xf32>
    %175 = vector.extract_strided_slice %162 {offsets = [0, 256], sizes = [8, 128], strides = [1, 1]} : vector<8x512xf32> to vector<8x128xf32>
    %176 = math.tanh %175 : vector<8x128xf32>
    %177 = vector.extract_strided_slice %162 {offsets = [0, 384], sizes = [8, 128], strides = [1, 1]} : vector<8x512xf32> to vector<8x128xf32>
    %178 = arith.negf %177 : vector<8x128xf32>
    %179 = math.exp %178 : vector<8x128xf32>
    %cst_55 = arith.constant 1.000000e+00 : f32
    %180 = vector.broadcast %cst_55 : f32 to vector<8x128xf32>
    %181 = arith.addf %180, %179 : vector<8x128xf32>
    %182 = arith.divf %180, %181 : vector<8x128xf32>
    %183 = arith.mulf %174, %149 : vector<8x128xf32>
    %184 = arith.mulf %168, %176 : vector<8x128xf32>
    %185 = arith.addf %183, %184 : vector<8x128xf32>
    %186 = math.tanh %185 : vector<8x128xf32>
    %187 = arith.mulf %182, %186 : vector<8x128xf32>
    %188 = arith.index_cast %155 : i32 to index
    %c0_56 = arith.constant 0 : index
    %189 = vector.load %arg12[%188, %c0_56] : memref<64x128xf32, #tpu.memory_space<vmem>>, vector<8x128xf32>
    tpu.vector_store %arg12[%188, %c0_56], %187 {strides = array<i32>} : memref<64x128xf32, #tpu.memory_space<vmem>>, vector<8x128xf32>,
    %c5_i32 = arith.constant 5 : i32
    %c8_i32_57 = arith.constant 8 : i32
    %190 = arith.muli %c5_i32, %c8_i32_57 : i32
    %191 = tpu.assume_multiple %190, 8 : i32
    %192 = arith.index_cast %191 : i32 to index
    %c0_58 = arith.constant 0 : index
    %193 = vector.load %arg13[%192, %c0_58] : memref<64x512xf32, #tpu.memory_space<vmem>>, vector<8x512xf32>
    %194 = arith.truncf %187 : vector<8x128xf32> to vector<8x128xbf16>
    %c0_59 = arith.constant 0 : index
    %c0_60 = arith.constant 0 : index
    %c0_61 = arith.constant 0 : index
    %195 = vector.load %arg3[%c0_59, %c0_60, %c0_61] : memref<1x128x512xbf16, #tpu.memory_space<vmem>>, vector<1x128x512xbf16>
    %196 = vector.shape_cast %195 : vector<1x128x512xbf16> to vector<128x512xbf16>
    %cst_62 = arith.constant dense<0.000000e+00> : vector<8x512xf32>
    %197 = tpu.matmul %194, %196, %cst_62 {dimension_numbers = #tpu.dot_dimension_numbers<[1], [0], [0], [1], [0, 0, 1, 1], [], []>} : vector<8x128xbf16>, vector<128x512xbf16>, vector<8x512xf32> -> vector<8x512xf32>
    %198 = arith.addf %193, %197 : vector<8x512xf32>
    %199 = vector.extract_strided_slice %198 {offsets = [0, 0], sizes = [8, 128], strides = [1, 1]} : vector<8x512xf32> to vector<8x128xf32>
    %200 = arith.negf %199 : vector<8x128xf32>
    %201 = math.exp %200 : vector<8x128xf32>
    %cst_63 = arith.constant 1.000000e+00 : f32
    %202 = vector.broadcast %cst_63 : f32 to vector<8x128xf32>
    %203 = arith.addf %202, %201 : vector<8x128xf32>
    %204 = arith.divf %202, %203 : vector<8x128xf32>
    %205 = vector.extract_strided_slice %198 {offsets = [0, 128], sizes = [8, 128], strides = [1, 1]} : vector<8x512xf32> to vector<8x128xf32>
    %206 = arith.negf %205 : vector<8x128xf32>
    %207 = math.exp %206 : vector<8x128xf32>
    %cst_64 = arith.constant 1.000000e+00 : f32
    %208 = vector.broadcast %cst_64 : f32 to vector<8x128xf32>
    %209 = arith.addf %208, %207 : vector<8x128xf32>
    %210 = arith.divf %208, %209 : vector<8x128xf32>
    %211 = vector.extract_strided_slice %198 {offsets = [0, 256], sizes = [8, 128], strides = [1, 1]} : vector<8x512xf32> to vector<8x128xf32>
    %212 = math.tanh %211 : vector<8x128xf32>
    %213 = vector.extract_strided_slice %198 {offsets = [0, 384], sizes = [8, 128], strides = [1, 1]} : vector<8x512xf32> to vector<8x128xf32>
    %214 = arith.negf %213 : vector<8x128xf32>
    %215 = math.exp %214 : vector<8x128xf32>
    %cst_65 = arith.constant 1.000000e+00 : f32
    %216 = vector.broadcast %cst_65 : f32 to vector<8x128xf32>
    %217 = arith.addf %216, %215 : vector<8x128xf32>
    %218 = arith.divf %216, %217 : vector<8x128xf32>
    %219 = arith.mulf %210, %185 : vector<8x128xf32>
    %220 = arith.mulf %204, %212 : vector<8x128xf32>
    %221 = arith.addf %219, %220 : vector<8x128xf32>
    %222 = math.tanh %221 : vector<8x128xf32>
    %223 = arith.mulf %218, %222 : vector<8x128xf32>
    %224 = arith.index_cast %191 : i32 to index
    %c0_66 = arith.constant 0 : index
    %225 = vector.load %arg12[%224, %c0_66] : memref<64x128xf32, #tpu.memory_space<vmem>>, vector<8x128xf32>
    tpu.vector_store %arg12[%224, %c0_66], %223 {strides = array<i32>} : memref<64x128xf32, #tpu.memory_space<vmem>>, vector<8x128xf32>,
    %c6_i32 = arith.constant 6 : i32
    %c8_i32_67 = arith.constant 8 : i32
    %226 = arith.muli %c6_i32, %c8_i32_67 : i32
    %227 = tpu.assume_multiple %226, 8 : i32
    %228 = arith.index_cast %227 : i32 to index
    %c0_68 = arith.constant 0 : index
    %229 = vector.load %arg13[%228, %c0_68] : memref<64x512xf32, #tpu.memory_space<vmem>>, vector<8x512xf32>
    %230 = arith.truncf %223 : vector<8x128xf32> to vector<8x128xbf16>
    %c0_69 = arith.constant 0 : index
    %c0_70 = arith.constant 0 : index
    %c0_71 = arith.constant 0 : index
    %231 = vector.load %arg3[%c0_69, %c0_70, %c0_71] : memref<1x128x512xbf16, #tpu.memory_space<vmem>>, vector<1x128x512xbf16>
    %232 = vector.shape_cast %231 : vector<1x128x512xbf16> to vector<128x512xbf16>
    %cst_72 = arith.constant dense<0.000000e+00> : vector<8x512xf32>
    %233 = tpu.matmul %230, %232, %cst_72 {dimension_numbers = #tpu.dot_dimension_numbers<[1], [0], [0], [1], [0, 0, 1, 1], [], []>} : vector<8x128xbf16>, vector<128x512xbf16>, vector<8x512xf32> -> vector<8x512xf32>
    %234 = arith.addf %229, %233 : vector<8x512xf32>
    %235 = vector.extract_strided_slice %234 {offsets = [0, 0], sizes = [8, 128], strides = [1, 1]} : vector<8x512xf32> to vector<8x128xf32>
    %236 = arith.negf %235 : vector<8x128xf32>
    %237 = math.exp %236 : vector<8x128xf32>
    %cst_73 = arith.constant 1.000000e+00 : f32
    %238 = vector.broadcast %cst_73 : f32 to vector<8x128xf32>
    %239 = arith.addf %238, %237 : vector<8x128xf32>
    %240 = arith.divf %238, %239 : vector<8x128xf32>
    %241 = vector.extract_strided_slice %234 {offsets = [0, 128], sizes = [8, 128], strides = [1, 1]} : vector<8x512xf32> to vector<8x128xf32>
    %242 = arith.negf %241 : vector<8x128xf32>
    %243 = math.exp %242 : vector<8x128xf32>
    %cst_74 = arith.constant 1.000000e+00 : f32
    %244 = vector.broadcast %cst_74 : f32 to vector<8x128xf32>
    %245 = arith.addf %244, %243 : vector<8x128xf32>
    %246 = arith.divf %244, %245 : vector<8x128xf32>
    %247 = vector.extract_strided_slice %234 {offsets = [0, 256], sizes = [8, 128], strides = [1, 1]} : vector<8x512xf32> to vector<8x128xf32>
    %248 = math.tanh %247 : vector<8x128xf32>
    %249 = vector.extract_strided_slice %234 {offsets = [0, 384], sizes = [8, 128], strides = [1, 1]} : vector<8x512xf32> to vector<8x128xf32>
    %250 = arith.negf %249 : vector<8x128xf32>
    %251 = math.exp %250 : vector<8x128xf32>
    %cst_75 = arith.constant 1.000000e+00 : f32
    %252 = vector.broadcast %cst_75 : f32 to vector<8x128xf32>
    %253 = arith.addf %252, %251 : vector<8x128xf32>
    %254 = arith.divf %252, %253 : vector<8x128xf32>
    %255 = arith.mulf %246, %221 : vector<8x128xf32>
    %256 = arith.mulf %240, %248 : vector<8x128xf32>
    %257 = arith.addf %255, %256 : vector<8x128xf32>
    %258 = math.tanh %257 : vector<8x128xf32>
    %259 = arith.mulf %254, %258 : vector<8x128xf32>
    %260 = arith.index_cast %227 : i32 to index
    %c0_76 = arith.constant 0 : index
    %261 = vector.load %arg12[%260, %c0_76] : memref<64x128xf32, #tpu.memory_space<vmem>>, vector<8x128xf32>
    tpu.vector_store %arg12[%260, %c0_76], %259 {strides = array<i32>} : memref<64x128xf32, #tpu.memory_space<vmem>>, vector<8x128xf32>,
    %c7_i32 = arith.constant 7 : i32
    %c8_i32_77 = arith.constant 8 : i32
    %262 = arith.muli %c7_i32, %c8_i32_77 : i32
    %263 = tpu.assume_multiple %262, 8 : i32
    %264 = arith.index_cast %263 : i32 to index
    %c0_78 = arith.constant 0 : index
    %265 = vector.load %arg13[%264, %c0_78] : memref<64x512xf32, #tpu.memory_space<vmem>>, vector<8x512xf32>
    %266 = arith.truncf %259 : vector<8x128xf32> to vector<8x128xbf16>
    %c0_79 = arith.constant 0 : index
    %c0_80 = arith.constant 0 : index
    %c0_81 = arith.constant 0 : index
    %267 = vector.load %arg3[%c0_79, %c0_80, %c0_81] : memref<1x128x512xbf16, #tpu.memory_space<vmem>>, vector<1x128x512xbf16>
    %268 = vector.shape_cast %267 : vector<1x128x512xbf16> to vector<128x512xbf16>
    %cst_82 = arith.constant dense<0.000000e+00> : vector<8x512xf32>
    %269 = tpu.matmul %266, %268, %cst_82 {dimension_numbers = #tpu.dot_dimension_numbers<[1], [0], [0], [1], [0, 0, 1, 1], [], []>} : vector<8x128xbf16>, vector<128x512xbf16>, vector<8x512xf32> -> vector<8x512xf32>
    %270 = arith.addf %265, %269 : vector<8x512xf32>
    %271 = vector.extract_strided_slice %270 {offsets = [0, 0], sizes = [8, 128], strides = [1, 1]} : vector<8x512xf32> to vector<8x128xf32>
    %272 = arith.negf %271 : vector<8x128xf32>
    %273 = math.exp %272 : vector<8x128xf32>
    %cst_83 = arith.constant 1.000000e+00 : f32
    %274 = vector.broadcast %cst_83 : f32 to vector<8x128xf32>
    %275 = arith.addf %274, %273 : vector<8x128xf32>
    %276 = arith.divf %274, %275 : vector<8x128xf32>
    %277 = vector.extract_strided_slice %270 {offsets = [0, 128], sizes = [8, 128], strides = [1, 1]} : vector<8x512xf32> to vector<8x128xf32>
    %278 = arith.negf %277 : vector<8x128xf32>
    %279 = math.exp %278 : vector<8x128xf32>
    %cst_84 = arith.constant 1.000000e+00 : f32
    %280 = vector.broadcast %cst_84 : f32 to vector<8x128xf32>
    %281 = arith.addf %280, %279 : vector<8x128xf32>
    %282 = arith.divf %280, %281 : vector<8x128xf32>
    %283 = vector.extract_strided_slice %270 {offsets = [0, 256], sizes = [8, 128], strides = [1, 1]} : vector<8x512xf32> to vector<8x128xf32>
    %284 = math.tanh %283 : vector<8x128xf32>
    %285 = vector.extract_strided_slice %270 {offsets = [0, 384], sizes = [8, 128], strides = [1, 1]} : vector<8x512xf32> to vector<8x128xf32>
    %286 = arith.negf %285 : vector<8x128xf32>
    %287 = math.exp %286 : vector<8x128xf32>
    %cst_85 = arith.constant 1.000000e+00 : f32
    %288 = vector.broadcast %cst_85 : f32 to vector<8x128xf32>
    %289 = arith.addf %288, %287 : vector<8x128xf32>
    %290 = arith.divf %288, %289 : vector<8x128xf32>
    %291 = arith.mulf %282, %257 : vector<8x128xf32>
    %292 = arith.mulf %276, %284 : vector<8x128xf32>
    %293 = arith.addf %291, %292 : vector<8x128xf32>
    %294 = math.tanh %293 : vector<8x128xf32>
    %295 = arith.mulf %290, %294 : vector<8x128xf32>
    %296 = arith.index_cast %263 : i32 to index
    %c0_86 = arith.constant 0 : index
    %297 = vector.load %arg12[%296, %c0_86] : memref<64x128xf32, #tpu.memory_space<vmem>>, vector<8x128xf32>
    tpu.vector_store %arg12[%296, %c0_86], %295 {strides = array<i32>} : memref<64x128xf32, #tpu.memory_space<vmem>>, vector<8x128xf32>,
    %c8_i32_87 = arith.constant 8 : i32
    %c0_88 = arith.constant 0 : index
    %c0_89 = arith.constant 0 : index
    %c0_90 = arith.constant 0 : index
    %298 = vector.load %arg10[%c0_88, %c0_89, %c0_90] : memref<1x8x128xf32, #tpu.memory_space<vmem>>, vector<1x8x128xf32>
    %299 = vector.shape_cast %298 : vector<1x8x128xf32> to vector<8x128xf32>
    %300 = vector.shape_cast %295 : vector<8x128xf32> to vector<1x8x128xf32>
    tpu.vector_store %arg10[%c0_88, %c0_89, %c0_90], %300 {strides = array<i32>} : memref<1x8x128xf32, #tpu.memory_space<vmem>>, vector<1x8x128xf32>,
    %c0_91 = arith.constant 0 : index
    %c0_92 = arith.constant 0 : index
    %c0_93 = arith.constant 0 : index
    %301 = vector.load %arg11[%c0_91, %c0_92, %c0_93] : memref<1x8x128xf32, #tpu.memory_space<vmem>>, vector<1x8x128xf32>
    %302 = vector.shape_cast %301 : vector<1x8x128xf32> to vector<8x128xf32>
    %303 = vector.shape_cast %293 : vector<8x128xf32> to vector<1x8x128xf32>
    tpu.vector_store %arg11[%c0_91, %c0_92, %c0_93], %303 {strides = array<i32>} : memref<1x8x128xf32, #tpu.memory_space<vmem>>, vector<1x8x128xf32>,
    %c2_i32_94 = arith.constant 2 : i32
    %304 = arith.cmpi eq, %arg0, %c2_i32_94 : i32
    %305 = arith.extui %304 : i1 to i32
    %c0_i32_95 = arith.constant 0 : i32
    %306 = arith.cmpi ne, %305, %c0_i32_95 : i32
    scf.if %306 {
      %c0_96 = arith.constant 0 : index
      %c0_97 = arith.constant 0 : index
      %307 = vector.load %arg12[%c0_96, %c0_97] : memref<64x128xf32, #tpu.memory_space<vmem>>, vector<64x128xf32>
      %308 = arith.truncf %307 : vector<64x128xf32> to vector<64x128xbf16>
      %c0_98 = arith.constant 0 : index
      %c0_99 = arith.constant 0 : index
      %309 = vector.load %arg7[%c0_98, %c0_99] : memref<128x128xbf16, #tpu.memory_space<vmem>>, vector<128x128xbf16>
      %cst_100 = arith.constant dense<0.000000e+00> : vector<64x128xf32>
      %310 = tpu.matmul %308, %309, %cst_100 {dimension_numbers = #tpu.dot_dimension_numbers<[1], [0], [0], [1], [0, 0, 1, 1], [], []>} : vector<64x128xbf16>, vector<128x128xbf16>, vector<64x128xf32> -> vector<64x128xf32>
      %c0_101 = arith.constant 0 : index
      %c0_102 = arith.constant 0 : index
      %311 = vector.load %arg8[%c0_101, %c0_102] : memref<1x128xf32, #tpu.memory_space<vmem>>, vector<1x128xf32>
      %312 = vector.broadcast %311 : vector<1x128xf32> to vector<64x128xf32>
      %313 = arith.addf %310, %312 : vector<64x128xf32>
      %cst_103 = arith.constant dense<0xFF800000> : vector<64xf32>
      %314 = vector.multi_reduction <maximumf>, %313, %cst_103 [1] : vector<64x128xf32> to vector<64xf32>
      %315 = vector.shape_cast %314 : vector<64xf32> to vector<64x1xf32>
      %316 = vector.broadcast %315 : vector<64x1xf32> to vector<64x128xf32>
      %317 = arith.subf %313, %316 : vector<64x128xf32>
      %318 = math.exp %317 : vector<64x128xf32>
      %cst_104 = arith.constant dense<0.000000e+00> : vector<64xf32>
      %319 = vector.multi_reduction <add>, %318, %cst_104 [1] : vector<64x128xf32> to vector<64xf32>
      %320 = vector.shape_cast %319 : vector<64xf32> to vector<64x1xf32>
      %321 = math.log %320 : vector<64x1xf32>
      %322 = arith.addf %321, %315 : vector<64x1xf32>
      %323 = vector.broadcast %322 : vector<64x1xf32> to vector<64x128xf32>
      %324 = arith.subf %313, %323 : vector<64x128xf32>
      %c0_105 = arith.constant 0 : index
      %c0_106 = arith.constant 0 : index
      %325 = vector.load %arg9[%c0_105, %c0_106] : memref<64x128xf32, #tpu.memory_space<vmem>>, vector<64x128xf32>
      tpu.vector_store %arg9[%c0_105, %c0_106], %324 {strides = array<i32>} : memref<64x128xf32, #tpu.memory_space<vmem>>, vector<64x128xf32>,
    } else {
    }
    return
  }
  func.func @transform_0(%arg0: i32) -> (i32, i32) {
    %c0_i32 = arith.constant 0 : i32
    %c0_i32_0 = arith.constant 0 : i32
    %c0_i32_1 = arith.constant 0 : i32
    return %c0_i32, %c0_i32_0 : i32, i32
  }
  func.func @transform_1(%arg0: i32) -> (i32, i32, i32) {
    %c0_i32 = arith.constant 0 : i32
    %c0_i32_0 = arith.constant 0 : i32
    %c0_i32_1 = arith.constant 0 : i32
    return %arg0, %c0_i32, %c0_i32_0 : i32, i32, i32
  }
  func.func @transform_2(%arg0: i32) -> (i32, i32, i32) {
    %c0_i32 = arith.constant 0 : i32
    %c0_i32_0 = arith.constant 0 : i32
    %c0_i32_1 = arith.constant 0 : i32
    return %arg0, %c0_i32, %c0_i32_0 : i32, i32, i32
  }
  func.func @transform_3(%arg0: i32) -> (i32, i32, i32) {
    %c0_i32 = arith.constant 0 : i32
    %c0_i32_0 = arith.constant 0 : i32
    %c0_i32_1 = arith.constant 0 : i32
    return %arg0, %c0_i32, %c0_i32_0 : i32, i32, i32
  }
  func.func @transform_4(%arg0: i32) -> (i32, i32, i32) {
    %c0_i32 = arith.constant 0 : i32
    %c0_i32_0 = arith.constant 0 : i32
    %c0_i32_1 = arith.constant 0 : i32
    return %arg0, %c0_i32, %c0_i32_0 : i32, i32, i32
  }
  func.func @transform_5(%arg0: i32) -> (i32, i32, i32) {
    %c0_i32 = arith.constant 0 : i32
    %c0_i32_0 = arith.constant 0 : i32
    %c0_i32_1 = arith.constant 0 : i32
    return %arg0, %c0_i32, %c0_i32_0 : i32, i32, i32
  }
  func.func @transform_6(%arg0: i32) -> (i32, i32) {
    %c0_i32 = arith.constant 0 : i32
    %c0_i32_0 = arith.constant 0 : i32
    %c0_i32_1 = arith.constant 0 : i32
    return %c0_i32, %c0_i32_0 : i32, i32
  }
  func.func @transform_7(%arg0: i32) -> (i32, i32) {
    %c0_i32 = arith.constant 0 : i32
    %c0_i32_0 = arith.constant 0 : i32
    %c0_i32_1 = arith.constant 0 : i32
    return %c0_i32, %c0_i32_0 : i32, i32
  }
  func.func @transform_8(%arg0: i32) -> (i32, i32) {
    %c0_i32 = arith.constant 0 : i32
    %c0_i32_0 = arith.constant 0 : i32
    %c0_i32_1 = arith.constant 0 : i32
    return %c0_i32, %c0_i32_0 : i32, i32
  }
  func.func @transform_9(%arg0: i32) -> (i32, i32, i32) {
    %c0_i32 = arith.constant 0 : i32
    %c0_i32_0 = arith.constant 0 : i32
    %c0_i32_1 = arith.constant 0 : i32
    return %arg0, %c0_i32, %c0_i32_0 : i32, i32, i32
  }
  func.func @transform_10(%arg0: i32) -> (i32, i32, i32) {
    %c0_i32 = arith.constant 0 : i32
    %c0_i32_0 = arith.constant 0 : i32
    %c0_i32_1 = arith.constant 0 : i32
    return %arg0, %c0_i32, %c0_i32_0 : i32, i32, i32
  }
}

</mosaic_0001>

<bundles_post_ra>
// kernel: tpu_custom_call.1
= control target key start
LH: loop header
LB: loop body
LE: loop exit
PB: predicated region body
PF: predicated region fallthrough
CT: control target
= control target key end

     0   :  { %s6326_s0 = inlined_call_operand.hbm [shape: f32[64,512], index: 0, kind: input, shape index: {}]   ;;  %s6327_s1 = inlined_call_operand.hbm [shape: bf16[3,128,512], index: 1, kind: input, shape index: {}]   ;;  %s6328_s2 = inlined_call_operand.hbm [shape: bf16[3,128,512], index: 2, kind: input, shape index: {}]   ;;  %s6329_s3 = inlined_call_operand.hbm [shape: f32[3,1,512], index: 3, kind: input, shape index: {}]   ;;  %s6330_s4 = inlined_call_operand.hbm [shape: f32[3,8,128], index: 4, kind: input, shape index: {}]   ;;  %s6331_s5 = inlined_call_operand.hbm [shape: f32[3,8,128], index: 5, kind: input, shape index: {}]   ;;  %s6332_s6 = inlined_call_operand.hbm [shape: bf16[128,128], index: 6, kind: input, shape index: {}]   ;;  %s6333_s7 = inlined_call_operand.vmem [shape: f32[1,128], index: 7, kind: input, shape index: {}]   ;;  %s6334_s8 = inlined_call_operand.hbm [shape: f32[64,128], index: 8, kind: output, shape index: {0}]   ;;  %s6335_s9 = inlined_call_operand.hbm [shape: f32[3,8,128], index: 9, kind: output, shape index: {1}]   ;;  %s6336_s10 = inlined_call_operand.hbm [shape: f32[3,8,128], index: 10, kind: output, shape index: {2}]  }
   0x1   :  { %6359 = sst [smem:[#allocation33_spill]] %s6327_s1 }
   0x2   :  { %6360 = sst [smem:[#allocation34_spill]] %s6332_s6 }
   0x3   :  { %6361 = sst [smem:[#allocation35_spill]] %s6333_s7 }
   0x4   :  { %6362 = sst [smem:[#allocation36_spill]] %s6334_s8 }
   0x5   :  { %6363 = sst [smem:[#allocation37_spill]] %s6335_s9 }
   0x6   :  { %6364 = sst [smem:[#allocation38_spill]] %s6336_s10 }
   0x7   :  { %16 = vsyncpa [#allocation5], 0 }
   0x8   :  { %17 = vsyncpa [#allocation8], 0 }
   0x9   :  { %19 = vsyncpa [#allocation8 + $0x1], 0 }
   0xa   :  { %20 = vsyncpa [#allocation11], 0 }
   0xb   :  { %22 = vsyncpa [#allocation11 + $0x1], 0 }
   0xc   :  { %23 = vsyncpa [#allocation14], 0 }
   0xd   :  { %25 = vsyncpa [#allocation14 + $0x1], 0 }
   0xe   :  { %26 = vsyncpa [#allocation6], 0 }
   0xf   :  { %27 = vsyncpa [#allocation18], 0 }
  0x10   :  { %29 = vsyncpa [#allocation18 + $0x1], 0  ;;  %s5293_s13 = smov 0   ;;  %s5295_s14 = smov 0  }
  0x11   :  { %s5297_s15 = smov 0   ;;  %s5299_s16 = smov 0  }
  0x12 LB: > { %6365 = sst [smem:[#allocation27_spill]] %s5212_s15  ;;  %s5312_s17 = sadd.s32 4294967295, %s5216_s16   ;;  %s5216_s16 = sphi %s5299_s16, %s6409_s16   ;;  %s5212_s15 = sphi %s5297_s15, %s6411_s15   ;;  %s5208_s14 = sphi %s5295_s14, %s6413_s14   ;;  %s5204_s13 = sphi %s5293_s13, %s6412_s13  }
  0x13   : > { %s6339_s18 = sadd.s32 4294967294, %s5216_s16   ;;  %s5316_s19 = sadd.s32 1, %s5216_s16  }
  0x14   : > { %6366 = sst [smem:[#allocation28_spill]] %s5316_s19  ;;  %s63_s20 = sadd.s32 1, %s5212_s15 }
  0x15   : > { %s60_s21 = ssub.s32 %s5216_s16, %s5316_s19  ;;  %p70_p0 = scmp.ne.s32.totalorder %s5212_s15, %s5208_s14 }
  0x16   : > { %p61_p1 = scmp.eq.s32.totalorder %s60_s21, 0  ;;  %p71_p2 = scmp.eq.s32.totalorder %s5216_s16, 0 }
  0x17   : > { %p76_p3 = scmp.ne.s32.totalorder %s5208_s14, %s5204_s13  ;;  %p6346_p4 = scmp.eq.s32.totalorder %s5312_s17, 0 }
  0x18   : > { %s5327_s22 = scalar_select %p61_p1, %s5212_s15, %s63_s20  }
  0x19   : > { %p5329_p5 = por %p71_p2, %p70_p0  ;;  %p5335_p6 = por %p6346_p4, %p76_p3 }
  0x1a   : > { %6367 = sst [smem:[#allocation29_spill]] %s5327_s22  ;;  %p6337_p7 = scmp.eq.s32.totalorder %s5312_s17, 2 }
  0x1b   : > { %s6369_s24 = scalar_select %p5335_p6, 1, 0 }
  0x1c   : > { %p273_p8 = scmp.eq.s32.totalorder %s6339_s18, 2  ;;  %p4055_p9 = scmp.ge.s32.totalorder %s5216_s16, 1 }
  0x1d   : > { %6370 = sst [smem:[#allocation30_spill]] %s6369_s24  ;;  %p306_p10 = scmp.lt.s32.totalorder %s5216_s16, 4 }
  0x1e   : > { %p5346_p11 = por %p6337_p7, %p70_p0  ;;  %p5350_p12 = por %p273_p8, %p76_p3 }
  0x1f   : > { %p5354_p13 = pnand %p4055_p9, %p306_p10  ;;  %s5218_s28 = smov [#allocation15]  }
  0x20   : > { %s6371_s25 = scalar_select %p5346_p11, 1, 0 }
  0x21   : > { %s6373_s26 = scalar_select %p5350_p12, 1, 0 }
  0x22   : > { %6372 = sst [smem:[#allocation31_spill]] %s6371_s25  ;;  %p4495_p2 = pneg %p5354_p13 }
  0x23   : > { %6374 = sst [smem:[#allocation32_spill]] %s6373_s26  ;;  %s331_s29 = sshll.u32 %s5218_s28, 4  ;;  %s332_s29 = int_to_ptr.vmem [resolvable:$true] %s331_s29 }
  0x24   : > { %s6375_s27 = scalar_select %p5354_p13, 1, 0 }
  0x25   : > { %p5363_p0 = pnand %p4495_p2, %p6346_p4  ;;  %p4527_p3 = scmp.lt.s32.totalorder %s5216_s16, 3 }
  0x26   : > { %s5369_s11 = sand.u32 1, %s5216_s16   ;;  %s4901_s12 = scalar_lea.vmem %s332_s29, 1024 }
  0x27   : > { %s6376_s30 = scalar_select %p5363_p0, 1, 0 }
  0x28   : > { %p6347_p8 = pneg %p5363_p0  ;;  %p4902_p9 = scmp.ne.s32.totalorder %s332_s29, %s4901_s12 }
  0x29   : > { %p4909_p1 = scmp.lt.s32.totalorder %s332_s29, %s332_s29  ;;  %p4910_p12 = scmp.lt.s32.totalorder %s4901_s12, %s4901_s12 }
  0x2a   : > { %p4904_p10 = pnand %p4902_p9, %p6347_p8 }
  0x2b   : > { %p4911_p11 = por %p4910_p12, %p4909_p1 }
  0x2c   : > { %p4905_p7 = pneg %p4904_p10 }
  0x2e   : > { %p4912_p2 = pnand %p4911_p11, %p4905_p7 }
  0x30   : > { %4915 = shalt.err (!%p4912_p2)
}
  0x31   : > { %s5219_s13 = smov 64   ;;  %s5220_s20 = smov 4  }
  0x32   : > { %s6377_s6 = sld [smem:[#allocation34_spill]]  ;;  %s5382_s18 = sand.u32 1, %s5212_s15  }
  0x33   : > { %s6344_s12 = sshll.u32 %s5216_s16, 12  ;;  %s6345_s22 = sshll.u32 %s5382_s18, 8 }
  0x34   : > { %s6378_s1 = sld [smem:[#allocation33_spill]]  ;;  %p5397_p7 = pnand %p4527_p3, %p5329_p5 }
  0x36   : > { %p5410_p12 = pneg %p5397_p7 }
  0x38   : > { %4501 = dma.hbm_to_vmem [thread:$0]  (!%p5363_p0), %s6377_s6, 1024, %s332_s29, [#allocation14], %s5219_s13, %s5219_s13, %s5220_s20  }
  0x39   : > { %s352_s29 = scalar_lea.vmem [#allocation7], %s6345_s22 }
  0x3a   : > { %s5391_s10 = scalar_lea.hbm %s6378_s1, %s6344_s12  ;;  %s359_s13 = sshll.u32 %s352_s29, 4  ;;  %s5403_s13 = int_to_ptr.vmem [resolvable:$true] %s359_s13 }
  0x3b   : > { %s4916_s28 = scalar_lea.hbm %s5391_s10, 4096  ;;  %s4921_s12 = scalar_lea.hbm %s6378_s1, 12288 }
  0x3c   : > { %p4917_p11 = scmp.ne.s32.totalorder %s5391_s10, %s4916_s28  ;;  %p4922_p3 = scmp.lt.s32.totalorder %s5391_s10, %s6378_s1 }
  0x3d   : > { %p4923_p9 = scmp.lt.s32.totalorder %s4921_s12, %s4916_s28 }
  0x3e   : > { %p4919_p5 = pnand %p5410_p12, %p4917_p11 }
  0x3f   : > { %p4924_p10 = por %p4923_p9, %p4922_p3 }
  0x40   : > { %p4920_p1 = pneg %p4919_p5 }
  0x42   : > { %p4925_p2 = pnand %p4924_p10, %p4920_p1 }
  0x44   : > { %4928 = shalt.err (!%p4925_p2)
}
  0x45   : > { %s4929_s20 = scalar_lea.vmem %s5403_s13, 4096  ;;  %s5221_s6 = smov [#allocation7]  }
  0x46   : > { %p4930_p4 = scmp.ne.s32.totalorder %s5403_s13, %s4929_s20  ;;  %s4934_s23 = sshll.u32 %s5221_s6, 4  ;;  %s4935_s23 = int_to_ptr.vmem [resolvable:$false] %s4934_s23 }
  0x47   : > { %s4936_s26 = scalar_lea.vmem %s4935_s23, 8192  ;;  %p4937_p8 = scmp.lt.s32.totalorder %s5403_s13, %s4935_s23 }
  0x48   : > { %p4932_p11 = pnand %p4930_p4, %p5410_p12  ;;  %p4938_p6 = scmp.lt.s32.totalorder %s4936_s26, %s4929_s20 }
  0x4a   : > { %p4933_p5 = pneg %p4932_p11  ;;  %p4939_p13 = por %p4938_p6, %p4937_p8 }
  0x4c   : > { %p4940_p0 = pnand %p4939_p13, %p4933_p5 }
  0x4e   : > { %4943 = shalt.err (!%p4940_p0)
}
  0x4f   : > { %s6358_s22 = smov 256   ;;  %s5223_s12 = smov 16  }
  0x50   : > { %s6381_s6 = scalar_lea.sflag [#allocation8], %s5369_s11  ;;  %s6382_s20 = sshll.u32 %s5216_s16, 12 }
  0x51   : > { %4505 = dma.hbm_to_vmem [thread:$0]  (!%p5397_p7), %s5391_s10, 4096, %s5403_s13, %s6381_s6, %s6358_s22, %s6358_s22, %s5223_s12  }
  0x52   : > { %s5442_s23 = scalar_lea.hbm %s6328_s2, %s6382_s20  ;;  %s6383_s26 = sshll.u32 %s5382_s18, 8 }
  0x53   : > { %s373_s1 = scalar_lea.vmem [#allocation9], %s6383_s26  ;;  %s4065_s8 = sshll.u32 %s5382_s18, 2 }
  0x54   : > { %s380_s15 = sshll.u32 %s373_s1, 4  ;;  %s4416_s9 = sshll.u32 %s5216_s16, 6  ;;  %s5446_s15 = int_to_ptr.vmem [resolvable:$true] %s380_s15 }
  0x55   : > { %s5453_s24 = scalar_lea.hbm %s6329_s3, %s4416_s9  ;;  %s394_s10 = scalar_lea.vmem [#allocation10], %s4065_s8 }
  0x56   : > { %s402_s13 = sshll.u32 %s394_s10, 4  ;;  %s5224_s6 = smov [#allocation4]   ;;  %s403_s13 = int_to_ptr.vmem [resolvable:$true] %s402_s13 }
  0x57   : > { %s318_s20 = sshll.u32 %s5224_s6, 4  ;;  %s391_s28 = scalar_lea.sflag [#allocation11], %s5369_s11  ;;  %s319_s20 = int_to_ptr.vmem [resolvable:$true] %s318_s20 }
  0x58   : > { %s4944_s29 = scalar_lea.hbm %s5453_s24, 64  ;;  %s4949_s7 = scalar_lea.hbm %s6329_s3, 192 }
  0x59   : > { %p4945_p4 = scmp.ne.s32.totalorder %s5453_s24, %s4944_s29  ;;  %p4950_p0 = scmp.lt.s32.totalorder %s5453_s24, %s6329_s3 }
  0x5a   : > { %p4951_p8 = scmp.lt.s32.totalorder %s4949_s7, %s4944_s29 }
  0x5b   : > { %p4947_p6 = pnand %p4945_p4, %p5410_p12 }
  0x5c   : > { %p4952_p1 = por %p4951_p8, %p4950_p0 }
  0x5d   : > { %p4948_p13 = pneg %p4947_p6 }
  0x5f   : > { %p4953_p3 = pnand %p4952_p1, %p4948_p13 }
  0x61   : > { %4956 = shalt.err (!%p4953_p3)
}
  0x62   : > { %s4957_s8 = scalar_lea.vmem %s403_s13, 64  ;;  %s5225_s10 = smov [#allocation10]  }
  0x63   : > { %p4958_p9 = scmp.ne.s32.totalorder %s403_s13, %s4957_s8  ;;  %s4962_s6 = sshll.u32 %s5225_s10, 4  ;;  %s4963_s6 = int_to_ptr.vmem [resolvable:$false] %s4962_s6 }
  0x64   : > { %s4964_s22 = scalar_lea.vmem %s4963_s6, 128  ;;  %p4965_p11 = scmp.lt.s32.totalorder %s403_s13, %s4963_s6 }
  0x65   : > { %p4960_p10 = pnand %p4958_p9, %p5410_p12  ;;  %p4966_p5 = scmp.lt.s32.totalorder %s4964_s22, %s4957_s8 }
  0x67   : > { %p4961_p2 = pneg %p4960_p10  ;;  %p4967_p4 = por %p4966_p5, %p4965_p11 }
  0x69   : > { %p4968_p6 = pnand %p4967_p4, %p4961_p2 }
  0x6b   : > { %4971 = shalt.err (!%p4968_p6)
}
  0x6c   : > { %4511 = dma.hbm_to_vmem [thread:$0]  (!%p5397_p7), %s5453_s24, 64, %s403_s13, %s391_s28  }
  0x6d   : > { %s4068_s29 = sshll.u32 %s5382_s18, 3  ;;  %s4983_s1 = scalar_lea.vmem %s319_s20, 4096 }
  0x6e   : > { %p4984_p13 = scmp.ne.s32.totalorder %s319_s20, %s4983_s1  ;;  %p6384_p0 = scmp.ne.s32.totalorder %s6376_s30, 0 }
  0x6f   : > { %p4991_p9 = scmp.lt.s32.totalorder %s319_s20, %s319_s20  ;;  %p4992_p10 = scmp.lt.s32.totalorder %s4983_s1, %s4983_s1 }
  0x70   : > { %p6385_p8 = pneg %p6384_p0 }
  0x71   : > { %p4993_p2 = por %p4992_p10, %p4991_p9 }
  0x72   : > { %p4986_p1 = pnand %p4984_p13, %p6385_p8 }
  0x74   : > { %p4987_p3 = pneg %p4986_p1 }
  0x76   : > { %p4994_p11 = pnand %p4993_p2, %p4987_p3 }
  0x78   : > { %4997 = shalt.err (!%p4994_p11)
}
  0x79   : > { %s5226_s22 = smov 512   ;;  %s5227_s24 = smov 32  }
  0x7a   : > { %4498 = dma.hbm_to_vmem [thread:$0]  (!%p6384_p0), %s6326_s0, 4096, %s319_s20, [#allocation5], %s5226_s22, %s5226_s22, %s5227_s24  }
  0x7b   : > { %s4998_s7 = scalar_lea.hbm %s5442_s23, 4096  ;;  %s5003_s8 = scalar_lea.hbm %s6328_s2, 12288 }
  0x7c   : > { %p4999_p5 = scmp.ne.s32.totalorder %s5442_s23, %s4998_s7  ;;  %p5004_p13 = scmp.lt.s32.totalorder %s5442_s23, %s6328_s2 }
  0x7d   : > { %p5005_p8 = scmp.lt.s32.totalorder %s5003_s8, %s4998_s7 }
  0x7e   : > { %p5001_p4 = pnand %p4999_p5, %p5410_p12 }
  0x7f   : > { %p5006_p1 = por %p5005_p8, %p5004_p13 }
  0x80   : > { %p5002_p6 = pneg %p5001_p4 }
  0x82   : > { %p5007_p3 = pnand %p5006_p1, %p5002_p6 }
  0x84   : > { %5010 = shalt.err (!%p5007_p3)
}
  0x85   : > { %s5011_s30 = scalar_lea.vmem %s5446_s15, 4096  ;;  %s5228_s20 = smov [#allocation9]  }
  0x86   : > { %p5012_p0 = scmp.ne.s32.totalorder %s5446_s15, %s5011_s30  ;;  %s5016_s1 = sshll.u32 %s5228_s20, 4  ;;  %s5017_s1 = int_to_ptr.vmem [resolvable:$false] %s5016_s1 }
  0x87   : > { %s5018_s22 = scalar_lea.vmem %s5017_s1, 8192  ;;  %p5019_p2 = scmp.lt.s32.totalorder %s5446_s15, %s5017_s1 }
  0x88   : > { %p5014_p9 = pnand %p5012_p0, %p5410_p12  ;;  %p5020_p11 = scmp.lt.s32.totalorder %s5018_s22, %s5011_s30 }
  0x8a   : > { %p5015_p10 = pneg %p5014_p9  ;;  %p5021_p5 = por %p5020_p11, %p5019_p2 }
  0x8c   : > { %p5022_p4 = pnand %p5021_p5, %p5015_p10 }
  0x8e   : > { %5025 = shalt.err (!%p5022_p4)
}
  0x8f   : > { %s6386_s24 = smov 256   ;;  %s6387_s13 = scalar_lea.sflag [#allocation8], %s5369_s11 }
  0x90   : > { %4508 = dma.hbm_to_vmem [thread:$0]  (!%p5397_p7), %s5442_s23, 4096, %s5446_s15, %s6387_s13, %s6386_s24, %s6386_s24, %s5223_s12  }
  0x91   : > { %s4069_s26 = sshll.u32 %s5216_s16, 7  ;;  %s413_s8 = scalar_lea.vmem [#allocation12], %s4068_s29 }
  0x92   : > { %s418_s25 = scalar_lea.hbm %s6330_s4, %s4069_s26  ;;  %s420_s10 = sshll.u32 %s413_s8, 4  ;;  %s421_s10 = int_to_ptr.vmem [resolvable:$true] %s420_s10 }
  0x93   : > { %s5026_s6 = scalar_lea.hbm %s418_s25, 128  ;;  %s5031_s1 = scalar_lea.hbm %s6330_s4, 384 }
  0x94   : > { %p5027_p6 = scmp.ne.s32.totalorder %s418_s25, %s5026_s6  ;;  %p5032_p1 = scmp.lt.s32.totalorder %s418_s25, %s6330_s4 }
  0x95   : > { %p5033_p3 = scmp.lt.s32.totalorder %s5031_s1, %s5026_s6 }
  0x96   : > { %p5029_p13 = pnand %p5027_p6, %p5410_p12 }
  0x97   : > { %p5034_p0 = por %p5033_p3, %p5032_p1 }
  0x98   : > { %p5030_p8 = pneg %p5029_p13 }
  0x9a   : > { %p5035_p9 = pnand %p5034_p0, %p5030_p8 }
  0x9c   : > { %5038 = shalt.err (!%p5035_p9)
}
  0x9d   : > { %s5039_s23 = scalar_lea.vmem %s421_s10, 128  ;;  %s5229_s22 = smov [#allocation12]  }
  0x9e   : > { %p5040_p10 = scmp.ne.s32.totalorder %s421_s10, %s5039_s23  ;;  %s5044_s24 = sshll.u32 %s5229_s22, 4  ;;  %s5045_s24 = int_to_ptr.vmem [resolvable:$false] %s5044_s24 }
  0x9f   : > { %s5046_s13 = scalar_lea.vmem %s5045_s24, 256  ;;  %p5047_p5 = scmp.lt.s32.totalorder %s421_s10, %s5045_s24 }
  0xa0   : > { %p5042_p2 = pnand %p5040_p10, %p5410_p12  ;;  %p5048_p4 = scmp.lt.s32.totalorder %s5046_s13, %s5039_s23 }
  0xa2   : > { %p5043_p11 = pneg %p5042_p2  ;;  %p5049_p6 = por %p5048_p4, %p5047_p5 }
  0xa4   : > { %p5050_p13 = pnand %p5049_p6, %p5043_p11 }
  0xa6   : > { %5053 = shalt.err (!%p5050_p13)
}
  0xa7   : > { %4514 = dma.hbm_to_vmem [thread:$0]  (!%p5397_p7), %s418_s25, 128, %s421_s10, %s391_s28  }
  0xa8   : > { %s5535_s8 = scalar_lea.hbm %s6331_s5, %s4069_s26  ;;  %s431_s6 = scalar_lea.vmem [#allocation13], %s4068_s29 }
  0xa9   : > { %s438_s30 = sshll.u32 %s431_s6, 4  ;;  %s428_s20 = scalar_lea.sflag [#allocation14], %s5369_s11  ;;  %s439_s30 = int_to_ptr.vmem [resolvable:$true] %s438_s30 }
  0xaa   : > { %s5054_s1 = scalar_lea.hbm %s5535_s8, 128  ;;  %s5059_s10 = scalar_lea.hbm %s6331_s5, 384 }
  0xab   : > { %p5055_p8 = scmp.ne.s32.totalorder %s5535_s8, %s5054_s1  ;;  %p5060_p0 = scmp.lt.s32.totalorder %s5535_s8, %s6331_s5 }
  0xac   : > { %p5061_p9 = scmp.lt.s32.totalorder %s5059_s10, %s5054_s1 }
  0xad   : > { %p5057_p1 = pnand %p5055_p8, %p5410_p12 }
  0xae   : > { %p5062_p10 = por %p5061_p9, %p5060_p0 }
  0xaf   : > { %p5058_p3 = pneg %p5057_p1 }
  0xb1   : > { %p5063_p2 = pnand %p5062_p10, %p5058_p3 }
  0xb3   : > { %5066 = shalt.err (!%p5063_p2)
}
  0xb4   : > { %s5067_s18 = scalar_lea.vmem %s439_s30, 128  ;;  %s5230_s11 = smov [#allocation13]  }
  0xb5   : > { %p5068_p11 = scmp.ne.s32.totalorder %s439_s30, %s5067_s18  ;;  %s5072_s29 = sshll.u32 %s5230_s11, 4  ;;  %s5073_s29 = int_to_ptr.vmem [resolvable:$false] %s5072_s29 }
  0xb6   : > { %s5074_s12 = scalar_lea.vmem %s5073_s29, 256  ;;  %p5075_p6 = scmp.lt.s32.totalorder %s439_s30, %s5073_s29 }
  0xb7   : > { %p5070_p5 = pnand %p5068_p11, %p5410_p12  ;;  %p5076_p13 = scmp.lt.s32.totalorder %s5074_s12, %s5067_s18 }
  0xb9   : > { %p5071_p4 = pneg %p5070_p5  ;;  %p5077_p8 = por %p5076_p13, %p5075_p6 }
  0xbb   : > { %p5078_p1 = pnand %p5077_p8, %p5071_p4 }
  0xbd   : > { %5081 = shalt.err (!%p5078_p1)
}
  0xbe   : > { %4517 = dma.hbm_to_vmem [thread:$0]  (!%p5397_p7), %s5535_s8, 128, %s439_s30, %s428_s20  }
  0xbf   : > { %p6388_p3 = scmp.ne.s32.totalorder %s6375_s27, 0 }
  0xc0   : > { %p6389_p0 = scmp.eq.s32.totalorder (!%p6388_p3), %s5312_s17, 0 }
  0xc1   : > { %447 = sbr.rel (%p6388_p3) target bundleno = 3179 (0xc6b), region = 52 }
  0xc6   : > { %5175 = dma.done.wait (%p6389_p0), [#allocation5], 4096   ;;  %p6390_p12 = pmov %p6389_p0 }
  0xc7   : > { %s6391_s19 = sld [smem:[#allocation30_spill]]  ;;  %s5563_s23 = sand.u32 1, %s5312_s17  }
  0xc8   : > { %5177 = vsyncadd (%p6390_p12), [#allocation5], 4294963200  ;;  %s455_s22 = sand.u32 1, %s5208_s14   ;;  %s454_s21 = scalar_lea.sflag [#allocation8], %s5563_s23 }
  0xc9   : > { %s4074_s24 = sshll.u32 %s455_s22, 8 }
  0xca   : > { %s5567_s13 = scalar_lea.vmem [#allocation7], %s4074_s24 }
  0xcd   : > { %p6392_p7 = scmp.ne.s32.totalorder %s6391_s19, 0 }
  0xcf   : > { %5179 = dma.done.wait (%p6392_p7), %s454_s21, 8192  }
  0xd0   : > { %5181 = vsyncadd (%p6392_p7), %s454_s21, 4294959104  ;;  %s4076_s27 = sshll.u32 %s455_s22, 2  ;;  %s5573_s7 = scalar_lea.vmem [#allocation9], %s4074_s24 }
  0xd1   : > { %s472_s9 = scalar_lea.sflag [#allocation11], %s5563_s23  ;;  %s5576_s8 = scalar_lea.vmem [#allocation10], %s4076_s27 }
  0xd2   : > { %5183 = dma.done.wait (%p6392_p7), %s472_s9, 192  }
  0xd3   : > { %5185 = vsyncadd (%p6392_p7), %s472_s9, 4294967104  ;;  %s5582_s6 = sshll.u32 %s455_s22, 3  ;;  %s490_s20 = scalar_lea.sflag [#allocation14], %s5563_s23 }
  0xd4   : > { %s484_s30 = scalar_lea.vmem [#allocation12], %s5582_s6  ;;  %s493_s1 = scalar_lea.vmem [#allocation13], %s5582_s6 }
  0xd5   : > { %5187 = dma.done.wait (%p6392_p7), %s490_s20, 128  }
  0xd6   : > { %5189 = vsyncadd (%p6392_p7), %s490_s20, 4294967168  ;;  %p6393_p9 = pmov %p6389_p0 }
  0xd7   : > { %p6394_p10 = pmov %p6389_p0 }
  0xd8   : > { %5191 = dma.done.wait (%p6393_p9), [#allocation14], 1024  }
  0xd9   : > { %5193 = vsyncadd (%p6394_p10), [#allocation14], 4294966272  ;;  %s551_s28 = scalar_lea.vmem [#allocation17], %s5582_s6  ;;  %s558_s25 = scalar_lea.vmem [#allocation19], %s5582_s6 }
  0xda   : > { %p6395_p2 = scmp.ne.s32.totalorder %s5312_s17, 0 }
  0xdc   : > { %563 = sbr.rel (%p6395_p2) target bundleno = 242 (0xf2), region = 84 }
  0xe1   : > { %v564_v0 = vld [vmem:[#allocation4] sm:$0xff]  ;;  %v565_v1 = vld [vmem:[#allocation4 + $0x8] sm:$0xff]  ;;  %v566_v2 = vld [vmem:[#allocation4 + $0x10] sm:$0xff] }
  0xe2   : > { %596 = vst [vmem:[#allocation3] sm:$0xff] %v564_v0  ;;  %597 = vst [vmem:[#allocation3 + $0x18] sm:$0xff] %v565_v1  ;;  %v567_v3 = vld [vmem:[#allocation4 + $0x18] sm:$0xff]  ;;  %v568_v4 = vld [vmem:[#allocation4 + $0x20] sm:$0xff] }
  0xe3   : > { %598 = vst [vmem:[#allocation3 + $0x50] sm:$0xff] %v566_v2  ;;  %v569_v5 = vld [vmem:[#allocation4 + $0x28] sm:$0xff]  ;;  %599 = vst [vmem:[#allocation3 + $0xe0] sm:$0xff] %v567_v3  ;;  %v570_v6 = vld [vmem:[#allocation4 + $0x30] sm:$0xff] }
  0xe4   : > { %600 = vst [vmem:[#allocation3 + $0xe8] sm:$0xff] %v568_v4  ;;  %601 = vst [vmem:[#allocation3 + $0x68] sm:$0xff] %v569_v5  ;;  %v571_v7 = vld [vmem:[#allocation4 + $0x38] sm:$0xff]  ;;  %v572_v8 = vld [vmem:[#allocation4 + $0x40] sm:$0xff] }
  0xe5   : > { %602 = vst [vmem:[#allocation3 + $0xf0] sm:$0xff] %v570_v6  ;;  %603 = vst [vmem:[#allocation3 + $0xd0] sm:$0xff] %v571_v7  ;;  %v573_v9 = vld [vmem:[#allocation4 + $0x48] sm:$0xff]  ;;  %v574_v10 = vld [vmem:[#allocation4 + $0x50] sm:$0xff] }
  0xe6   : > { %604 = vst [vmem:[#allocation3 + $0x20] sm:$0xff] %v572_v8  ;;  %v575_v11 = vld [vmem:[#allocation4 + $0x58] sm:$0xff]  ;;  %605 = vst [vmem:[#allocation3 + $0xa8] sm:$0xff] %v573_v9  ;;  %v576_v12 = vld [vmem:[#allocation4 + $0x60] sm:$0xff] }
  0xe7   : > { %606 = vst [vmem:[#allocation3 + $0x10] sm:$0xff] %v574_v10  ;;  %607 = vst [vmem:[#allocation3 + $0x8] sm:$0xff] %v575_v11  ;;  %v577_v13 = vld [vmem:[#allocation4 + $0x68] sm:$0xff]  ;;  %v578_v14 = vld [vmem:[#allocation4 + $0x70] sm:$0xff] }
  0xe8   : > { %608 = vst [vmem:[#allocation3 + $0xa0] sm:$0xff] %v576_v12  ;;  %609 = vst [vmem:[#allocation3 + $0x28] sm:$0xff] %v577_v13  ;;  %v579_v15 = vld [vmem:[#allocation4 + $0x78] sm:$0xff]  ;;  %v580_v16 = vld [vmem:[#allocation4 + $0x80] sm:$0xff] }
  0xe9   : > { %610 = vst [vmem:[#allocation3 + $0x78] sm:$0xff] %v578_v14  ;;  %v581_v17 = vld [vmem:[#allocation4 + $0x88] sm:$0xff]  ;;  %611 = vst [vmem:[#allocation3 + $0x60] sm:$0xff] %v579_v15  ;;  %v582_v18 = vld [vmem:[#allocation4 + $0x90] sm:$0xff] }
  0xea   : > { %612 = vst [vmem:[#allocation3 + $0xb0] sm:$0xff] %v580_v16  ;;  %613 = vst [vmem:[#allocation3 + $0xc8] sm:$0xff] %v581_v17  ;;  %v583_v19 = vld [vmem:[#allocation4 + $0x98] sm:$0xff]  ;;  %v584_v20 = vld [vmem:[#allocation4 + $0xa0] sm:$0xff] }
  0xeb   : > { %614 = vst [vmem:[#allocation3 + $0x70] sm:$0xff] %v582_v18  ;;  %615 = vst [vmem:[#allocation3 + $0x30] sm:$0xff] %v583_v19  ;;  %v585_v21 = vld [vmem:[#allocation4 + $0xa8] sm:$0xff]  ;;  %v586_v22 = vld [vmem:[#allocation4 + $0xb0] sm:$0xff] }
  0xec   : > { %616 = vst [vmem:[#allocation3 + $0x90] sm:$0xff] %v584_v20  ;;  %v587_v23 = vld [vmem:[#allocation4 + $0xb8] sm:$0xff]  ;;  %617 = vst [vmem:[#allocation3 + $0xf8] sm:$0xff] %v585_v21  ;;  %v588_v24 = vld [vmem:[#allocation4 + $0xc0] sm:$0xff] }
  0xed   : > { %618 = vst [vmem:[#allocation3 + $0xb8] sm:$0xff] %v586_v22  ;;  %619 = vst [vmem:[#allocation3 + $0x80] sm:$0xff] %v587_v23  ;;  %v589_v25 = vld [vmem:[#allocation4 + $0xc8] sm:$0xff]  ;;  %v590_v26 = vld [vmem:[#allocation4 + $0xd0] sm:$0xff] }
  0xee   : > { %620 = vst [vmem:[#allocation3 + $0x48] sm:$0xff] %v588_v24  ;;  %621 = vst [vmem:[#allocation3 + $0x38] sm:$0xff] %v589_v25  ;;  %v591_v27 = vld [vmem:[#allocation4 + $0xd8] sm:$0xff]  ;;  %v592_v28 = vld [vmem:[#allocation4 + $0xe0] sm:$0xff] }
  0xef   : > { %622 = vst [vmem:[#allocation3 + $0xd8] sm:$0xff] %v590_v26  ;;  %v593_v29 = vld [vmem:[#allocation4 + $0xe8] sm:$0xff]  ;;  %623 = vst [vmem:[#allocation3 + $0x98] sm:$0xff] %v591_v27  ;;  %v594_v30 = vld [vmem:[#allocation4 + $0xf0] sm:$0xff] }
  0xf0   : > { %624 = vst [vmem:[#allocation3 + $0x58] sm:$0xff] %v592_v28  ;;  %625 = vst [vmem:[#allocation3 + $0xc0] sm:$0xff] %v593_v29  ;;  %v595_v31 = vld [vmem:[#allocation4 + $0xf8] sm:$0xff] }
  0xf1   : > { %626 = vst [vmem:[#allocation3 + $0x40] sm:$0xff] %v594_v30  ;;  %627 = vst [vmem:[#allocation3 + $0x88] sm:$0xff] %v595_v31 }
  0xf2 PF: > { %p4083_p11 = scmp.le.s32.totalorder %s5312_s17, 0 }
  0xf4   : > { %631 = sbr.rel (%p4083_p11) target bundleno = 509 (0x1fd), region = 88 }
  0xf9   : > { %v4578_v32 = vld [vmem:[%s5567_s13 + $0xe4] ss:$16 sps:$4 sm:$0xff]   ;;  %v4580_v33 = vld [vmem:[%s5567_s13 + $0xec] ss:$16 sps:$4 sm:$0xff]   ;;  %v5231_v34 = vmov 0   ;;  %v678_v13 = vlaneseq }
  0xfa   : > { %890 = vmatprep.mubr.bf16.mxu0 %v5231_v34  ;;  %963 = vmatprep.mubr.bf16.mxu1 %v5231_v34  ;;  %v4582_v35 = vld [vmem:[%s5567_s13 + $0xe0] ss:$16 sps:$4 sm:$0xff]   ;;  %v4583_v36 = vld [vmem:[%s5567_s13 + $0xe8] ss:$16 sps:$4 sm:$0xff]   ;;  %v4584_v37 = vld [vmem:[%s5567_s13 + $0xc4] ss:$16 sps:$4 sm:$0xff]  }
  0xfb   : > { %858 = vmatprep.subr.bf16.mxu0 %v4578_v32  ;;  %931 = vmatprep.subr.bf16.mxu1 %v4580_v33  ;;  %v4586_v38 = vld [vmem:[%s5567_s13 + $0xcc] ss:$16 sps:$4 sm:$0xff]   ;;  %v4588_v39 = vld [vmem:[%s5567_s13 + $0xc0] ss:$16 sps:$4 sm:$0xff]   ;;  %v4589_v40 = vld [vmem:[%s5567_s13 + $0xc8] ss:$16 sps:$4 sm:$0xff]  }
  0xfc   : > { %859 = vmatpush1.bf16.msra.mxu0 %v4582_v35  ;;  %932 = vmatpush1.bf16.msra.mxu1 %v4583_v36  ;;  %v4590_v41 = vld [vmem:[%s5567_s13 + $0xa4] ss:$16 sps:$4 sm:$0xff]   ;;  %v4592_v42 = vld [vmem:[%s5567_s13 + $0xac] ss:$16 sps:$4 sm:$0xff]   ;;  %v4594_v43 = vld [vmem:[%s5567_s13 + $0xa0] ss:$16 sps:$4 sm:$0xff]  }
  0xfd   : > { %860 = vmatprep.subr.bf16.mxu0 %v4584_v37  ;;  %933 = vmatprep.subr.bf16.mxu1 %v4586_v38  ;;  %v4595_v44 = vld [vmem:[%s5567_s13 + $0xa8] ss:$16 sps:$4 sm:$0xff]   ;;  %v4596_v45 = vld [vmem:[%s5567_s13 + $0x84] ss:$16 sps:$4 sm:$0xff]   ;;  %v4598_v46 = vld [vmem:[%s5567_s13 + $0x8c] ss:$16 sps:$4 sm:$0xff]  }
  0xfe   : > { %v4600_v47 = vld [vmem:[%s5567_s13 + $0x80] ss:$16 sps:$4 sm:$0xff]   ;;  %v4601_v48 = vld [vmem:[%s5567_s13 + $0x88] ss:$16 sps:$4 sm:$0xff]   ;;  %v4602_v49 = vld [vmem:[%s5567_s13 + $0x64] ss:$16 sps:$4 sm:$0xff]  }
  0xff   : > { %v4604_v50 = vld [vmem:[%s5567_s13 + $0x6c] ss:$16 sps:$4 sm:$0xff]   ;;  %v4606_v51 = vld [vmem:[%s5567_s13 + $0x60] ss:$16 sps:$4 sm:$0xff]   ;;  %v4607_v52 = vld [vmem:[%s5567_s13 + $0x68] ss:$16 sps:$4 sm:$0xff]  }
 0x100   : > { %861 = vmatpush1.bf16.msra.mxu0 %v4588_v39  ;;  %934 = vmatpush1.bf16.msra.mxu1 %v4589_v40  ;;  %v4608_v53 = vld [vmem:[%s5567_s13 + $0x44] ss:$16 sps:$4 sm:$0xff]   ;;  %v4610_v54 = vld [vmem:[%s5567_s13 + $0x4c] ss:$16 sps:$4 sm:$0xff]   ;;  %v4612_v55 = vld [vmem:[%s5567_s13 + $0x40] ss:$16 sps:$4 sm:$0xff]  }
 0x101   : > { %862 = vmatprep.subr.bf16.mxu0 %v4590_v41  ;;  %935 = vmatprep.subr.bf16.mxu1 %v4592_v42  ;;  %v4613_v56 = vld [vmem:[%s5567_s13 + $0x48] ss:$16 sps:$4 sm:$0xff]   ;;  %v4614_v57 = vld [vmem:[%s5567_s13 + $0x24] ss:$16 sps:$4 sm:$0xff]   ;;  %v4616_v58 = vld [vmem:[%s5567_s13 + $0x2c] ss:$16 sps:$4 sm:$0xff]  }
 0x102   : > { %v4618_v59 = vld [vmem:[%s5567_s13 + $0x20] ss:$16 sps:$4 sm:$0xff]   ;;  %v4619_v60 = vld [vmem:[%s5567_s13 + $0x28] ss:$16 sps:$4 sm:$0xff]   ;;  %v4620_v61 = vld [vmem:[%s5567_s13 + $0x4] ss:$16 sps:$4 sm:$0xff]  }
 0x103   : > { %v4622_v62 = vld [vmem:[%s5567_s13 + $0xc] ss:$16 sps:$4 sm:$0xff]   ;;  %v4624_v63 = vld [vmem:[%s5567_s13] ss:$16 sps:$4 sm:$0xff]   ;;  %v4625_v0 = vld [vmem:[%s5567_s13 + $0x8] ss:$16 sps:$4 sm:$0xff]  }
 0x104   : > { %863 = vmatpush1.bf16.msra.mxu0 %v4594_v43  ;;  %936 = vmatpush1.bf16.msra.mxu1 %v4595_v44  ;;  %v632_v1 = vld [vmem:[#allocation2 + $0x30] sm:$0xff]  ;;  %v633_v2 = vld [vmem:[#allocation2] sm:$0xff]  ;;  %v634_v4 = vld [vmem:[#allocation2 + $0x18] sm:$0xff]  ;;  %v679_v14 = vshrl.u32 %v678_v13, 7 }
 0x105   : > { %864 = vmatprep.subr.bf16.mxu0 %v4596_v45  ;;  %937 = vmatprep.subr.bf16.mxu1 %v4598_v46  ;;  %v640_v3 = vpack.c.bf16 %v633_v2, %v632_v1  ;;  %v635_v5 = vld [vmem:[#allocation2 + $0x10] sm:$0xff]  ;;  %v636_v7 = vld [vmem:[#allocation2 + $0x8] sm:$0xff]  ;;  %v637_v8 = vld [vmem:[#allocation2 + $0x20] sm:$0xff] }
 0x106   : > { %v641_v6 = vpack.c.bf16 %v635_v5, %v634_v4  ;;  %v642_v9 = vpack.c.bf16 %v637_v8, %v636_v7  ;;  %v638_v10 = vld [vmem:[#allocation2 + $0x28] sm:$0xff]  ;;  %v639_v11 = vld [vmem:[#allocation2 + $0x38] sm:$0xff]  ;;  %v680_v15 = vsub.s32 0, %v679_v14  ;;  %v688_v16 = vsub.s32 2, %v679_v14  ;;  %v676_v17 = vld [vmem:[%s5576_s8] sm:$0xf] }
 0x107   : > { %v643_v12 = vpack.c.bf16 %v639_v11, %v638_v10  ;;  %v684_v18 = vsub.s32 1, %v679_v14  ;;  %v692_v19 = vsub.s32 3, %v679_v14 }
 0x108   : > { %865 = vmatpush1.bf16.msra.mxu0 %v4600_v47  ;;  %938 = vmatpush1.bf16.msra.mxu1 %v4601_v48  ;;  %v5641_v20 = vrot.slane %v676_v17, %v680_v15  ;;  %v5643_v21 = vrot.slane %v676_v17, %v688_v16 }
 0x109   : > { %866 = vmatprep.subr.bf16.mxu0 %v4602_v49  ;;  %939 = vmatprep.subr.bf16.mxu1 %v4604_v50  ;;  %v5645_v22 = vrot.slane %v676_v17, %v684_v18  ;;  %v5647_v23 = vrot.slane %v676_v17, %v692_v19 }
 0x10c   : > { %867 = vmatpush1.bf16.msra.mxu0 %v4606_v51  ;;  %940 = vmatpush1.bf16.msra.mxu1 %v4607_v52 }
 0x10d   : > { %868 = vmatprep.subr.bf16.mxu0 %v4608_v53  ;;  %941 = vmatprep.subr.bf16.mxu1 %v4610_v54 }
 0x110   : > { %869 = vmatpush1.bf16.msra.mxu0 %v4612_v55  ;;  %942 = vmatpush1.bf16.msra.mxu1 %v4613_v56 }
 0x111   : > { %870 = vmatprep.subr.bf16.mxu0 %v4614_v57  ;;  %943 = vmatprep.subr.bf16.mxu1 %v4616_v58 }
 0x114   : > { %871 = vmatpush1.bf16.msra.mxu0 %v4618_v59  ;;  %944 = vmatpush1.bf16.msra.mxu1 %v4619_v60 }
 0x115   : > { %872 = vmatprep.subr.bf16.mxu0 %v4620_v61  ;;  %945 = vmatprep.subr.bf16.mxu1 %v4622_v62 }
 0x118   : > { %873 = vmatpush1.bf16.msra.mxu0 %v4624_v63  ;;  %946 = vmatpush1.bf16.msra.mxu1 %v4625_v0 }
 0x11b   : > { %891 = vmatmul.mubr.bf16.vlgmr.msra.gmra.mxu0 %v640_v3  ;;  %964 = vmatmul.mubr.bf16.vlgmr.msra.gmra.mxu1 %v640_v3 }
 0x11c   : > { %900 = vmatprep.mubr.bf16.mxu0 %v5231_v34  ;;  %973 = vmatprep.mubr.bf16.mxu1 %v5231_v34 }
 0x123   : > { %901 = vmatmul.mubr.bf16.gmra.mxu0 %v641_v6  ;;  %974 = vmatmul.mubr.bf16.gmra.mxu1 %v641_v6 }
 0x124   : > { %910 = vmatprep.mubr.bf16.mxu0 %v5231_v34  ;;  %983 = vmatprep.mubr.bf16.mxu1 %v5231_v34 }
 0x12b   : > { %911 = vmatmul.mubr.bf16.gmra.mxu0 %v642_v9  ;;  %984 = vmatmul.mubr.bf16.gmra.mxu1 %v642_v9 }
 0x12c   : > { %920 = vmatprep.mubr.bf16.mxu0 %v5231_v34  ;;  %993 = vmatprep.mubr.bf16.mxu1 %v5231_v34 }
 0x133   : > { %921 = vmatmul.mubr.bf16.gmra.mxu0 %v643_v12  ;;  %994 = vmatmul.mubr.bf16.gmra.mxu1 %v643_v12 }
 0x1db   : > { %v892_v24 = vpop.f32.mrf.mxu0  ;;  %v965_v25 = vpop.f32.mrf.mxu1 }
 0x1dc   : > { %v893_v26 = vadd.f32 %v892_v24, %v5641_v20  ;;  %v966_v27 = vadd.f32 %v965_v25, %v5643_v21 }
 0x1dd   : > { %v894_v28 = vpop.f32.mrf.mxu0  ;;  %v967_v29 = vpop.f32.mrf.mxu1 }
 0x1de   : > { %1004 = vst [vmem:[#allocation3] sm:$0xff] %v893_v26  ;;  %1006 = vst [vmem:[#allocation3 + $0x50] sm:$0xff] %v966_v27  ;;  %v895_v30 = vadd.f32 %v894_v28, %v5645_v22  ;;  %v968_v31 = vadd.f32 %v967_v29, %v5647_v23 }
 0x1df   : > { %v896_v32 = vpop.f32.mrf.mxu0  ;;  %v969_v33 = vpop.f32.mrf.mxu1 }
 0x1e0   : > { %1005 = vst [vmem:[#allocation3 + $0x18] sm:$0xff] %v895_v30  ;;  %1007 = vst [vmem:[#allocation3 + $0xe0] sm:$0xff] %v968_v31  ;;  %v897_v34 = vadd.f32 %v896_v32, %v5641_v20  ;;  %v970_v35 = vadd.f32 %v969_v33, %v5643_v21 }
 0x1e1   : > { %v898_v36 = vpop.f32.mrf.mxu0  ;;  %v971_v37 = vpop.f32.mrf.mxu1 }
 0x1e2   : > { %1008 = vst [vmem:[#allocation3 + $0xe8] sm:$0xff] %v897_v34  ;;  %1010 = vst [vmem:[#allocation3 + $0xf0] sm:$0xff] %v970_v35  ;;  %v899_v38 = vadd.f32 %v898_v36, %v5645_v22  ;;  %v972_v39 = vadd.f32 %v971_v37, %v5647_v23 }
 0x1e3   : > { %v902_v40 = vpop.f32.mrf.mxu0  ;;  %v975_v41 = vpop.f32.mrf.mxu1 }
 0x1e4   : > { %1009 = vst [vmem:[#allocation3 + $0x68] sm:$0xff] %v899_v38  ;;  %1011 = vst [vmem:[#allocation3 + $0xd0] sm:$0xff] %v972_v39  ;;  %v903_v42 = vadd.f32 %v902_v40, %v5641_v20  ;;  %v976_v43 = vadd.f32 %v975_v41, %v5643_v21 }
 0x1e5   : > { %v904_v44 = vpop.f32.mrf.mxu0  ;;  %v977_v45 = vpop.f32.mrf.mxu1 }
 0x1e6   : > { %1012 = vst [vmem:[#allocation3 + $0x20] sm:$0xff] %v903_v42  ;;  %1014 = vst [vmem:[#allocation3 + $0x10] sm:$0xff] %v976_v43  ;;  %v905_v46 = vadd.f32 %v904_v44, %v5645_v22  ;;  %v978_v47 = vadd.f32 %v977_v45, %v5647_v23 }
 0x1e7   : > { %v906_v48 = vpop.f32.mrf.mxu0  ;;  %v979_v49 = vpop.f32.mrf.mxu1 }
 0x1e8   : > { %1013 = vst [vmem:[#allocation3 + $0xa8] sm:$0xff] %v905_v46  ;;  %1015 = vst [vmem:[#allocation3 + $0x8] sm:$0xff] %v978_v47  ;;  %v907_v50 = vadd.f32 %v906_v48, %v5641_v20  ;;  %v980_v51 = vadd.f32 %v979_v49, %v5643_v21 }
 0x1e9   : > { %v908_v52 = vpop.f32.mrf.mxu0  ;;  %v981_v53 = vpop.f32.mrf.mxu1 }
 0x1ea   : > { %1016 = vst [vmem:[#allocation3 + $0xa0] sm:$0xff] %v907_v50  ;;  %1018 = vst [vmem:[#allocation3 + $0x78] sm:$0xff] %v980_v51  ;;  %v909_v54 = vadd.f32 %v908_v52, %v5645_v22  ;;  %v982_v55 = vadd.f32 %v981_v53, %v5647_v23 }
 0x1eb   : > { %v912_v56 = vpop.f32.mrf.mxu0  ;;  %v985_v57 = vpop.f32.mrf.mxu1 }
 0x1ec   : > { %1017 = vst [vmem:[#allocation3 + $0x28] sm:$0xff] %v909_v54  ;;  %1019 = vst [vmem:[#allocation3 + $0x60] sm:$0xff] %v982_v55  ;;  %v913_v58 = vadd.f32 %v912_v56, %v5641_v20  ;;  %v986_v59 = vadd.f32 %v985_v57, %v5643_v21 }
 0x1ed   : > { %v914_v60 = vpop.f32.mrf.mxu0  ;;  %v987_v61 = vpop.f32.mrf.mxu1 }
 0x1ee   : > { %1020 = vst [vmem:[#allocation3 + $0xb0] sm:$0xff] %v913_v58  ;;  %1022 = vst [vmem:[#allocation3 + $0x70] sm:$0xff] %v986_v59  ;;  %v915_v62 = vadd.f32 %v914_v60, %v5645_v22  ;;  %v988_v63 = vadd.f32 %v987_v61, %v5647_v23 }
 0x1ef   : > { %v916_v0 = vpop.f32.mrf.mxu0  ;;  %v989_v1 = vpop.f32.mrf.mxu1 }
 0x1f0   : > { %1021 = vst [vmem:[#allocation3 + $0xc8] sm:$0xff] %v915_v62  ;;  %1023 = vst [vmem:[#allocation3 + $0x30] sm:$0xff] %v988_v63  ;;  %v917_v2 = vadd.f32 %v916_v0, %v5641_v20  ;;  %v990_v3 = vadd.f32 %v989_v1, %v5643_v21 }
 0x1f1   : > { %v918_v4 = vpop.f32.mrf.mxu0  ;;  %v991_v5 = vpop.f32.mrf.mxu1 }
 0x1f2   : > { %1024 = vst [vmem:[#allocation3 + $0x90] sm:$0xff] %v917_v2  ;;  %1026 = vst [vmem:[#allocation3 + $0xb8] sm:$0xff] %v990_v3  ;;  %v919_v6 = vadd.f32 %v918_v4, %v5645_v22  ;;  %v992_v7 = vadd.f32 %v991_v5, %v5647_v23 }
 0x1f3   : > { %v922_v8 = vpop.f32.mrf.mxu0  ;;  %v995_v9 = vpop.f32.mrf.mxu1 }
 0x1f4   : > { %1025 = vst [vmem:[#allocation3 + $0xf8] sm:$0xff] %v919_v6  ;;  %1027 = vst [vmem:[#allocation3 + $0x80] sm:$0xff] %v992_v7  ;;  %v923_v10 = vadd.f32 %v922_v8, %v5641_v20  ;;  %v996_v11 = vadd.f32 %v995_v9, %v5643_v21 }
 0x1f5   : > { %v924_v12 = vpop.f32.mrf.mxu0  ;;  %v997_v13 = vpop.f32.mrf.mxu1 }
 0x1f6   : > { %1028 = vst [vmem:[#allocation3 + $0x48] sm:$0xff] %v923_v10  ;;  %1030 = vst [vmem:[#allocation3 + $0xd8] sm:$0xff] %v996_v11  ;;  %v925_v14 = vadd.f32 %v924_v12, %v5645_v22  ;;  %v998_v15 = vadd.f32 %v997_v13, %v5647_v23 }
 0x1f7   : > { %v926_v16 = vpop.f32.mrf.mxu0  ;;  %v999_v17 = vpop.f32.mrf.mxu1 }
 0x1f8   : > { %1029 = vst [vmem:[#allocation3 + $0x38] sm:$0xff] %v925_v14  ;;  %1031 = vst [vmem:[#allocation3 + $0x98] sm:$0xff] %v998_v15  ;;  %v927_v18 = vadd.f32 %v926_v16, %v5641_v20  ;;  %v1000_v19 = vadd.f32 %v999_v17, %v5643_v21 }
 0x1f9   : > { %v928_v24 = vpop.f32.mrf.mxu0  ;;  %v1001_v25 = vpop.f32.mrf.mxu1 }
 0x1fa   : > { %1032 = vst [vmem:[#allocation3 + $0x58] sm:$0xff] %v927_v18  ;;  %1034 = vst [vmem:[#allocation3 + $0x40] sm:$0xff] %v1000_v19  ;;  %v929_v26 = vadd.f32 %v928_v24, %v5645_v22  ;;  %v1002_v27 = vadd.f32 %v1001_v25, %v5647_v23 }
 0x1fc   : > { %1033 = vst [vmem:[#allocation3 + $0xc0] sm:$0xff] %v929_v26  ;;  %1035 = vst [vmem:[#allocation3 + $0x88] sm:$0xff] %v1002_v27 }
 0x1fd PF: > { %v5682_v20 = vld [vmem:[%s5573_s7 + $0xe4] ss:$16 sps:$4 sm:$0xff]   ;;  %v5685_v21 = vld [vmem:[%s5573_s7 + $0xe0] ss:$16 sps:$4 sm:$0xff]   ;;  %v5232_v28 = vmov 0   ;;  %v1042_v61 = vld [vmem:[#allocation3 + $0x18] sm:$0xff] }
 0x1fe   : > { %1270 = vmatprep.mubr.bf16.mxu0 %v5232_v28  ;;  %1311 = vmatprep.mubr.bf16.mxu1 %v5232_v28  ;;  %v5691_v22 = vld [vmem:[%s5573_s7 + $0xc4] ss:$16 sps:$4 sm:$0xff]   ;;  %v5695_v23 = vld [vmem:[%s5573_s7 + $0xc0] ss:$16 sps:$4 sm:$0xff]   ;;  %v5702_v30 = vld [vmem:[%s5573_s7 + $0xec] ss:$16 sps:$4 sm:$0xff]  }
 0x1ff   : > { %1238 = vmatprep.subr.bf16.mxu0 %v5682_v20  ;;  %v5699_v29 = vld [vmem:[%s5573_s7 + $0xa4] ss:$16 sps:$4 sm:$0xff]   ;;  %v5705_v31 = vld [vmem:[%s5573_s7 + $0xe8] ss:$16 sps:$4 sm:$0xff]   ;;  %v5709_v32 = vld [vmem:[%s5573_s7 + $0xa0] ss:$16 sps:$4 sm:$0xff]   ;;  %1279 = vmatprep.subr.bf16.mxu1 %v5702_v30 }
 0x200   : > { %1239 = vmatpush1.bf16.msra.mxu0 %v5685_v21  ;;  %v5714_v33 = vld [vmem:[%s5573_s7 + $0x84] ss:$16 sps:$4 sm:$0xff]   ;;  %1280 = vmatpush1.bf16.msra.mxu1 %v5705_v31  ;;  %v5718_v34 = vld [vmem:[%s5573_s7 + $0xcc] ss:$16 sps:$4 sm:$0xff]   ;;  %v5721_v35 = vld [vmem:[%s5573_s7 + $0xc8] ss:$16 sps:$4 sm:$0xff]  }
 0x201   : > { %1240 = vmatprep.subr.bf16.mxu0 %v5691_v22  ;;  %1281 = vmatprep.subr.bf16.mxu1 %v5718_v34  ;;  %v5726_v36 = vld [vmem:[%s5573_s7 + $0x80] ss:$16 sps:$4 sm:$0xff]   ;;  %v5729_v37 = vld [vmem:[%s5573_s7 + $0x64] ss:$16 sps:$4 sm:$0xff]   ;;  %v5732_v38 = vld [vmem:[%s5573_s7 + $0xac] ss:$16 sps:$4 sm:$0xff]  }
 0x202   : > { %v5737_v39 = vld [vmem:[%s5573_s7 + $0xa8] ss:$16 sps:$4 sm:$0xff]   ;;  %v5741_v40 = vld [vmem:[%s5573_s7 + $0x8c] ss:$16 sps:$4 sm:$0xff]   ;;  %v5745_v41 = vld [vmem:[%s5573_s7 + $0x60] ss:$16 sps:$4 sm:$0xff]  }
 0x203   : > { %v5749_v42 = vld [vmem:[%s5573_s7 + $0x44] ss:$16 sps:$4 sm:$0xff]   ;;  %v5753_v43 = vld [vmem:[%s5573_s7 + $0x88] ss:$16 sps:$4 sm:$0xff]   ;;  %v5757_v44 = vld [vmem:[%s5573_s7 + $0x6c] ss:$16 sps:$4 sm:$0xff]  }
 0x204   : > { %1241 = vmatpush1.bf16.msra.mxu0 %v5695_v23  ;;  %1282 = vmatpush1.bf16.msra.mxu1 %v5721_v35  ;;  %v5760_v45 = vld [vmem:[%s5573_s7 + $0x40] ss:$16 sps:$4 sm:$0xff]   ;;  %v5764_v46 = vld [vmem:[%s5573_s7 + $0x24] ss:$16 sps:$4 sm:$0xff]   ;;  %v5769_v47 = vld [vmem:[%s5573_s7 + $0x68] ss:$16 sps:$4 sm:$0xff]  }
 0x205   : > { %1242 = vmatprep.subr.bf16.mxu0 %v5699_v29  ;;  %1283 = vmatprep.subr.bf16.mxu1 %v5732_v38  ;;  %v5772_v48 = vld [vmem:[%s5573_s7 + $0x20] ss:$16 sps:$4 sm:$0xff]   ;;  %v5776_v49 = vld [vmem:[%s5573_s7 + $0x4c] ss:$16 sps:$4 sm:$0xff]   ;;  %v5779_v50 = vld [vmem:[%s5573_s7 + $0x4] ss:$16 sps:$4 sm:$0xff]  }
 0x206   : > { %v5782_v51 = vld [vmem:[%s5573_s7 + $0x48] ss:$16 sps:$4 sm:$0xff]   ;;  %v5786_v52 = vld [vmem:[%s5573_s7 + $0x2c] ss:$16 sps:$4 sm:$0xff]   ;;  %v5791_v53 = vld [vmem:[%s5573_s7] ss:$16 sps:$4 sm:$0xff]  }
 0x207   : > { %v1036_v54 = vld [vmem:[%s484_s30] sm:$0xff]  ;;  %v1041_v59 = vld [vmem:[#allocation3] sm:$0xff]  ;;  %p4396_p5 = scmp.ne.s32.totalorder %s5312_s17, 2 }
 0x208   : > { %1243 = vmatpush1.bf16.msra.mxu0 %v5709_v32  ;;  %1284 = vmatpush1.bf16.msra.mxu1 %v5737_v39  ;;  %v5797_v55 = vld [vmem:[%s5573_s7 + $0x28] ss:$16 sps:$4 sm:$0xff]   ;;  %v5801_v56 = vld [vmem:[%s5573_s7 + $0xc] ss:$16 sps:$4 sm:$0xff]   ;;  %v1045_v57 = vpack.c.bf16 %v1036_v54, %v1036_v54  ;;  %v1044_v7 = vld [vmem:[#allocation3 + $0xe0] sm:$0xff]  ;;  %s6396_s26 = sld [smem:[#allocation35_spill]] (!%p4396_p5) }
 0x209   : > { %1244 = vmatprep.subr.bf16.mxu0 %v5714_v33  ;;  %1285 = vmatprep.subr.bf16.mxu1 %v5741_v40  ;;  %v5809_v58 = vld [vmem:[%s5573_s7 + $0x8] ss:$16 sps:$4 sm:$0xff]   ;;  %v1043_v10 = vld [vmem:[#allocation3 + $0x50] sm:$0xff] }
 0x20a   : > { %v1037_v25 = vld [vmem:[%s493_s1] sm:$0xff] }
 0x20c   : > { %1245 = vmatpush1.bf16.msra.mxu0 %v5726_v36  ;;  %1286 = vmatpush1.bf16.msra.mxu1 %v5753_v43 }
 0x20d   : > { %1246 = vmatprep.subr.bf16.mxu0 %v5729_v37  ;;  %1287 = vmatprep.subr.bf16.mxu1 %v5757_v44 }
 0x210   : > { %1247 = vmatpush1.bf16.msra.mxu0 %v5745_v41  ;;  %1288 = vmatpush1.bf16.msra.mxu1 %v5769_v47 }
 0x211   : > { %1248 = vmatprep.subr.bf16.mxu0 %v5749_v42  ;;  %1289 = vmatprep.subr.bf16.mxu1 %v5776_v49 }
 0x214   : > { %1249 = vmatpush1.bf16.msra.mxu0 %v5760_v45  ;;  %1290 = vmatpush1.bf16.msra.mxu1 %v5782_v51 }
 0x215   : > { %1250 = vmatprep.subr.bf16.mxu0 %v5764_v46  ;;  %1291 = vmatprep.subr.bf16.mxu1 %v5786_v52 }
 0x218   : > { %1251 = vmatpush1.bf16.msra.mxu0 %v5772_v48  ;;  %1292 = vmatpush1.bf16.msra.mxu1 %v5797_v55 }
 0x219   : > { %1252 = vmatprep.subr.bf16.mxu0 %v5779_v50  ;;  %1293 = vmatprep.subr.bf16.mxu1 %v5801_v56 }
 0x21c   : > { %1253 = vmatpush1.bf16.msra.mxu0 %v5791_v53  ;;  %1294 = vmatpush1.bf16.msra.mxu1 %v5809_v58 }
 0x21d   : > { %1549 = vmatprep.subr.bf16.mxu0 %v5682_v20  ;;  %1590 = vmatprep.subr.bf16.mxu1 %v5702_v30 }
 0x21f   : > { %1271 = vmatmul.mubr.bf16.vlgmr.msra.gmra.mxu0 %v1045_v57  ;;  %1312 = vmatmul.mubr.bf16.vlgmr.msra.gmra.mxu1 %v1045_v57 }
 0x220   : > { %1550 = vmatpush1.bf16.msra.mxu0 %v5685_v21  ;;  %1581 = vmatprep.mubr.bf16.mxu0 %v5232_v28 }
 0x221   : > { %1551 = vmatprep.subr.bf16.mxu0 %v5691_v22  ;;  %1591 = vmatpush1.bf16.msra.mxu1 %v5705_v31 }
 0x222   : > { %1592 = vmatprep.subr.bf16.mxu1 %v5718_v34  ;;  %1622 = vmatprep.mubr.bf16.mxu1 %v5232_v28 }
 0x224   : > { %1552 = vmatpush1.bf16.msra.mxu0 %v5695_v23 }
 0x225   : > { %1553 = vmatprep.subr.bf16.mxu0 %v5699_v29  ;;  %1593 = vmatpush1.bf16.msra.mxu1 %v5721_v35 }
 0x226   : > { %1594 = vmatprep.subr.bf16.mxu1 %v5732_v38 }
 0x228   : > { %1554 = vmatpush1.bf16.msra.mxu0 %v5709_v32 }
 0x229   : > { %1555 = vmatprep.subr.bf16.mxu0 %v5714_v33  ;;  %1595 = vmatpush1.bf16.msra.mxu1 %v5737_v39 }
 0x22a   : > { %1596 = vmatprep.subr.bf16.mxu1 %v5741_v40 }
 0x22c   : > { %1556 = vmatpush1.bf16.msra.mxu0 %v5726_v36 }
 0x22d   : > { %1557 = vmatprep.subr.bf16.mxu0 %v5729_v37  ;;  %1597 = vmatpush1.bf16.msra.mxu1 %v5753_v43 }
 0x22e   : > { %1598 = vmatprep.subr.bf16.mxu1 %v5757_v44 }
 0x230   : > { %1558 = vmatpush1.bf16.msra.mxu0 %v5745_v41 }
 0x231   : > { %1559 = vmatprep.subr.bf16.mxu0 %v5749_v42  ;;  %1599 = vmatpush1.bf16.msra.mxu1 %v5769_v47 }
 0x232   : > { %1600 = vmatprep.subr.bf16.mxu1 %v5776_v49 }
 0x234   : > { %1560 = vmatpush1.bf16.msra.mxu0 %v5760_v45 }
 0x235   : > { %1561 = vmatprep.subr.bf16.mxu0 %v5764_v46  ;;  %1601 = vmatpush1.bf16.msra.mxu1 %v5782_v51 }
 0x236   : > { %1602 = vmatprep.subr.bf16.mxu1 %v5786_v52 }
 0x238   : > { %1562 = vmatpush1.bf16.msra.mxu0 %v5772_v48 }
 0x239   : > { %1563 = vmatprep.subr.bf16.mxu0 %v5779_v50  ;;  %1603 = vmatpush1.bf16.msra.mxu1 %v5797_v55 }
 0x23a   : > { %1604 = vmatprep.subr.bf16.mxu1 %v5801_v56 }
 0x23c   : > { %1564 = vmatpush1.bf16.msra.mxu0 %v5791_v53 }
 0x23d   : > { %1861 = vmatprep.subr.bf16.mxu0 %v5682_v20  ;;  %1605 = vmatpush1.bf16.msra.mxu1 %v5809_v58 }
 0x23e   : > { %1902 = vmatprep.subr.bf16.mxu1 %v5702_v30 }
 0x2df   : > { %v1272_v60 = vpop.f32.mrf.mxu0  ;;  %v1313_v4 = vpop.f32.mrf.mxu1 }
 0x2e0   : > { %v1320_v62 = vadd.f32 %v1272_v60, %v1041_v59  ;;  %v1322_v12 = vadd.f32 %v1313_v4, %v1043_v10 }
 0x2e1   : > { %v1274_v63 = vpop.f32.mrf.mxu0  ;;  %v1315_v6 = vpop.f32.mrf.mxu1 }
 0x2e2   : > { %v4148_v0 = vmul.f32 -1.442695, %v1320_v62  ;;  %v1321_v1 = vadd.f32 %v1274_v63, %v1042_v61  ;;  %v1323_v11 = vadd.f32 %v1315_v6, %v1044_v7 }
 0x2e3   : > { %v1276_v2 = vpop.f32.mrf.mxu0  ;;  %v1317_v8 = vpop.f32.mrf.mxu1 }
 0x2e4   : > { %4722 = vpow2.f32 %v4148_v0  ;;  %v4149_v3 = vmul.f32 -1.442695, %v1321_v1  ;;  %v4150_v13 = vmul.f32 -1.442695, %v1323_v11  ;;  %v1352_v0 = vld [vmem:[#allocation3 + $0xe8] sm:$0xff] }
 0x2e5   : > { %v1277_v5 = vpop.f32.mrf.mxu0  ;;  %v1318_v9 = vpop.f32.mrf.mxu1 }
 0x2e6   : > { %4724 = vpow2.f32 %v4149_v3  ;;  %v1353_v3 = vld [vmem:[#allocation3 + $0x68] sm:$0xff] }
 0x2e7   : > { %4726 = vtanh.f32 %v1322_v12 }
 0x2e8   : > { %4728 = vpow2.f32 %v4150_v13 }
 0x2f1   : > { %v4723_v14 = vpop.eup %4722 }
 0x2f2   : > { %v1327_v15 = vadd.f32 1.0, %v4723_v14  ;;  %v1355_v14 = vld [vmem:[#allocation3 + $0xd0] sm:$0xff] }
 0x2f3   : > { %v4725_v16 = vpop.eup %4724 }
 0x2f4   : > { %4730 = vrcp.f32 %v1327_v15  ;;  %v1333_v17 = vadd.f32 1.0, %v4725_v16  ;;  %v4727_v18 = vpop.eup %4726  ;;  %v1354_v15 = vld [vmem:[#allocation3 + $0xf0] sm:$0xff] }
 0x2f5   : > { %v4729_v19 = vpop.eup %4728 }
 0x2f6   : > { %4732 = vrcp.f32 %v1333_v17  ;;  %v1340_v27 = vadd.f32 1.0, %v4729_v19 }
 0x2f8   : > { %4734 = vrcp.f32 %v1340_v27 }
 0x301   : > { %v4731_v24 = vpop.eup %4730 }
 0x302   : > { %v1344_v57 = vmul.f32 %v4731_v24, %v4727_v18 }
 0x303   : > { %v4733_v26 = vpop.eup %4732 }
 0x304   : > { %v1343_v54 = vmul.f32 %v4733_v26, %v1037_v25 }
 0x305   : > { %v4735_v60 = vpop.eup %4734 }
 0x306   : > { %v5851_v59 = vadd.f32 %v1344_v57, %v1343_v54 }
 0x308   : > { %4736 = vtanh.f32 %v5851_v59 }
 0x315   : > { %v4737_v61 = vpop.eup %4736 }
 0x316   : > { %v1347_v62 = vmul.f32 %v4737_v61, %v4735_v60 }
 0x318   : > { %1348 = vst [vmem:[#allocation2 + $0x30] sm:$0xff] %v1347_v62  ;;  %v1356_v63 = vpack.c.bf16 %v1347_v62, %v1347_v62 }
 0x31a   : > { %1582 = vmatmul.mubr.bf16.vlgmr.msra.gmra.mxu0 %v1356_v63  ;;  %1623 = vmatmul.mubr.bf16.vlgmr.msra.gmra.mxu1 %v1356_v63 }
 0x31b   : > { %1862 = vmatpush1.bf16.msra.mxu0 %v5685_v21  ;;  %1903 = vmatpush1.bf16.msra.mxu1 %v5705_v31 }
 0x31c   : > { %1863 = vmatprep.subr.bf16.mxu0 %v5691_v22  ;;  %1904 = vmatprep.subr.bf16.mxu1 %v5718_v34 }
 0x31d   : > { %1893 = vmatprep.mubr.bf16.mxu0 %v5232_v28  ;;  %1934 = vmatprep.mubr.bf16.mxu1 %v5232_v28 }
 0x31f   : > { %1864 = vmatpush1.bf16.msra.mxu0 %v5695_v23  ;;  %1905 = vmatpush1.bf16.msra.mxu1 %v5721_v35 }
 0x320   : > { %1865 = vmatprep.subr.bf16.mxu0 %v5699_v29  ;;  %1906 = vmatprep.subr.bf16.mxu1 %v5732_v38 }
 0x323   : > { %1866 = vmatpush1.bf16.msra.mxu0 %v5709_v32  ;;  %1907 = vmatpush1.bf16.msra.mxu1 %v5737_v39 }
 0x324   : > { %1867 = vmatprep.subr.bf16.mxu0 %v5714_v33  ;;  %1908 = vmatprep.subr.bf16.mxu1 %v5741_v40 }
 0x327   : > { %1868 = vmatpush1.bf16.msra.mxu0 %v5726_v36  ;;  %1909 = vmatpush1.bf16.msra.mxu1 %v5753_v43 }
 0x328   : > { %1869 = vmatprep.subr.bf16.mxu0 %v5729_v37  ;;  %1910 = vmatprep.subr.bf16.mxu1 %v5757_v44 }
 0x32b   : > { %1870 = vmatpush1.bf16.msra.mxu0 %v5745_v41  ;;  %1911 = vmatpush1.bf16.msra.mxu1 %v5769_v47 }
 0x32c   : > { %1871 = vmatprep.subr.bf16.mxu0 %v5749_v42  ;;  %1912 = vmatprep.subr.bf16.mxu1 %v5776_v49 }
 0x32f   : > { %1872 = vmatpush1.bf16.msra.mxu0 %v5760_v45  ;;  %1913 = vmatpush1.bf16.msra.mxu1 %v5782_v51 }
 0x330   : > { %1873 = vmatprep.subr.bf16.mxu0 %v5764_v46  ;;  %1914 = vmatprep.subr.bf16.mxu1 %v5786_v52 }
 0x333   : > { %1874 = vmatpush1.bf16.msra.mxu0 %v5772_v48  ;;  %1915 = vmatpush1.bf16.msra.mxu1 %v5797_v55 }
 0x334   : > { %1875 = vmatprep.subr.bf16.mxu0 %v5779_v50  ;;  %1916 = vmatprep.subr.bf16.mxu1 %v5801_v56 }
 0x337   : > { %1876 = vmatpush1.bf16.msra.mxu0 %v5791_v53  ;;  %1917 = vmatpush1.bf16.msra.mxu1 %v5809_v58 }
 0x338   : > { %2173 = vmatprep.subr.bf16.mxu0 %v5682_v20  ;;  %2214 = vmatprep.subr.bf16.mxu1 %v5702_v30 }
 0x3da   : > { %v1583_v1 = vpop.f32.mrf.mxu0  ;;  %v1624_v2 = vpop.f32.mrf.mxu1 }
 0x3db   : > { %v1631_v4 = vadd.f32 %v1583_v1, %v1352_v0  ;;  %v1633_v17 = vadd.f32 %v1624_v2, %v1354_v15  ;;  %v5966_v15 = vld [vmem:[%s5573_s7 + $0xac] ss:$16 sps:$4 sm:$0xff]  }
 0x3dc   : > { %v1585_v5 = vpop.f32.mrf.mxu0  ;;  %v1626_v6 = vpop.f32.mrf.mxu1 }
 0x3dd   : > { %v4183_v7 = vmul.f32 -1.442695, %v1631_v4  ;;  %v1632_v8 = vadd.f32 %v1585_v5, %v1353_v3  ;;  %v1634_v20 = vadd.f32 %v1626_v6, %v1355_v14  ;;  %v5956_v14 = vld [vmem:[%s5573_s7 + $0xc8] ss:$16 sps:$4 sm:$0xff]  }
 0x3de   : > { %v1587_v9 = vpop.f32.mrf.mxu0  ;;  %v1628_v10 = vpop.f32.mrf.mxu1 }
 0x3df   : > { %4738 = vpow2.f32 %v4183_v7  ;;  %v4184_v11 = vmul.f32 -1.442695, %v1632_v8  ;;  %v4185_v30 = vmul.f32 -1.442695, %v1634_v20  ;;  %v5931_v7 = vld [vmem:[%s5573_s7 + $0xe4] ss:$16 sps:$4 sm:$0xff]  }
 0x3e0   : > { %v1588_v12 = vpop.f32.mrf.mxu0  ;;  %v1629_v13 = vpop.f32.mrf.mxu1  ;;  %v5934_v8 = vld [vmem:[%s5573_s7 + $0xec] ss:$16 sps:$4 sm:$0xff]   ;;  %v5937_v9 = vld [vmem:[%s5573_s7 + $0xe0] ss:$16 sps:$4 sm:$0xff]   ;;  %v5940_v10 = vld [vmem:[%s5573_s7 + $0xe8] ss:$16 sps:$4 sm:$0xff]  }
 0x3e1   : > { %4740 = vpow2.f32 %v4184_v11  ;;  %v5947_v11 = vld [vmem:[%s5573_s7 + $0xc4] ss:$16 sps:$4 sm:$0xff]   ;;  %v5950_v12 = vld [vmem:[%s5573_s7 + $0xcc] ss:$16 sps:$4 sm:$0xff]   ;;  %v5953_v13 = vld [vmem:[%s5573_s7 + $0xc0] ss:$16 sps:$4 sm:$0xff]  }
 0x3e2   : > { %4742 = vpow2.f32 %v4185_v30  ;;  %v5963_v20 = vld [vmem:[%s5573_s7 + $0xa4] ss:$16 sps:$4 sm:$0xff]   ;;  %v5969_v30 = vld [vmem:[%s5573_s7 + $0xa0] ss:$16 sps:$4 sm:$0xff]  }
 0x3ec   : > { %v4739_v16 = vpop.eup %4738 }
 0x3ed   : > { %v1638_v18 = vadd.f32 1.0, %v4739_v16  ;;  %v5972_v16 = vld [vmem:[%s5573_s7 + $0xa8] ss:$16 sps:$4 sm:$0xff]  }
 0x3ee   : > { %v4741_v19 = vpop.eup %4740 }
 0x3ef   : > { %4744 = vrcp.f32 %v1638_v18  ;;  %v1644_v24 = vadd.f32 1.0, %v4741_v19  ;;  %v4743_v25 = vpop.eup %4742  ;;  %v5982_v18 = vld [vmem:[%s5573_s7 + $0x8c] ss:$16 sps:$4 sm:$0xff]   ;;  %v5985_v19 = vld [vmem:[%s5573_s7 + $0x80] ss:$16 sps:$4 sm:$0xff]  }
 0x3f0   : > { %4746 = vtanh.f32 %v1633_v17  ;;  %v1651_v57 = vadd.f32 1.0, %v4743_v25  ;;  %v5979_v17 = vld [vmem:[%s5573_s7 + $0x84] ss:$16 sps:$4 sm:$0xff]  }
 0x3f1   : > { %4748 = vrcp.f32 %v1644_v24  ;;  %v5988_v24 = vld [vmem:[%s5573_s7 + $0x88] ss:$16 sps:$4 sm:$0xff]   ;;  %v5993_v25 = vld [vmem:[%s5573_s7 + $0x64] ss:$16 sps:$4 sm:$0xff]  }
 0x3f2   : > { %4750 = vrcp.f32 %v1651_v57  ;;  %v6009_v57 = vld [vmem:[%s5573_s7 + $0x44] ss:$16 sps:$4 sm:$0xff]  }
 0x3fc   : > { %v4745_v26 = vpop.eup %4744 }
 0x3fd   : > { %v4747_v27 = vpop.eup %4746 }
 0x3fe   : > { %v4749_v54 = vpop.eup %4748  ;;  %v1655_v60 = vmul.f32 %v4747_v27, %v4745_v26  ;;  %v5996_v26 = vld [vmem:[%s5573_s7 + $0x6c] ss:$16 sps:$4 sm:$0xff]   ;;  %v6001_v27 = vld [vmem:[%s5573_s7 + $0x60] ss:$16 sps:$4 sm:$0xff]  }
 0x3ff   : > { %v1654_v61 = vmul.f32 %v4749_v54, %v5851_v59  ;;  %v4751_v63 = vpop.eup %4750  ;;  %v6004_v54 = vld [vmem:[%s5573_s7 + $0x68] ss:$16 sps:$4 sm:$0xff]  }
 0x401   : > { %v5889_v62 = vadd.f32 %v1655_v60, %v1654_v61  ;;  %v6012_v60 = vld [vmem:[%s5573_s7 + $0x4c] ss:$16 sps:$4 sm:$0xff]   ;;  %v6017_v61 = vld [vmem:[%s5573_s7 + $0x40] ss:$16 sps:$4 sm:$0xff]  }
 0x403   : > { %4752 = vtanh.f32 %v5889_v62 }
 0x410   : > { %v4753_v0 = vpop.eup %4752 }
 0x411   : > { %v1658_v1 = vmul.f32 %v4753_v0, %v4751_v63  ;;  %v6025_v63 = vld [vmem:[%s5573_s7 + $0x24] ss:$16 sps:$4 sm:$0xff]   ;;  %v6028_v0 = vld [vmem:[%s5573_s7 + $0x2c] ss:$16 sps:$4 sm:$0xff]  }
 0x413   : > { %1660 = vst [vmem:[#allocation2] sm:$0xff] %v1658_v1  ;;  %v1668_v2 = vpack.c.bf16 %v1658_v1, %v1658_v1  ;;  %v6033_v1 = vld [vmem:[%s5573_s7 + $0x20] ss:$16 sps:$4 sm:$0xff]  }
 0x415   : > { %1894 = vmatmul.mubr.bf16.vlgmr.msra.gmra.mxu0 %v1668_v2  ;;  %1935 = vmatmul.mubr.bf16.vlgmr.msra.gmra.mxu1 %v1668_v2  ;;  %v6036_v2 = vld [vmem:[%s5573_s7 + $0x28] ss:$16 sps:$4 sm:$0xff]  }
 0x416   : > { %2174 = vmatpush1.bf16.msra.mxu0 %v5685_v21  ;;  %2215 = vmatpush1.bf16.msra.mxu1 %v5705_v31  ;;  %v1664_v21 = vld [vmem:[#allocation3 + $0x20] sm:$0xff] }
 0x417   : > { %2175 = vmatprep.subr.bf16.mxu0 %v5691_v22  ;;  %2216 = vmatprep.subr.bf16.mxu1 %v5718_v34 }
 0x418   : > { %2205 = vmatprep.mubr.bf16.mxu0 %v5232_v28  ;;  %2246 = vmatprep.mubr.bf16.mxu1 %v5232_v28 }
 0x41a   : > { %2176 = vmatpush1.bf16.msra.mxu0 %v5695_v23  ;;  %2217 = vmatpush1.bf16.msra.mxu1 %v5721_v35 }
 0x41b   : > { %2177 = vmatprep.subr.bf16.mxu0 %v5699_v29  ;;  %2218 = vmatprep.subr.bf16.mxu1 %v5732_v38  ;;  %v1665_v29 = vld [vmem:[#allocation3 + $0xa8] sm:$0xff] }
 0x41e   : > { %2178 = vmatpush1.bf16.msra.mxu0 %v5709_v32  ;;  %2219 = vmatpush1.bf16.msra.mxu1 %v5737_v39 }
 0x41f   : > { %2179 = vmatprep.subr.bf16.mxu0 %v5714_v33  ;;  %2220 = vmatprep.subr.bf16.mxu1 %v5741_v40 }
 0x422   : > { %2180 = vmatpush1.bf16.msra.mxu0 %v5726_v36  ;;  %2221 = vmatpush1.bf16.msra.mxu1 %v5753_v43  ;;  %v1666_v43 = vld [vmem:[#allocation3 + $0x10] sm:$0xff] }
 0x423   : > { %2181 = vmatprep.subr.bf16.mxu0 %v5729_v37  ;;  %2222 = vmatprep.subr.bf16.mxu1 %v5757_v44 }
 0x426   : > { %2182 = vmatpush1.bf16.msra.mxu0 %v5745_v41  ;;  %2223 = vmatpush1.bf16.msra.mxu1 %v5769_v47  ;;  %v1667_v41 = vld [vmem:[#allocation3 + $0x8] sm:$0xff] }
 0x427   : > { %2183 = vmatprep.subr.bf16.mxu0 %v5749_v42  ;;  %2224 = vmatprep.subr.bf16.mxu1 %v5776_v49 }
 0x42a   : > { %2184 = vmatpush1.bf16.msra.mxu0 %v5760_v45  ;;  %2225 = vmatpush1.bf16.msra.mxu1 %v5782_v51 }
 0x42b   : > { %2185 = vmatprep.subr.bf16.mxu0 %v5764_v46  ;;  %2226 = vmatprep.subr.bf16.mxu1 %v5786_v52 }
 0x42e   : > { %2186 = vmatpush1.bf16.msra.mxu0 %v5772_v48  ;;  %2227 = vmatpush1.bf16.msra.mxu1 %v5797_v55 }
 0x42f   : > { %2187 = vmatprep.subr.bf16.mxu0 %v5779_v50  ;;  %2228 = vmatprep.subr.bf16.mxu1 %v5801_v56 }
 0x432   : > { %2188 = vmatpush1.bf16.msra.mxu0 %v5791_v53  ;;  %2229 = vmatpush1.bf16.msra.mxu1 %v5809_v58 }
 0x433   : > { %2485 = vmatprep.subr.bf16.mxu0 %v5931_v7  ;;  %2526 = vmatprep.subr.bf16.mxu1 %v5934_v8 }
 0x4d5   : > { %v1895_v22 = vpop.f32.mrf.mxu0  ;;  %v1936_v23 = vpop.f32.mrf.mxu1 }
 0x4d6   : > { %v1943_v31 = vadd.f32 %v1895_v22, %v1664_v21  ;;  %v1945_v46 = vadd.f32 %v1936_v23, %v1666_v43  ;;  %v6041_v21 = vld [vmem:[%s5573_s7 + $0x4] ss:$16 sps:$4 sm:$0xff]   ;;  %v6044_v22 = vld [vmem:[%s5573_s7 + $0xc] ss:$16 sps:$4 sm:$0xff]   ;;  %v6049_v23 = vld [vmem:[%s5573_s7] ss:$16 sps:$4 sm:$0xff]  }
 0x4d7   : > { %v1897_v32 = vpop.f32.mrf.mxu0  ;;  %v1938_v33 = vpop.f32.mrf.mxu1 }
 0x4d8   : > { %v4218_v34 = vmul.f32 -1.442695, %v1943_v31  ;;  %v1944_v35 = vadd.f32 %v1897_v32, %v1665_v29  ;;  %v1946_v42 = vadd.f32 %v1938_v33, %v1667_v41  ;;  %v6052_v29 = vld [vmem:[%s5573_s7 + $0x8] ss:$16 sps:$4 sm:$0xff]   ;;  %v1976_v31 = vld [vmem:[#allocation3 + $0xa0] sm:$0xff] }
 0x4d9   : > { %v1899_v36 = vpop.f32.mrf.mxu0  ;;  %v1940_v37 = vpop.f32.mrf.mxu1 }
 0x4da   : > { %4754 = vpow2.f32 %v4218_v34  ;;  %v4219_v38 = vmul.f32 -1.442695, %v1944_v35  ;;  %v4220_v44 = vmul.f32 -1.442695, %v1946_v42  ;;  %v1977_v34 = vld [vmem:[#allocation3 + $0x28] sm:$0xff] }
 0x4db   : > { %v1900_v39 = vpop.f32.mrf.mxu0  ;;  %v1941_v40 = vpop.f32.mrf.mxu1 }
 0x4dc   : > { %4756 = vpow2.f32 %v4219_v38 }
 0x4dd   : > { %4758 = vpow2.f32 %v4220_v44 }
 0x4e7   : > { %v4755_v45 = vpop.eup %4754 }
 0x4e8   : > { %v1950_v47 = vadd.f32 1.0, %v4755_v45  ;;  %v1979_v45 = vld [vmem:[#allocation3 + $0x60] sm:$0xff] }
 0x4e9   : > { %v4757_v48 = vpop.eup %4756 }
 0x4ea   : > { %4760 = vrcp.f32 %v1950_v47  ;;  %v1956_v49 = vadd.f32 1.0, %v4757_v48  ;;  %v4759_v50 = vpop.eup %4758  ;;  %v1978_v47 = vld [vmem:[#allocation3 + $0x78] sm:$0xff] }
 0x4eb   : > { %4762 = vtanh.f32 %v1945_v46  ;;  %v1963_v55 = vadd.f32 1.0, %v4759_v50 }
 0x4ec   : > { %4764 = vrcp.f32 %v1956_v49 }
 0x4ed   : > { %4766 = vrcp.f32 %v1963_v55 }
 0x4f7   : > { %v4761_v51 = vpop.eup %4760 }
 0x4f8   : > { %v4763_v52 = vpop.eup %4762 }
 0x4f9   : > { %v4765_v53 = vpop.eup %4764  ;;  %v1967_v56 = vmul.f32 %v4763_v52, %v4761_v51 }
 0x4fa   : > { %v1966_v58 = vmul.f32 %v4765_v53, %v5889_v62  ;;  %v4767_v3 = vpop.eup %4766  ;;  %v6020_v62 = vld [vmem:[%s5573_s7 + $0x48] ss:$16 sps:$4 sm:$0xff]  }
 0x4fc   : > { %v5925_v59 = vadd.f32 %v1967_v56, %v1966_v58 }
 0x4fe   : > { %4768 = vtanh.f32 %v5925_v59 }
 0x50b   : > { %v4769_v4 = vpop.eup %4768 }
 0x50c   : > { %v1970_v5 = vmul.f32 %v4769_v4, %v4767_v3 }
 0x50e   : > { %1972 = vst [vmem:[#allocation2 + $0x18] sm:$0xff] %v1970_v5  ;;  %v1980_v6 = vpack.c.bf16 %v1970_v5, %v1970_v5 }
 0x510   : > { %2206 = vmatmul.mubr.bf16.vlgmr.msra.gmra.mxu0 %v1980_v6  ;;  %2247 = vmatmul.mubr.bf16.vlgmr.msra.gmra.mxu1 %v1980_v6 }
 0x511   : > { %2517 = vmatprep.mubr.bf16.mxu0 %v5232_v28  ;;  %2558 = vmatprep.mubr.bf16.mxu1 %v5232_v28 }
 0x512   : > { %2486 = vmatpush1.bf16.msra.mxu0 %v5937_v9  ;;  %2527 = vmatpush1.bf16.msra.mxu1 %v5940_v10 }
 0x513   : > { %2487 = vmatprep.subr.bf16.mxu0 %v5947_v11  ;;  %2528 = vmatprep.subr.bf16.mxu1 %v5950_v12 }
 0x516   : > { %2488 = vmatpush1.bf16.msra.mxu0 %v5953_v13  ;;  %2529 = vmatpush1.bf16.msra.mxu1 %v5956_v14 }
 0x517   : > { %2489 = vmatprep.subr.bf16.mxu0 %v5963_v20  ;;  %2530 = vmatprep.subr.bf16.mxu1 %v5966_v15 }
 0x51a   : > { %2490 = vmatpush1.bf16.msra.mxu0 %v5969_v30  ;;  %2531 = vmatpush1.bf16.msra.mxu1 %v5972_v16 }
 0x51b   : > { %2491 = vmatprep.subr.bf16.mxu0 %v5979_v17  ;;  %2532 = vmatprep.subr.bf16.mxu1 %v5982_v18 }
 0x51e   : > { %2492 = vmatpush1.bf16.msra.mxu0 %v5985_v19  ;;  %2533 = vmatpush1.bf16.msra.mxu1 %v5988_v24 }
 0x51f   : > { %2493 = vmatprep.subr.bf16.mxu0 %v5993_v25  ;;  %2534 = vmatprep.subr.bf16.mxu1 %v5996_v26 }
 0x522   : > { %2494 = vmatpush1.bf16.msra.mxu0 %v6001_v27  ;;  %2535 = vmatpush1.bf16.msra.mxu1 %v6004_v54 }
 0x523   : > { %2495 = vmatprep.subr.bf16.mxu0 %v6009_v57  ;;  %2536 = vmatprep.subr.bf16.mxu1 %v6012_v60 }
 0x526   : > { %2496 = vmatpush1.bf16.msra.mxu0 %v6017_v61  ;;  %2537 = vmatpush1.bf16.msra.mxu1 %v6020_v62 }
 0x527   : > { %2497 = vmatprep.subr.bf16.mxu0 %v6025_v63  ;;  %2538 = vmatprep.subr.bf16.mxu1 %v6028_v0 }
 0x52a   : > { %2498 = vmatpush1.bf16.msra.mxu0 %v6033_v1  ;;  %2539 = vmatpush1.bf16.msra.mxu1 %v6036_v2 }
 0x52b   : > { %2499 = vmatprep.subr.bf16.mxu0 %v6041_v21  ;;  %2540 = vmatprep.subr.bf16.mxu1 %v6044_v22 }
 0x52e   : > { %2500 = vmatpush1.bf16.msra.mxu0 %v6049_v23  ;;  %2541 = vmatpush1.bf16.msra.mxu1 %v6052_v29 }
 0x52f   : > { %2797 = vmatprep.subr.bf16.mxu0 %v5931_v7  ;;  %2838 = vmatprep.subr.bf16.mxu1 %v5934_v8 }
 0x5d0   : > { %v2207_v32 = vpop.f32.mrf.mxu0  ;;  %v2248_v33 = vpop.f32.mrf.mxu1 }
 0x5d1   : > { %v2255_v35 = vadd.f32 %v2207_v32, %v1976_v31  ;;  %v2257_v50 = vadd.f32 %v2248_v33, %v1978_v47 }
 0x5d2   : > { %v2209_v36 = vpop.f32.mrf.mxu0  ;;  %v2250_v37 = vpop.f32.mrf.mxu1 }
 0x5d3   : > { %v4253_v38 = vmul.f32 -1.442695, %v2255_v35  ;;  %v2256_v39 = vadd.f32 %v2209_v36, %v1977_v34  ;;  %v2258_v46 = vadd.f32 %v2250_v37, %v1979_v45 }
 0x5d4   : > { %v2211_v40 = vpop.f32.mrf.mxu0  ;;  %v2252_v41 = vpop.f32.mrf.mxu1 }
 0x5d5   : > { %4770 = vpow2.f32 %v4253_v38  ;;  %v4254_v42 = vmul.f32 -1.442695, %v2256_v39  ;;  %v4255_v48 = vmul.f32 -1.442695, %v2258_v46  ;;  %v2289_v38 = vld [vmem:[#allocation3 + $0xc8] sm:$0xff] }
 0x5d6   : > { %v2212_v43 = vpop.f32.mrf.mxu0  ;;  %v2253_v44 = vpop.f32.mrf.mxu1 }
 0x5d7   : > { %4772 = vpow2.f32 %v4254_v42 }
 0x5d8   : > { %4774 = vpow2.f32 %v4255_v48 }
 0x5e2   : > { %v4771_v49 = vpop.eup %4770 }
 0x5e3   : > { %v2262_v51 = vadd.f32 1.0, %v4771_v49  ;;  %v2291_v49 = vld [vmem:[#allocation3 + $0x30] sm:$0xff] }
 0x5e4   : > { %v4773_v52 = vpop.eup %4772 }
 0x5e5   : > { %4776 = vrcp.f32 %v2262_v51  ;;  %v2268_v53 = vadd.f32 1.0, %v4773_v52  ;;  %v4775_v55 = vpop.eup %4774  ;;  %v2290_v51 = vld [vmem:[#allocation3 + $0x70] sm:$0xff] }
 0x5e6   : > { %4778 = vtanh.f32 %v2257_v50  ;;  %v2275_v4 = vadd.f32 1.0, %v4775_v55 }
 0x5e7   : > { %4780 = vrcp.f32 %v2268_v53 }
 0x5e8   : > { %4782 = vrcp.f32 %v2275_v4 }
 0x5f2   : > { %v4777_v56 = vpop.eup %4776 }
 0x5f3   : > { %v4779_v58 = vpop.eup %4778 }
 0x5f4   : > { %v4781_v3 = vpop.eup %4780  ;;  %v2279_v5 = vmul.f32 %v4779_v58, %v4777_v56 }
 0x5f5   : > { %v2278_v6 = vmul.f32 %v4781_v3, %v5925_v59  ;;  %v4783_v32 = vpop.eup %4782  ;;  %v2288_v59 = vld [vmem:[#allocation3 + $0xb0] sm:$0xff] }
 0x5f7   : > { %v6061_v31 = vadd.f32 %v2279_v5, %v2278_v6 }
 0x5f9   : > { %4784 = vtanh.f32 %v6061_v31 }
 0x606   : > { %v4785_v33 = vpop.eup %4784 }
 0x607   : > { %v2282_v34 = vmul.f32 %v4785_v33, %v4783_v32 }
 0x609   : > { %2284 = vst [vmem:[#allocation2 + $0x10] sm:$0xff] %v2282_v34  ;;  %v2292_v35 = vpack.c.bf16 %v2282_v34, %v2282_v34 }
 0x60b   : > { %2518 = vmatmul.mubr.bf16.vlgmr.msra.gmra.mxu0 %v2292_v35  ;;  %2559 = vmatmul.mubr.bf16.vlgmr.msra.gmra.mxu1 %v2292_v35 }
 0x60c   : > { %2798 = vmatpush1.bf16.msra.mxu0 %v5937_v9  ;;  %2839 = vmatpush1.bf16.msra.mxu1 %v5940_v10 }
 0x60d   : > { %2799 = vmatprep.subr.bf16.mxu0 %v5947_v11  ;;  %2840 = vmatprep.subr.bf16.mxu1 %v5950_v12 }
 0x60e   : > { %2829 = vmatprep.mubr.bf16.mxu0 %v5232_v28  ;;  %2870 = vmatprep.mubr.bf16.mxu1 %v5232_v28 }
 0x610   : > { %2800 = vmatpush1.bf16.msra.mxu0 %v5953_v13  ;;  %2841 = vmatpush1.bf16.msra.mxu1 %v5956_v14 }
 0x611   : > { %2801 = vmatprep.subr.bf16.mxu0 %v5963_v20  ;;  %2842 = vmatprep.subr.bf16.mxu1 %v5966_v15 }
 0x614   : > { %2802 = vmatpush1.bf16.msra.mxu0 %v5969_v30  ;;  %2843 = vmatpush1.bf16.msra.mxu1 %v5972_v16 }
 0x615   : > { %2803 = vmatprep.subr.bf16.mxu0 %v5979_v17  ;;  %2844 = vmatprep.subr.bf16.mxu1 %v5982_v18 }
 0x618   : > { %2804 = vmatpush1.bf16.msra.mxu0 %v5985_v19  ;;  %2845 = vmatpush1.bf16.msra.mxu1 %v5988_v24 }
 0x619   : > { %2805 = vmatprep.subr.bf16.mxu0 %v5993_v25  ;;  %2846 = vmatprep.subr.bf16.mxu1 %v5996_v26 }
 0x61c   : > { %2806 = vmatpush1.bf16.msra.mxu0 %v6001_v27  ;;  %2847 = vmatpush1.bf16.msra.mxu1 %v6004_v54 }
 0x61d   : > { %2807 = vmatprep.subr.bf16.mxu0 %v6009_v57  ;;  %2848 = vmatprep.subr.bf16.mxu1 %v6012_v60 }
 0x620   : > { %2808 = vmatpush1.bf16.msra.mxu0 %v6017_v61  ;;  %2849 = vmatpush1.bf16.msra.mxu1 %v6020_v62 }
 0x621   : > { %2809 = vmatprep.subr.bf16.mxu0 %v6025_v63  ;;  %2850 = vmatprep.subr.bf16.mxu1 %v6028_v0 }
 0x624   : > { %2810 = vmatpush1.bf16.msra.mxu0 %v6033_v1  ;;  %2851 = vmatpush1.bf16.msra.mxu1 %v6036_v2 }
 0x625   : > { %2811 = vmatprep.subr.bf16.mxu0 %v6041_v21  ;;  %2852 = vmatprep.subr.bf16.mxu1 %v6044_v22 }
 0x628   : > { %2812 = vmatpush1.bf16.msra.mxu0 %v6049_v23  ;;  %2853 = vmatpush1.bf16.msra.mxu1 %v6052_v29 }
 0x629   : > { %3109 = vmatprep.subr.bf16.mxu0 %v5931_v7  ;;  %3150 = vmatprep.subr.bf16.mxu1 %v5934_v8 }
 0x6cb   : > { %v2519_v36 = vpop.f32.mrf.mxu0  ;;  %v2560_v37 = vpop.f32.mrf.mxu1 }
 0x6cc   : > { %v2567_v39 = vadd.f32 %v2519_v36, %v2288_v59  ;;  %v2569_v55 = vadd.f32 %v2560_v37, %v2290_v51 }
 0x6cd   : > { %v2521_v40 = vpop.f32.mrf.mxu0  ;;  %v2562_v41 = vpop.f32.mrf.mxu1 }
 0x6ce   : > { %v4288_v42 = vmul.f32 -1.442695, %v2567_v39  ;;  %v2568_v43 = vadd.f32 %v2521_v40, %v2289_v38  ;;  %v2570_v50 = vadd.f32 %v2562_v41, %v2291_v49 }
 0x6cf   : > { %v2523_v44 = vpop.f32.mrf.mxu0  ;;  %v2564_v45 = vpop.f32.mrf.mxu1 }
 0x6d0   : > { %4786 = vpow2.f32 %v4288_v42  ;;  %v4289_v46 = vmul.f32 -1.442695, %v2568_v43  ;;  %v4290_v52 = vmul.f32 -1.442695, %v2570_v50  ;;  %v2601_v42 = vld [vmem:[#allocation3 + $0xf8] sm:$0xff] }
 0x6d1   : > { %v2524_v47 = vpop.f32.mrf.mxu0  ;;  %v2565_v48 = vpop.f32.mrf.mxu1 }
 0x6d2   : > { %4788 = vpow2.f32 %v4289_v46 }
 0x6d3   : > { %4790 = vpow2.f32 %v4290_v52 }
 0x6dd   : > { %v4787_v53 = vpop.eup %4786 }
 0x6de   : > { %v2574_v56 = vadd.f32 1.0, %v4787_v53  ;;  %v2603_v53 = vld [vmem:[#allocation3 + $0x80] sm:$0xff] }
 0x6df   : > { %v4789_v58 = vpop.eup %4788 }
 0x6e0   : > { %4792 = vrcp.f32 %v2574_v56  ;;  %v2580_v3 = vadd.f32 1.0, %v4789_v58  ;;  %v4791_v4 = vpop.eup %4790 }
 0x6e1   : > { %4794 = vtanh.f32 %v2569_v55  ;;  %v2587_v33 = vadd.f32 1.0, %v4791_v4  ;;  %v2602_v55 = vld [vmem:[#allocation3 + $0xb8] sm:$0xff] }
 0x6e2   : > { %4796 = vrcp.f32 %v2580_v3 }
 0x6e3   : > { %4798 = vrcp.f32 %v2587_v33 }
 0x6ed   : > { %v4793_v5 = vpop.eup %4792 }
 0x6ee   : > { %v4795_v6 = vpop.eup %4794 }
 0x6ef   : > { %v4797_v32 = vpop.eup %4796  ;;  %v2591_v34 = vmul.f32 %v4795_v6, %v4793_v5 }
 0x6f0   : > { %v2590_v35 = vmul.f32 %v4797_v32, %v6061_v31  ;;  %v4799_v36 = vpop.eup %4798  ;;  %v2600_v31 = vld [vmem:[#allocation3 + $0x90] sm:$0xff] }
 0x6f2   : > { %v6099_v59 = vadd.f32 %v2591_v34, %v2590_v35 }
 0x6f4   : > { %4800 = vtanh.f32 %v6099_v59 }
 0x701   : > { %v4801_v37 = vpop.eup %4800 }
 0x702   : > { %v2594_v38 = vmul.f32 %v4801_v37, %v4799_v36 }
 0x704   : > { %2596 = vst [vmem:[#allocation2 + $0x8] sm:$0xff] %v2594_v38  ;;  %v2604_v39 = vpack.c.bf16 %v2594_v38, %v2594_v38 }
 0x706   : > { %2830 = vmatmul.mubr.bf16.vlgmr.msra.gmra.mxu0 %v2604_v39  ;;  %2871 = vmatmul.mubr.bf16.vlgmr.msra.gmra.mxu1 %v2604_v39 }
 0x707   : > { %3110 = vmatpush1.bf16.msra.mxu0 %v5937_v9  ;;  %3151 = vmatpush1.bf16.msra.mxu1 %v5940_v10 }
 0x708   : > { %3111 = vmatprep.subr.bf16.mxu0 %v5947_v11  ;;  %3152 = vmatprep.subr.bf16.mxu1 %v5950_v12 }
 0x709   : > { %3141 = vmatprep.mubr.bf16.mxu0 %v5232_v28  ;;  %3182 = vmatprep.mubr.bf16.mxu1 %v5232_v28 }
 0x70b   : > { %3112 = vmatpush1.bf16.msra.mxu0 %v5953_v13  ;;  %3153 = vmatpush1.bf16.msra.mxu1 %v5956_v14 }
 0x70c   : > { %3113 = vmatprep.subr.bf16.mxu0 %v5963_v20  ;;  %3154 = vmatprep.subr.bf16.mxu1 %v5966_v15 }
 0x70f   : > { %3114 = vmatpush1.bf16.msra.mxu0 %v5969_v30  ;;  %3155 = vmatpush1.bf16.msra.mxu1 %v5972_v16 }
 0x710   : > { %3115 = vmatprep.subr.bf16.mxu0 %v5979_v17  ;;  %3156 = vmatprep.subr.bf16.mxu1 %v5982_v18 }
 0x713   : > { %3116 = vmatpush1.bf16.msra.mxu0 %v5985_v19  ;;  %3157 = vmatpush1.bf16.msra.mxu1 %v5988_v24 }
 0x714   : > { %3117 = vmatprep.subr.bf16.mxu0 %v5993_v25  ;;  %3158 = vmatprep.subr.bf16.mxu1 %v5996_v26 }
 0x717   : > { %3118 = vmatpush1.bf16.msra.mxu0 %v6001_v27  ;;  %3159 = vmatpush1.bf16.msra.mxu1 %v6004_v54 }
 0x718   : > { %3119 = vmatprep.subr.bf16.mxu0 %v6009_v57  ;;  %3160 = vmatprep.subr.bf16.mxu1 %v6012_v60 }
 0x71b   : > { %3120 = vmatpush1.bf16.msra.mxu0 %v6017_v61  ;;  %3161 = vmatpush1.bf16.msra.mxu1 %v6020_v62 }
 0x71c   : > { %3121 = vmatprep.subr.bf16.mxu0 %v6025_v63  ;;  %3162 = vmatprep.subr.bf16.mxu1 %v6028_v0 }
 0x71f   : > { %3122 = vmatpush1.bf16.msra.mxu0 %v6033_v1  ;;  %3163 = vmatpush1.bf16.msra.mxu1 %v6036_v2 }
 0x720   : > { %3123 = vmatprep.subr.bf16.mxu0 %v6041_v21  ;;  %3164 = vmatprep.subr.bf16.mxu1 %v6044_v22 }
 0x723   : > { %3124 = vmatpush1.bf16.msra.mxu0 %v6049_v23  ;;  %3165 = vmatpush1.bf16.msra.mxu1 %v6052_v29 }
 0x724   : > { %3421 = vmatprep.subr.bf16.mxu0 %v5931_v7  ;;  %3462 = vmatprep.subr.bf16.mxu1 %v5934_v8 }
 0x7c6   : > { %v2831_v40 = vpop.f32.mrf.mxu0  ;;  %v2872_v41 = vpop.f32.mrf.mxu1 }
 0x7c7   : > { %v2879_v43 = vadd.f32 %v2831_v40, %v2600_v31  ;;  %v2881_v58 = vadd.f32 %v2872_v41, %v2602_v55 }
 0x7c8   : > { %v2833_v44 = vpop.f32.mrf.mxu0  ;;  %v2874_v45 = vpop.f32.mrf.mxu1 }
 0x7c9   : > { %v4323_v46 = vmul.f32 -1.442695, %v2879_v43  ;;  %v2880_v47 = vadd.f32 %v2833_v44, %v2601_v42  ;;  %v2882_v7 = vadd.f32 %v2874_v45, %v2603_v53  ;;  %v3224_v45 = vld [vmem:[#allocation3 + $0x58] sm:$0xff] }
 0x7ca   : > { %v2835_v48 = vpop.f32.mrf.mxu0  ;;  %v2876_v49 = vpop.f32.mrf.mxu1 }
 0x7cb   : > { %4802 = vpow2.f32 %v4323_v46  ;;  %v4324_v50 = vmul.f32 -1.442695, %v2880_v47  ;;  %v4325_v8 = vmul.f32 -1.442695, %v2882_v7  ;;  %v3225_v48 = vld [vmem:[#allocation3 + $0xc0] sm:$0xff] }
 0x7cc   : > { %v2836_v51 = vpop.f32.mrf.mxu0  ;;  %v2877_v52 = vpop.f32.mrf.mxu1 }
 0x7cd   : > { %4804 = vpow2.f32 %v4324_v50 }
 0x7ce   : > { %4806 = vpow2.f32 %v4325_v8 }
 0x7d8   : > { %v4803_v56 = vpop.eup %4802 }
 0x7d9   : > { %v2886_v3 = vadd.f32 1.0, %v4803_v56 }
 0x7da   : > { %v4805_v4 = vpop.eup %4804 }
 0x7db   : > { %4808 = vrcp.f32 %v2886_v3  ;;  %v2892_v5 = vadd.f32 1.0, %v4805_v4  ;;  %v4807_v6 = vpop.eup %4806  ;;  %v3227_v3 = vld [vmem:[#allocation3 + $0x88] sm:$0xff] }
 0x7dc   : > { %4810 = vtanh.f32 %v2881_v58  ;;  %v2899_v35 = vadd.f32 1.0, %v4807_v6 }
 0x7dd   : > { %4812 = vrcp.f32 %v2892_v5  ;;  %v3226_v5 = vld [vmem:[#allocation3 + $0x40] sm:$0xff] }
 0x7de   : > { %4814 = vrcp.f32 %v2899_v35 }
 0x7e8   : > { %v4809_v32 = vpop.eup %4808 }
 0x7e9   : > { %v4811_v33 = vpop.eup %4810 }
 0x7ea   : > { %v4813_v34 = vpop.eup %4812  ;;  %v2903_v36 = vmul.f32 %v4811_v33, %v4809_v32 }
 0x7eb   : > { %v2902_v37 = vmul.f32 %v4813_v34, %v6099_v59  ;;  %v4815_v39 = vpop.eup %4814 }
 0x7ed   : > { %v6137_v38 = vadd.f32 %v2903_v36, %v2902_v37 }
 0x7ef   : > { %4816 = vtanh.f32 %v6137_v38 }
 0x7fc   : > { %v4817_v31 = vpop.eup %4816 }
 0x7fd   : > { %v2906_v40 = vmul.f32 %v4817_v31, %v4815_v39 }
 0x7ff   : > { %2908 = vst [vmem:[#allocation2 + $0x20] sm:$0xff] %v2906_v40  ;;  %v2916_v41 = vpack.c.bf16 %v2906_v40, %v2906_v40 }
 0x801   : > { %3142 = vmatmul.mubr.bf16.vlgmr.msra.gmra.mxu0 %v2916_v41  ;;  %3183 = vmatmul.mubr.bf16.vlgmr.msra.gmra.mxu1 %v2916_v41 }
 0x802   : > { %3422 = vmatpush1.bf16.msra.mxu0 %v5937_v9  ;;  %3463 = vmatpush1.bf16.msra.mxu1 %v5940_v10 }
 0x803   : > { %3423 = vmatprep.subr.bf16.mxu0 %v5947_v11  ;;  %3464 = vmatprep.subr.bf16.mxu1 %v5950_v12  ;;  %v2913_v11 = vld [vmem:[#allocation3 + $0x38] sm:$0xff] }
 0x804   : > { %3453 = vmatprep.mubr.bf16.mxu0 %v5232_v28  ;;  %3494 = vmatprep.mubr.bf16.mxu1 %v5232_v28  ;;  %v2912_v28 = vld [vmem:[#allocation3 + $0x48] sm:$0xff] }
 0x806   : > { %3424 = vmatpush1.bf16.msra.mxu0 %v5953_v13  ;;  %3465 = vmatpush1.bf16.msra.mxu1 %v5956_v14 }
 0x807   : > { %3425 = vmatprep.subr.bf16.mxu0 %v5963_v20  ;;  %3466 = vmatprep.subr.bf16.mxu1 %v5966_v15 }
 0x80a   : > { %3426 = vmatpush1.bf16.msra.mxu0 %v5969_v30  ;;  %3467 = vmatpush1.bf16.msra.mxu1 %v5972_v16 }
 0x80b   : > { %3427 = vmatprep.subr.bf16.mxu0 %v5979_v17  ;;  %3468 = vmatprep.subr.bf16.mxu1 %v5982_v18 }
 0x80e   : > { %3428 = vmatpush1.bf16.msra.mxu0 %v5985_v19  ;;  %3469 = vmatpush1.bf16.msra.mxu1 %v5988_v24  ;;  %v2915_v24 = vld [vmem:[#allocation3 + $0x98] sm:$0xff] }
 0x80f   : > { %3429 = vmatprep.subr.bf16.mxu0 %v5993_v25  ;;  %3470 = vmatprep.subr.bf16.mxu1 %v5996_v26  ;;  %v2914_v26 = vld [vmem:[#allocation3 + $0xd8] sm:$0xff] }
 0x812   : > { %3430 = vmatpush1.bf16.msra.mxu0 %v6001_v27  ;;  %3471 = vmatpush1.bf16.msra.mxu1 %v6004_v54 }
 0x813   : > { %3431 = vmatprep.subr.bf16.mxu0 %v6009_v57  ;;  %3472 = vmatprep.subr.bf16.mxu1 %v6012_v60 }
 0x816   : > { %3432 = vmatpush1.bf16.msra.mxu0 %v6017_v61  ;;  %3473 = vmatpush1.bf16.msra.mxu1 %v6020_v62 }
 0x817   : > { %3433 = vmatprep.subr.bf16.mxu0 %v6025_v63  ;;  %3474 = vmatprep.subr.bf16.mxu1 %v6028_v0 }
 0x81a   : > { %3434 = vmatpush1.bf16.msra.mxu0 %v6033_v1  ;;  %3475 = vmatpush1.bf16.msra.mxu1 %v6036_v2 }
 0x81b   : > { %3435 = vmatprep.subr.bf16.mxu0 %v6041_v21  ;;  %3476 = vmatprep.subr.bf16.mxu1 %v6044_v22 }
 0x81e   : > { %3436 = vmatpush1.bf16.msra.mxu0 %v6049_v23  ;;  %3477 = vmatpush1.bf16.msra.mxu1 %v6052_v29 }
 0x8c1   : > { %v3143_v9 = vpop.f32.mrf.mxu0  ;;  %v3184_v10 = vpop.f32.mrf.mxu1 }
 0x8c2   : > { %v3191_v12 = vadd.f32 %v3143_v9, %v2912_v28  ;;  %v3193_v57 = vadd.f32 %v3184_v10, %v2914_v26 }
 0x8c3   : > { %v3145_v13 = vpop.f32.mrf.mxu0  ;;  %v3186_v14 = vpop.f32.mrf.mxu1 }
 0x8c4   : > { %v4358_v20 = vmul.f32 -1.442695, %v3191_v12  ;;  %v3192_v15 = vadd.f32 %v3145_v13, %v2913_v11  ;;  %v3194_v25 = vadd.f32 %v3186_v14, %v2915_v24 }
 0x8c5   : > { %v3147_v30 = vpop.f32.mrf.mxu0  ;;  %v3188_v16 = vpop.f32.mrf.mxu1 }
 0x8c6   : > { %4818 = vpow2.f32 %v4358_v20  ;;  %v4359_v17 = vmul.f32 -1.442695, %v3192_v15  ;;  %v4360_v27 = vmul.f32 -1.442695, %v3194_v25 }
 0x8c7   : > { %v3148_v18 = vpop.f32.mrf.mxu0  ;;  %v3189_v19 = vpop.f32.mrf.mxu1 }
 0x8c8   : > { %4820 = vpow2.f32 %v4359_v17 }
 0x8c9   : > { %4822 = vpow2.f32 %v4360_v27 }
 0x8d3   : > { %v4819_v54 = vpop.eup %4818 }
 0x8d4   : > { %v3198_v60 = vadd.f32 1.0, %v4819_v54 }
 0x8d5   : > { %v4821_v61 = vpop.eup %4820 }
 0x8d6   : > { %4824 = vrcp.f32 %v3198_v60  ;;  %v3204_v62 = vadd.f32 1.0, %v4821_v61  ;;  %v4823_v63 = vpop.eup %4822 }
 0x8d7   : > { %4826 = vtanh.f32 %v3193_v57  ;;  %v3211_v21 = vadd.f32 1.0, %v4823_v63 }
 0x8d8   : > { %4828 = vrcp.f32 %v3204_v62 }
 0x8d9   : > { %4830 = vrcp.f32 %v3211_v21 }
 0x8e3   : > { %v4825_v0 = vpop.eup %4824 }
 0x8e4   : > { %v4827_v1 = vpop.eup %4826 }
 0x8e5   : > { %v4829_v2 = vpop.eup %4828  ;;  %v3215_v22 = vmul.f32 %v4827_v1, %v4825_v0 }
 0x8e6   : > { %v3214_v23 = vmul.f32 %v4829_v2, %v6137_v38  ;;  %v4831_v59 = vpop.eup %4830 }
 0x8e8   : > { %v3216_v29 = vadd.f32 %v3215_v22, %v3214_v23 }
 0x8ea   : > { %4832 = vtanh.f32 %v3216_v29 }
 0x8f7   : > { %v4833_v42 = vpop.eup %4832 }
 0x8f8   : > { %v3218_v43 = vmul.f32 %v4833_v42, %v4831_v59 }
 0x8fa   : > { %3220 = vst [vmem:[#allocation2 + $0x28] sm:$0xff] %v3218_v43  ;;  %v3228_v44 = vpack.c.bf16 %v3218_v43, %v3218_v43 }
 0x8fc   : > { %3454 = vmatmul.mubr.bf16.vlgmr.msra.gmra.mxu0 %v3228_v44  ;;  %3495 = vmatmul.mubr.bf16.vlgmr.msra.gmra.mxu1 %v3228_v44 }
 0x9bc   : > { %v3455_v46 = vpop.f32.mrf.mxu0  ;;  %v3496_v47 = vpop.f32.mrf.mxu1 }
 0x9bd   : > { %v3503_v49 = vadd.f32 %v3455_v46, %v3224_v45  ;;  %v3505_v33 = vadd.f32 %v3496_v47, %v3226_v5 }
 0x9be   : > { %v3457_v50 = vpop.f32.mrf.mxu0  ;;  %v3498_v51 = vpop.f32.mrf.mxu1 }
 0x9bf   : > { %v4393_v52 = vmul.f32 -1.442695, %v3503_v49  ;;  %v3504_v53 = vadd.f32 %v3457_v50, %v3225_v48  ;;  %v3506_v4 = vadd.f32 %v3498_v51, %v3227_v3 }
 0x9c0   : > { %v3459_v7 = vpop.f32.mrf.mxu0  ;;  %v3500_v55 = vpop.f32.mrf.mxu1 }
 0x9c1   : > { %4834 = vpow2.f32 %v4393_v52  ;;  %v4394_v8 = vmul.f32 -1.442695, %v3504_v53  ;;  %v4395_v6 = vmul.f32 -1.442695, %v3506_v4 }
 0x9c2   : > { %v3460_v56 = vpop.f32.mrf.mxu0  ;;  %v3501_v58 = vpop.f32.mrf.mxu1 }
 0x9c3   : > { %4836 = vpow2.f32 %v4394_v8 }
 0x9c4   : > { %4838 = vpow2.f32 %v4395_v6 }
 0x9ce   : > { %v4835_v32 = vpop.eup %4834 }
 0x9cf   : > { %v3510_v34 = vadd.f32 1.0, %v4835_v32 }
 0x9d0   : > { %v4837_v35 = vpop.eup %4836 }
 0x9d1   : > { %4840 = vrcp.f32 %v3510_v34  ;;  %v3516_v36 = vadd.f32 1.0, %v4837_v35  ;;  %v4839_v37 = vpop.eup %4838 }
 0x9d2   : > { %4842 = vtanh.f32 %v3505_v33  ;;  %v3523_v40 = vadd.f32 1.0, %v4839_v37 }
 0x9d3   : > { %4844 = vrcp.f32 %v3516_v36 }
 0x9d4   : > { %4846 = vrcp.f32 %v3523_v40 }
 0x9de   : > { %v4841_v38 = vpop.eup %4840 }
 0x9df   : > { %v4843_v39 = vpop.eup %4842 }
 0x9e0   : > { %v4845_v31 = vpop.eup %4844  ;;  %v3527_v41 = vmul.f32 %v4843_v39, %v4841_v38 }
 0x9e1   : > { %v3526_v28 = vmul.f32 %v4845_v31, %v3216_v29  ;;  %v4847_v10 = vpop.eup %4846 }
 0x9e3   : > { %v3528_v9 = vadd.f32 %v3527_v41, %v3526_v28 }
 0x9e5   : > { %4848 = vtanh.f32 %v3528_v9  ;;  %3534 = vst [vmem:[%s558_s25] sm:$0xff] %v3528_v9 }
 0x9f1   : > { %3538 = sbr.rel (%p4396_p5) target bundleno = 3111 (0xc27), region = 92 }
 0x9f2   : > { %v4849_v11 = vpop.eup %4848 }
 0x9f3   : > { %v3530_v12 = vmul.f32 %v4849_v11, %v4847_v10 }
 0x9f5   : > { %3532 = vst [vmem:[#allocation2 + $0x38] sm:$0xff] %v3530_v12  ;;  %3533 = vst [vmem:[%s551_s28] sm:$0xff] %v3530_v12 }
 0x9f6   : > { %v4850_v13 = vld [vmem:[#allocation15 + $0x38] sm:$0xff]   ;;  %v4851_v14 = vld [vmem:[#allocation15 + $0x30] sm:$0xff]   ;;  %v4852_v20 = vld [vmem:[#allocation15 + $0x28] sm:$0xff]  }
 0x9f7   : > { %4429 = vmatprep.subr.bf16.mxu0 %v4850_v13  ;;  %4453 = vmatprep.subr.bf16.mxu1 %v4850_v13  ;;  %v4853_v15 = vld [vmem:[#allocation15 + $0x20] sm:$0xff]   ;;  %v3539_v30 = vld [vmem:[#allocation2 + $0x30] sm:$0xff]  ;;  %v3540_v16 = vld [vmem:[#allocation2] sm:$0xff] }
 0x9f8   : > { %4430 = vmatpush3.bf16.msra.mxu0 %v4850_v13  ;;  %4461 = vmatpush3.bf16.msra.mxu1 %v4850_v13  ;;  %v3543_v17 = vld [vmem:[#allocation2 + $0x8] sm:$0xff]  ;;  %v3547_v18 = vpack.c.bf16 %v3540_v16, %v3539_v30  ;;  %v3544_v19 = vld [vmem:[#allocation2 + $0x20] sm:$0xff]  ;;  %v4855_v26 = vld [vmem:[#allocation15 + $0x10] sm:$0xff]  }
 0x9f9   : > { %4431 = vmatprep.subr.bf16.mxu0 %v4851_v14  ;;  %4454 = vmatprep.subr.bf16.mxu1 %v4851_v14  ;;  %v3549_v24 = vpack.c.bf16 %v3544_v19, %v3543_v17  ;;  %v4854_v25 = vld [vmem:[#allocation15 + $0x18] sm:$0xff]   ;;  %v4856_v27 = vld [vmem:[#allocation15 + $0x8] sm:$0xff]   ;;  %v4857_v54 = vld [vmem:[#allocation15] sm:$0xff]  }
 0x9fa   : > { %4445 = vmatprep.mubr.bf16.mxu0 %v3547_v18  ;;  %v3541_v57 = vld [vmem:[#allocation2 + $0x18] sm:$0xff]  ;;  %v3542_v60 = vld [vmem:[#allocation2 + $0x10] sm:$0xff]  ;;  %v3545_v61 = vld [vmem:[#allocation2 + $0x28] sm:$0xff] }
 0x9fb   : > { %4449 = vmatprep.mubr.bf16.mxu1 %v3549_v24  ;;  %v3548_v63 = vpack.c.bf16 %v3542_v60, %v3541_v57  ;;  %v4397_v1 = vld [vmem:[%s6396_s26] ss:$0 sm:$0xff] }
 0x9fc   : > { %4432 = vmatpush3.bf16.msra.mxu0 %v4851_v14  ;;  %4462 = vmatpush3.bf16.msra.mxu1 %v4851_v14  ;;  %v3546_v62 = vld [vmem:[#allocation2 + $0x38] sm:$0xff] }
 0x9fd   : > { %4433 = vmatprep.subr.bf16.mxu0 %v4852_v20  ;;  %4455 = vmatprep.subr.bf16.mxu1 %v4852_v20  ;;  %v3550_v0 = vpack.c.bf16 %v3546_v62, %v3545_v61 }
 0xa00   : > { %4434 = vmatpush3.bf16.msra.mxu0 %v4852_v20  ;;  %4463 = vmatpush3.bf16.msra.mxu1 %v4852_v20 }
 0xa01   : > { %4435 = vmatprep.subr.bf16.mxu0 %v4853_v15  ;;  %4456 = vmatprep.subr.bf16.mxu1 %v4853_v15 }
 0xa04   : > { %4436 = vmatpush3.bf16.msra.mxu0 %v4853_v15  ;;  %4464 = vmatpush3.bf16.msra.mxu1 %v4853_v15 }
 0xa05   : > { %4437 = vmatprep.subr.bf16.mxu0 %v4854_v25  ;;  %4457 = vmatprep.subr.bf16.mxu1 %v4854_v25 }
 0xa08   : > { %4438 = vmatpush3.bf16.msra.mxu0 %v4854_v25  ;;  %4465 = vmatpush3.bf16.msra.mxu1 %v4854_v25 }
 0xa09   : > { %4439 = vmatprep.subr.bf16.mxu0 %v4855_v26  ;;  %4458 = vmatprep.subr.bf16.mxu1 %v4855_v26 }
 0xa0c   : > { %4440 = vmatpush3.bf16.msra.mxu0 %v4855_v26  ;;  %4466 = vmatpush3.bf16.msra.mxu1 %v4855_v26 }
 0xa0d   : > { %4441 = vmatprep.subr.bf16.mxu0 %v4856_v27  ;;  %4459 = vmatprep.subr.bf16.mxu1 %v4856_v27 }
 0xa10   : > { %4442 = vmatpush3.bf16.msra.mxu0 %v4856_v27  ;;  %4467 = vmatpush3.bf16.msra.mxu1 %v4856_v27 }
 0xa11   : > { %4443 = vmatprep.subr.bf16.mxu0 %v4857_v54  ;;  %4460 = vmatprep.subr.bf16.mxu1 %v4857_v54 }
 0xa14   : > { %4444 = vmatpush3.bf16.msra.mxu0 %v4857_v54  ;;  %4468 = vmatpush3.bf16.msra.mxu1 %v4857_v54 }
 0xa17   : > { %4446 = vmatmul.mubr.bf16.vlgmr.msra.gmra.mxu0 %v3548_v63  ;;  %4450 = vmatmul.mubr.bf16.vlgmr.msra.gmra.mxu1 %v3550_v0 }
 0xad7   : > { %v4447_v2 = vpop.f32.mrf.mxu0  ;;  %v4451_v21 = vpop.f32.mrf.mxu1 }
 0xad8   : > { %v6181_v22 = vadd.f32 %v4447_v2, %v4397_v1  ;;  %v6201_v51 = vadd.f32 %v4451_v21, %v4397_v1 }
 0xad9   : > { %v3656_v23 = vpop.f32.mrf.mxu0  ;;  %v3672_v29 = vpop.f32.mrf.mxu1 }
 0xada   : > { %v6183_v59 = vadd.f32 %v4397_v1, %v3656_v23  ;;  %3691 = vmax.xlane.f32.xlu1 %v6181_v22  ;;  %v6189_v46 = vadd.f32 %v4397_v1, %v3672_v29 }
 0xadb   : > { %v4448_v42 = vpop.f32.mrf.mxu0  ;;  %v4452_v43 = vpop.f32.mrf.mxu1 }
 0xadc   : > { %v6186_v44 = vadd.f32 %v4448_v42, %v4397_v1  ;;  %3687 = vmax.xlane.f32.xlu0 %v6183_v59  ;;  %v6198_v50 = vadd.f32 %v4452_v43, %v4397_v1 }
 0xadd   : > { %v3675_v45 = vpop.f32.mrf.mxu1  ;;  %v3659_v47 = vpop.f32.mrf.mxu0 }
 0xade   : > { %3693 = vmax.xlane.f32.xlu1 %v6186_v44  ;;  %v6192_v48 = vadd.f32 %v4397_v1, %v3675_v45  ;;  %v6195_v49 = vadd.f32 %v4397_v1, %v3659_v47 }
 0xae0   : > { %3695 = vmax.xlane.f32.xlu0 %v6189_v46 }
 0xae2   : > { %3697 = vmax.xlane.f32.xlu1 %v6192_v48 }
 0xae4   : > { %3689 = vmax.xlane.f32.xlu0 %v6195_v49 }
 0xae6   : > { %3701 = vmax.xlane.f32.xlu1 %v6198_v50 }
 0xae8   : > { %3699 = vmax.xlane.f32.xlu0 %v6201_v51 }
 0xb63   : > { %v6205_v52 = vpop.xlane.xlu1 %3691 }
 0xb64   : > { %v3705_v53 = vsub.f32 %v6181_v22, %v6205_v52 }
 0xb65   : > { %v6209_v7 = vpop.xlane.xlu0 %3687 }
 0xb66   : > { %v3715_v55 = vmul.f32 1.442695, %v3705_v53  ;;  %v3703_v8 = vsub.f32 %v6183_v59, %v6209_v7 }
 0xb67   : > { %v6213_v56 = vpop.xlane.xlu1 %3693 }
 0xb68   : > { %4858 = vpow2.f32 %v3715_v55  ;;  %v3711_v58 = vmul.f32 1.442695, %v3703_v8  ;;  %v3706_v3 = vsub.f32 %v6186_v44, %v6213_v56 }
 0xb69   : > { %v6217_v4 = vpop.xlane.xlu0 %3695 }
 0xb6a   : > { %v3717_v5 = vmul.f32 1.442695, %v3706_v3  ;;  %v3707_v6 = vsub.f32 %v6189_v46, %v6217_v4  ;;  %4860 = vpow2.f32 %v3711_v58 }
 0xb6b   : > { %v6221_v32 = vpop.xlane.xlu1 %3697 }
 0xb6c   : > { %4862 = vpow2.f32 %v3717_v5  ;;  %v3719_v33 = vmul.f32 1.442695, %v3707_v6  ;;  %v3708_v34 = vsub.f32 %v6192_v48, %v6221_v32 }
 0xb6d   : > { %v6225_v35 = vpop.xlane.xlu0 %3689 }
 0xb6e   : > { %v3704_v36 = vsub.f32 %v6195_v49, %v6225_v35  ;;  %4864 = vpow2.f32 %v3719_v33  ;;  %v3721_v39 = vmul.f32 1.442695, %v3708_v34 }
 0xb6f   : > { %v6229_v37 = vpop.xlane.xlu1 %3701 }
 0xb70   : > { %v3713_v38 = vmul.f32 1.442695, %v3704_v36  ;;  %v3710_v40 = vsub.f32 %v6198_v50, %v6229_v37 }
 0xb71   : > { %v6231_v31 = vpop.xlane.xlu0 %3699 }
 0xb72   : > { %4866 = vpow2.f32 %v3713_v38  ;;  %v3709_v41 = vsub.f32 %v6201_v51, %v6231_v31  ;;  %v3725_v10 = vmul.f32 1.442695, %v3710_v40 }
 0xb73   : > { %4868 = vpow2.f32 %v3721_v39 }
 0xb74   : > { %v3723_v28 = vmul.f32 1.442695, %v3709_v41 }
 0xb75   : > { %v4859_v9 = vpop.eup %4858 }
 0xb76   : > { %4870 = vpow2.f32 %v3723_v28  ;;  %3731 = vadd.xlane.f32.xlu0 %v4859_v9 }
 0xb77   : > { %v4861_v11 = vpop.eup %4860  ;;  %4872 = vpow2.f32 %v3725_v10 }
 0xb79   : > { %v4863_v12 = vpop.eup %4862 }
 0xb7a   : > { %3733 = vadd.xlane.f32.xlu1 %v4863_v12  ;;  %3727 = vadd.xlane.f32.xlu0 %v4861_v11 }
 0xb7b   : > { %v4865_v13 = vpop.eup %4864 }
 0xb7e   : > { %3735 = vadd.xlane.f32.xlu0 %v4865_v13 }
 0xb7f   : > { %v4867_v14 = vpop.eup %4866 }
 0xb80   : > { %3729 = vadd.xlane.f32.xlu1 %v4867_v14  ;;  %v4869_v20 = vpop.eup %4868 }
 0xb83   : > { %v4871_v15 = vpop.eup %4870 }
 0xb84   : > { %3737 = vadd.xlane.f32.xlu1 %v4869_v20  ;;  %3739 = vadd.xlane.f32.xlu0 %v4871_v15  ;;  %v4873_v30 = vpop.eup %4872 }
 0xb88   : > { %3741 = vadd.xlane.f32.xlu1 %v4873_v30 }
 0xbff   : > { %v3732_v16 = vpop.xlane.xlu0 %3731 }
 0xc00   : > { %4874 = vlog2.f32 %v3732_v16 }
 0xc03   : > { %v3734_v17 = vpop.xlane.xlu1 %3733  ;;  %v3728_v18 = vpop.xlane.xlu0 %3727 }
 0xc04   : > { %4876 = vlog2.f32 %v3734_v17 }
 0xc05   : > { %4878 = vlog2.f32 %v3728_v18 }
 0xc07   : > { %v3736_v19 = vpop.xlane.xlu0 %3735 }
 0xc08   : > { %4880 = vlog2.f32 %v3736_v19 }
 0xc09   : > { %v3730_v24 = vpop.xlane.xlu1 %3729 }
 0xc0a   : > { %4882 = vlog2.f32 %v3730_v24 }
 0xc0d   : > { %v4875_v25 = vpop.eup %4874  ;;  %v3738_v26 = vpop.xlane.xlu1 %3737 }
 0xc0e   : > { %v3740_v27 = vpop.xlane.xlu0 %3739  ;;  %v3748_v54 = vmul.f32 0.6931472, %v4875_v25  ;;  %4884 = vlog2.f32 %v3738_v26 }
 0xc0f   : > { %4886 = vlog2.f32 %v3740_v27 }
 0xc10   : > { %v3761_v57 = vadd.f32 %v3748_v54, %v6205_v52 }
 0xc11   : > { %v4877_v60 = vpop.eup %4876  ;;  %v3742_v61 = vpop.xlane.xlu1 %3741 }
 0xc12   : > { %v4879_v62 = vpop.eup %4878  ;;  %v3769_v63 = vsub.f32 %v6181_v22, %v3761_v57  ;;  %v3750_v0 = vmul.f32 0.6931472, %v4877_v60  ;;  %4888 = vlog2.f32 %v3742_v61 }
 0xc13   : > { %v3744_v1 = vmul.f32 0.6931472, %v4879_v62 }
 0xc14   : > { %3777 = vst [vmem:[#allocation16 + $0x10] sm:$0xff] %v3769_v63  ;;  %v3762_v2 = vadd.f32 %v3750_v0, %v6213_v56 }
 0xc15   : > { %v4881_v21 = vpop.eup %4880  ;;  %v3759_v23 = vadd.f32 %v3744_v1, %v6209_v7 }
 0xc16   : > { %v3770_v29 = vsub.f32 %v6186_v44, %v3762_v2  ;;  %v3752_v42 = vmul.f32 0.6931472, %v4881_v21 }
 0xc17   : > { %v4883_v43 = vpop.eup %4882  ;;  %v3767_v45 = vsub.f32 %v6183_v59, %v3759_v23 }
 0xc18   : > { %3778 = vst [vmem:[#allocation16 + $0x18] sm:$0xff] %v3770_v29  ;;  %v3763_v47 = vadd.f32 %v3752_v42, %v6217_v4  ;;  %v3746_v52 = vmul.f32 0.6931472, %v4883_v43 }
 0xc19   : > { %3775 = vst [vmem:[#allocation16] sm:$0xff] %v3767_v45 }
 0xc1a   : > { %v3771_v22 = vsub.f32 %v6189_v46, %v3763_v47  ;;  %v3760_v53 = vadd.f32 %v3746_v52, %v6225_v35 }
 0xc1b   : > { %v4885_v55 = vpop.eup %4884 }
 0xc1c   : > { %v4887_v8 = vpop.eup %4886  ;;  %3779 = vst [vmem:[#allocation16 + $0x20] sm:$0xff] %v3771_v22  ;;  %v3768_v7 = vsub.f32 %v6195_v49, %v3760_v53  ;;  %v3754_v56 = vmul.f32 0.6931472, %v4885_v55 }
 0xc1d   : > { %v3756_v44 = vmul.f32 0.6931472, %v4887_v8 }
 0xc1e   : > { %3776 = vst [vmem:[#allocation16 + $0x8] sm:$0xff] %v3768_v7  ;;  %v3764_v58 = vadd.f32 %v3754_v56, %v6221_v32 }
 0xc1f   : > { %v4889_v59 = vpop.eup %4888  ;;  %v3765_v3 = vadd.f32 %v3756_v44, %v6231_v31 }
 0xc20   : > { %v3772_v4 = vsub.f32 %v6192_v48, %v3764_v58  ;;  %v3758_v5 = vmul.f32 0.6931472, %v4889_v59 }
 0xc21   : > { %v3773_v46 = vsub.f32 %v6201_v51, %v3765_v3 }
 0xc22   : > { %3780 = vst [vmem:[#allocation16 + $0x28] sm:$0xff] %v3772_v4  ;;  %v3766_v6 = vadd.f32 %v3758_v5, %v6229_v37 }
 0xc23   : > { %3781 = vst [vmem:[#allocation16 + $0x30] sm:$0xff] %v3773_v46 }
 0xc24   : > { %v3774_v33 = vsub.f32 %v6198_v50, %v3766_v6 }
 0xc26   : > { %3782 = vst [vmem:[#allocation16 + $0x38] sm:$0xff] %v3774_v33 }
 0xc27 PF: > { %s6397_s18 = sld [smem:[#allocation31_spill]]  ;;  %s4409_s11 = sshll.u32 %s5312_s17, 7 }
 0xc28   : > { %s6398_s19 = sld [smem:[#allocation37_spill]]  ;;  %s3815_s24 = sshll.u32 %s551_s28, 4  ;;  %s3816_s24 = int_to_ptr.vmem [resolvable:$true] %s3815_s24 }
 0xc29   : > { %s3784_s21 = scalar_lea.sflag [#allocation18], %s5563_s23  ;;  %s5082_s13 = scalar_lea.vmem %s3816_s24, 128 }
 0xc2a   : > { %p5083_p4 = scmp.ne.s32.totalorder %s3816_s24, %s5082_s13  ;;  %s5233_s27 = smov [#allocation17]  }
 0xc2b   : > { %s5086_s7 = sshll.u32 %s5233_s27, 4  ;;  %s5087_s7 = int_to_ptr.vmem [resolvable:$false] %s5086_s7 }
 0xc2c   : > { %s5088_s9 = scalar_lea.vmem %s5087_s7, 256  ;;  %p5089_p1 = scmp.lt.s32.totalorder %s3816_s24, %s5087_s7 }
 0xc2d   : > { %p6399_p6 = scmp.ne.s32.totalorder %s6397_s18, 0  ;;  %p5090_p3 = scmp.lt.s32.totalorder %s5088_s9, %s5082_s13 }
 0xc2e   : > { %s3813_s22 = scalar_lea.hbm %s6398_s19, %s4409_s11 }
 0xc2f   : > { %p5084_p13 = pnand %p5083_p4, %p6399_p6  ;;  %p5091_p0 = por %p5090_p3, %p5089_p1 }
 0xc31   : > { %p5085_p8 = pneg %p5084_p13 }
 0xc33   : > { %p5092_p12 = pnand %p5091_p0, %p5085_p8 }
 0xc35   : > { %5095 = shalt.err (!%p5092_p12)
}
 0xc36   : > { %s5096_s8 = scalar_lea.hbm %s3813_s22, 128  ;;  %s5100_s1 = scalar_lea.hbm %s6398_s19, 384 }
 0xc37   : > { %p5097_p7 = scmp.ne.s32.totalorder %s3813_s22, %s5096_s8  ;;  %p5101_p2 = scmp.lt.s32.totalorder %s3813_s22, %s6398_s19 }
 0xc38   : > { %p5102_p11 = scmp.lt.s32.totalorder %s5100_s1, %s5096_s8 }
 0xc39   : > { %p5098_p9 = pnand %p5097_p7, %p6399_p6 }
 0xc3a   : > { %p5103_p5 = por %p5102_p11, %p5101_p2 }
 0xc3b   : > { %p5099_p10 = pneg %p5098_p9 }
 0xc3d   : > { %p5104_p4 = pnand %p5103_p5, %p5099_p10 }
 0xc3f   : > { %5107 = shalt.err (!%p5104_p4)
}
 0xc40   : > { %4489 = dma.vmem_to_hbm [thread:$0]  (%p6399_p6), %s3816_s24, 128, %s3813_s22, %s3784_s21  }
 0xc41   : > { %s5234_s15 = smov [#allocation16]   ;;  %p6400_p8 = scmp.eq.s32.totalorder %s5312_s17, 2 }
 0xc42   : > { %s3799_s26 = sshll.u32 %s5234_s15, 4  ;;  %s3800_s26 = int_to_ptr.vmem [resolvable:$true] %s3799_s26 }
 0xc43   : > { %s5108_s29 = scalar_lea.vmem %s3800_s26, 1024  ;;  %p5115_p0 = scmp.lt.s32.totalorder %s3800_s26, %s3800_s26 }
 0xc44   : > { %p5109_p13 = scmp.ne.s32.totalorder %s3800_s26, %s5108_s29  ;;  %p5116_p12 = scmp.lt.s32.totalorder %s5108_s29, %s5108_s29 }
 0xc46   : > { %p5110_p1 = pnand %p5109_p13, %p6400_p8  ;;  %p5117_p7 = por %p5116_p12, %p5115_p0 }
 0xc48   : > { %p5111_p3 = pneg %p5110_p1 }
 0xc4a   : > { %p5118_p9 = pnand %p5117_p7, %p5111_p3 }
 0xc4c   : > { %5121 = shalt.err (!%p5118_p9)
}
 0xc4d   : > { %s5235_s12 = smov 128   ;;  %s5236_s13 = smov 8  }
 0xc4e   : > { %p6401_p10 = pmov %p6400_p8  ;;  %s6402_s27 = sld [smem:[#allocation36_spill]] }
 0xc4f   : > { %s6403_s8 = sld [smem:[#allocation38_spill]]  ;;  %s3828_s20 = sshll.u32 %s558_s25, 4  ;;  %s3829_s20 = int_to_ptr.vmem [resolvable:$true] %s3828_s20 }
 0xc50   : > { %s5132_s1 = scalar_lea.vmem %s3829_s20, 128  ;;  %s5237_s28 = smov [#allocation19]  }
 0xc51   : > { %p5133_p2 = scmp.ne.s32.totalorder %s3829_s20, %s5132_s1  ;;  %s5136_s10 = sshll.u32 %s5237_s28, 4  ;;  %s5137_s10 = int_to_ptr.vmem [resolvable:$false] %s5136_s10 }
 0xc52   : > { %s5138_s15 = scalar_lea.vmem %s5137_s10, 256  ;;  %p5139_p4 = scmp.lt.s32.totalorder %s3829_s20, %s5137_s10 }
 0xc53   : > { %p5134_p11 = pnand %p5133_p2, %p6399_p6  ;;  %p5140_p13 = scmp.lt.s32.totalorder %s5138_s15, %s5132_s1 }
 0xc54   : > { %4488 = dma.vmem_to_hbm [thread:$0]  (%p6401_p10), %s3800_s26, 1024, %s6402_s27, [#allocation6], %s5235_s12, %s5235_s12, %s5236_s13  }
 0xc55   : > { %s3826_s30 = scalar_lea.hbm %s6403_s8, %s4409_s11  ;;  %p5135_p5 = pneg %p5134_p11 }
 0xc56   : > { %p5141_p8 = por %p5140_p13, %p5139_p4 }
 0xc58   : > { %p5142_p1 = pnand %p5141_p8, %p5135_p5 }
 0xc5a   : > { %5145 = shalt.err (!%p5142_p1)
}
 0xc5b   : > { %s5146_s26 = scalar_lea.hbm %s3826_s30, 128  ;;  %s5150_s11 = scalar_lea.hbm %s6403_s8, 384 }
 0xc5c   : > { %p5147_p3 = scmp.ne.s32.totalorder %s3826_s30, %s5146_s26  ;;  %p5151_p7 = scmp.lt.s32.totalorder %s3826_s30, %s6403_s8 }
 0xc5d   : > { %p5152_p9 = scmp.lt.s32.totalorder %s5150_s11, %s5146_s26 }
 0xc5e   : > { %p5148_p0 = pnand %p5147_p3, %p6399_p6 }
 0xc5f   : > { %p5153_p10 = por %p5152_p9, %p5151_p7 }
 0xc60   : > { %p5149_p12 = pneg %p5148_p0 }
 0xc62   : > { %p5154_p2 = pnand %p5153_p10, %p5149_p12 }
 0xc64   : > { %5157 = shalt.err (!%p5154_p2)
}
 0xc65   : > { %4490 = dma.vmem_to_hbm [thread:$0]  (%p6399_p6), %s3829_s20, 128, %s3826_s30, %s3784_s21  }
 0xc66   : > { %p6404_p11 = scmp.eq.s32.totalorder %s5312_s17, 2 }
 0xc68   : > { %5195 = dma.done.wait (%p6404_p11), [#allocation6], 1024   ;;  %p6405_p5 = pmov %p6404_p11 }
 0xc6a   : > { %5197 = vsyncadd (%p6405_p5), [#allocation6], 4294966272 }
 0xc6b PF: > { %s6406_s13 = sld [smem:[#allocation32_spill]]  ;;  %p4532_p4 = scmp.ge.s32.totalorder %s5216_s16, 2 }
 0xc6c   : > { %s6407_s22 = sadd.s32 4294967294, %s5216_s16  }
 0xc6d   : > { %s3844_s24 = sand.u32 1, %s6407_s22  }
 0xc6e   : > { %s3845_s18 = scalar_lea.sflag [#allocation18], %s3844_s24 }
 0xc71   : > { %p6408_p13 = scmp.ne.s32.totalorder %s6406_s13, 0 }
 0xc73   : > { %p4519_p8 = pnand %p4532_p4, %p6408_p13 }
 0xc75   : > { %p4520_p1 = pneg %p4519_p8 }
 0xc77   : > { %5199 = dma.done.wait (%p4520_p1), %s3845_s18, 256  }
 0xc78   : > { %5201 = vsyncadd (%p4520_p1), %s3845_s18, 4294967040  ;;  %s6409_s16 = sld [smem:[#allocation28_spill]]  ;;  %s6412_s13 = smov %s5208_s14 }
 0xc79   : > { %s6410_s23 = sld [smem:[#allocation27_spill]] }
 0xc7a   : > { %s6411_s15 = sld [smem:[#allocation29_spill]] }
 0xc7e   : > { %p32_p6 = scmp.ge.s32.totalorder %s6409_s16, 5  }
 0xc7f   : > { %s6413_s14 = smov %s6410_s23 }
 0xc80   :  { %34 = sbr.rel (!%p32_p6) target bundleno = 18 (0x12), region = 205 }
 0xc85   :  { %3859 = vsyncpa [#allocation5], 1 }
 0xc86   :  { %3861 = vsyncpa [#allocation5 + $0x1], 1 }
 0xc87   :  { %3862 = vsyncpa [#allocation8], 1 }
 0xc88   :  { %3864 = vsyncpa [#allocation8 + $0x1], 1 }
 0xc89   :  { %3865 = vsyncpa [#allocation11], 1 }
 0xc8a   :  { %3867 = vsyncpa [#allocation11 + $0x1], 1 }
 0xc8b   :  { %3868 = vsyncpa [#allocation14], 1 }
 0xc8c   :  { %3870 = vsyncpa [#allocation14 + $0x1], 1 }
 0xc8d   :  { %3871 = vsyncpa [#allocation6], 1 }
 0xc8e   :  { %3873 = vsyncpa [#allocation6 + $0x1], 1 }
 0xc8f   :  { %3874 = vsyncpa [#allocation18], 1 }
 0xc90   :  { %3876 = vsyncpa [#allocation18 + $0x1], 1 }

</bundles_post_ra>
